<compile_context>
chip_gen: v5e
topology: v5e:2x2
jax: 0.10.0
libtpu: 0.0.40
codegen_flags: <defaults>
</compile_context>

<pallas_src>
import functools
import math

import jax
import jax.numpy as jnp
from jax import lax
from jax.experimental import pallas as pl
from jax.experimental.pallas import tpu as pltpu  # noqa: F401  (TPU backend)

# ----------------------------- tiny BERT config ------------------------------
VOCAB = 128
TYPE_VOCAB = 2
TYPE_PAD = 8              # type-embedding table padded to 8 rows (sublane tile)
MAX_POS = 64
HIDDEN = 32
HEADS = 2
HEAD_DIM = HIDDEN // HEADS
FFN = 4 * HIDDEN
LAYERS = 2
LN_EPS = 1e-12
POOLING = "first_last"    # args.pooling in the reference script

_ATTN_SCALE = 1.0 / math.sqrt(HEAD_DIM)
_PER_LAYER_REFS = 12


# ----------------------------- in-kernel helpers ------------------------------
def _layer_norm(x, g, b):
    mu = jnp.mean(x, axis=-1, keepdims=True)
    var = jnp.mean(jnp.square(x - mu), axis=-1, keepdims=True)
    return (x - mu) * lax.rsqrt(var + LN_EPS) * g + b


def _erf(x):
    # Abramowitz & Stegun 7.1.26, |abs err| < 1.5e-7: exact erf-GELU to f32
    # precision without relying on an erf primitive lowering (only exp + VPU).
    a1, a2, a3, a4, a5 = (0.254829592, -0.284496736, 1.421413741,
                          -1.453152027, 1.061405429)
    p = 0.3275911
    ax = jnp.abs(x)
    t = 1.0 / (1.0 + p * ax)
    poly = ((((a5 * t + a4) * t + a3) * t + a2) * t + a1) * t
    y = 1.0 - poly * jnp.exp(-ax * ax)
    return jnp.where(x >= 0.0, y, -y)


def _gelu(x):  # exact erf-GELU (HF BERT default)
    return 0.5 * x * (1.0 + _erf(x * 0.7071067811865476))


def _matmul(a, b):
    return jnp.dot(a, b, preferred_element_type=jnp.float32)


# --------------------------- the fused BERT kernel ----------------------------
def _bert_fused_kernel(ids_ref, type_ref, pos_ref, mask_ref,
                       wemb_ref, pemb_ref, temb_ref, eg_ref, eb_ref,
                       *rest, batch, seq):
    pooled_ref, cls_ref = rest[-2], rest[-1]
    layer_refs = rest[:-2]
    bs = batch * seq

    def one_hot(idx, depth):  # idx: (bs, 1) int32 -> (bs, depth) f32
        cols = lax.broadcasted_iota(jnp.int32, (bs, depth), 1)
        return jnp.where(cols == idx, 1.0, 0.0).astype(jnp.float32)

    # Embedding "gathers" as one-hot matmuls (MXU-friendly, no dynamic gather).
    emb = (_matmul(one_hot(ids_ref[...], VOCAB), wemb_ref[...])
           + _matmul(one_hot(pos_ref[...], MAX_POS), pemb_ref[...])
           + _matmul(one_hot(type_ref[...], TYPE_PAD), temb_ref[...]))
    h = _layer_norm(emb, eg_ref[...], eb_ref[...])                 # (bs, H)

    # HF-style additive attention mask: (1 - mask) * -10000, one row per batch.
    bias = (1.0 - mask_ref[...].astype(jnp.float32)) * -10000.0    # (batch, seq)

    h_first_layer = None
    for l in range(LAYERS):
        (wqkv, bqkv, wo, bo, ln1g, ln1b,
         wi, bi, wo2, bo2, ln2g, ln2b) = layer_refs[l * _PER_LAYER_REFS:
                                                    (l + 1) * _PER_LAYER_REFS]

        # Fused QKV projection: one (bs, H) @ (H, 3H) matmul.
        qkv = _matmul(h, wqkv[...]) + bqkv[...]                    # (bs, 3H)
        q = qkv[:, 0:HIDDEN]
        k = qkv[:, HIDDEN:2 * HIDDEN]
        v = qkv[:, 2 * HIDDEN:3 * HIDDEN]

        # Attention for every (batch, head) pair inside the same body,
        # using static slices; heads merged back lane-dense.
        batch_ctx = []
        for b in range(batch):
            r0, r1 = b * seq, (b + 1) * seq
            bias_b = bias[b:b + 1, :]                              # (1, seq)
            head_ctx = []
            for hh in range(HEADS):
                c0, c1 = hh * HEAD_DIM, (hh + 1) * HEAD_DIM
                qh = q[r0:r1, c0:c1]                               # (seq, D)
                kh = k[r0:r1, c0:c1]
                vh = v[r0:r1, c0:c1]
                # q @ k^T via dot_general contracting last dims (no transpose).
                s = lax.dot_general(qh, kh, (((1,), (1,)), ((), ())),
                                    preferred_element_type=jnp.float32)
                s = s * _ATTN_SCALE + bias_b
                s = s - jnp.max(s, axis=-1, keepdims=True)
                p = jnp.exp(s)
                p = p / jnp.sum(p, axis=-1, keepdims=True)
                head_ctx.append(_matmul(p, vh))                    # (seq, D)
            batch_ctx.append(jnp.concatenate(head_ctx, axis=1))    # (seq, H)
        ctx = jnp.concatenate(batch_ctx, axis=0)                   # (bs, H)

        attn_out = _matmul(ctx, wo[...]) + bo[...]
        h = _layer_norm(attn_out + h, ln1g[...], ln1b[...])

        ffn = _gelu(_matmul(h, wi[...]) + bi[...])
        ffn = _matmul(ffn, wo2[...]) + bo2[...]
        h = _layer_norm(ffn + h, ln2g[...], ln2b[...])

        if l == 0:
            h_first_layer = h                # hidden_states[1] in HF numbering

    # first_last pooling: (hidden_states[-1] + hidden_states[1]).mean(dim=1)
    s = h + h_first_layer
    pooled = jnp.concatenate(
        [jnp.mean(s[b * seq:(b + 1) * seq, :], axis=0, keepdims=True)
         for b in range(batch)], axis=0)                           # (batch, H)
    pooled_ref[...] = pooled.astype(pooled_ref.dtype)

    # 'cls' branch of the reference script: output[0][:, -1, :] (last token).
    cls_rows = jnp.concatenate(
        [h[b * seq + seq - 1: b * seq + seq, :] for b in range(batch)], axis=0)
    cls_ref[...] = cls_rows.astype(cls_ref.dtype)


# ------------------------------ parameters -----------------------------------
def init_params(key):
    keys = iter(jax.random.split(key, 64))

    def dense(shape):
        return jax.random.normal(next(keys), shape, jnp.float32) * 0.02

    type_emb = jnp.zeros((TYPE_PAD, HIDDEN), jnp.float32)
    type_emb = type_emb.at[:TYPE_VOCAB].set(dense((TYPE_VOCAB, HIDDEN)))

    params = {
        "word_emb": dense((VOCAB, HIDDEN)),
        "pos_emb": dense((MAX_POS, HIDDEN)),
        "type_emb": type_emb,                                   # padded rows
        "emb_ln_g": jnp.ones((HIDDEN,), jnp.float32),
        "emb_ln_b": jnp.zeros((HIDDEN,), jnp.float32),
        "layers": [],
    }
    for _ in range(LAYERS):
        params["layers"].append({
            # fused QKV projection: concat of Wq | Wk | Wv along output dim
            "wqkv": dense((HIDDEN, 3 * HIDDEN)),
            "bqkv": jnp.zeros((3 * HIDDEN,), jnp.float32),
            "wo": dense((HIDDEN, HIDDEN)), "bo": jnp.zeros((HIDDEN,), jnp.float32),
            "attn_ln_g": jnp.ones((HIDDEN,), jnp.float32),
            "attn_ln_b": jnp.zeros((HIDDEN,), jnp.float32),
            "wi": dense((HIDDEN, FFN)), "bi": jnp.zeros((FFN,), jnp.float32),
            "wo2": dense((FFN, HIDDEN)), "bo2": jnp.zeros((HIDDEN,), jnp.float32),
            "ffn_ln_g": jnp.ones((HIDDEN,), jnp.float32),
            "ffn_ln_b": jnp.zeros((HIDDEN,), jnp.float32),
        })
    return params


# ------------------------------ model forward --------------------------------
def _full_spec(shape):
    ndim = len(shape)
    return pl.BlockSpec(shape, lambda i, _n=ndim: (0,) * _n)


def model_forward(params, input_ids, attention_mask, token_type_ids,
                  pooling=POOLING):
    B, S = input_ids.shape
    BS = B * S

    ids = input_ids.reshape(BS, 1).astype(jnp.int32)
    types = token_type_ids.reshape(BS, 1).astype(jnp.int32)
    pos = jnp.tile(jnp.arange(S, dtype=jnp.int32), B).reshape(BS, 1)
    mask = attention_mask.astype(jnp.int32)

    def row(v):  # 1-D param vector -> (1, N) for lane-major broadcast in-kernel
        return v.reshape(1, -1)

    inputs = [ids, types, pos, mask,
              params["word_emb"], params["pos_emb"], params["type_emb"],
              row(params["emb_ln_g"]), row(params["emb_ln_b"])]
    for lyr in params["layers"]:
        inputs += [lyr["wqkv"], row(lyr["bqkv"]),
                   lyr["wo"], row(lyr["bo"]),
                   row(lyr["attn_ln_g"]), row(lyr["attn_ln_b"]),
                   lyr["wi"], row(lyr["bi"]),
                   lyr["wo2"], row(lyr["bo2"]),
                   row(lyr["ffn_ln_g"]), row(lyr["ffn_ln_b"])]

    out_spec = _full_spec((B, HIDDEN))
    pooled, cls_last = pl.pallas_call(
        functools.partial(_bert_fused_kernel, batch=B, seq=S),
        grid=(1,),
        in_specs=[_full_spec(x.shape) for x in inputs],
        out_specs=(out_spec, out_spec),
        out_shape=(jax.ShapeDtypeStruct((B, HIDDEN), jnp.float32),
                   jax.ShapeDtypeStruct((B, HIDDEN), jnp.float32)),
    )(*inputs)

    if pooling == "first_last":
        # (hidden_states[-1] + hidden_states[1]).mean(dim=1)
        return pooled
    elif pooling == "cls":
        # output[0][:, -1, :] in the reference script
        return cls_last
    raise ValueError(f"unknown pooling {pooling}")


# ----------------------------------- main -------------------------------------
if __name__ == "__main__":
    key = jax.random.PRNGKey(0)
    pkey, idkey = jax.random.split(key)

    B, S = 2, 8
    params = init_params(pkey)
    input_ids = jax.random.randint(idkey, (B, S), 0, VOCAB, dtype=jnp.int32)
    attention_mask = jnp.ones((B, S), jnp.int32)
    token_type_ids = jnp.zeros((B, S), jnp.int32)

    out = model_forward(params, input_ids, attention_mask, token_type_ids)
    out = jax.block_until_ready(out)
    assert out.shape == (B, HIDDEN) and out.dtype == jnp.float32
    print("KERNEL_OK")
</pallas_src>

<mosaic_0001>
module attributes {stable_mosaic.version = 11 : i64} {
  func.func @_bert_fused_kernel(%arg0: i32, %arg1: memref<16x1xi32, #tpu.memory_space<vmem>>, %arg2: memref<16x1xi32, #tpu.memory_space<vmem>>, %arg3: memref<16x1xi32, #tpu.memory_space<vmem>>, %arg4: memref<2x8xi32, #tpu.memory_space<vmem>>, %arg5: memref<128x32xf32, #tpu.memory_space<vmem>>, %arg6: memref<64x32xf32, #tpu.memory_space<vmem>>, %arg7: memref<8x32xf32, #tpu.memory_space<vmem>>, %arg8: memref<1x32xf32, #tpu.memory_space<vmem>>, %arg9: memref<1x32xf32, #tpu.memory_space<vmem>>, %arg10: memref<32x96xf32, #tpu.memory_space<vmem>>, %arg11: memref<1x96xf32, #tpu.memory_space<vmem>>, %arg12: memref<32x32xf32, #tpu.memory_space<vmem>>, %arg13: memref<1x32xf32, #tpu.memory_space<vmem>>, %arg14: memref<1x32xf32, #tpu.memory_space<vmem>>, %arg15: memref<1x32xf32, #tpu.memory_space<vmem>>, %arg16: memref<32x128xf32, #tpu.memory_space<vmem>>, %arg17: memref<1x128xf32, #tpu.memory_space<vmem>>, %arg18: memref<128x32xf32, #tpu.memory_space<vmem>>, %arg19: memref<1x32xf32, #tpu.memory_space<vmem>>, %arg20: memref<1x32xf32, #tpu.memory_space<vmem>>, %arg21: memref<1x32xf32, #tpu.memory_space<vmem>>, %arg22: memref<32x96xf32, #tpu.memory_space<vmem>>, %arg23: memref<1x96xf32, #tpu.memory_space<vmem>>, %arg24: memref<32x32xf32, #tpu.memory_space<vmem>>, %arg25: memref<1x32xf32, #tpu.memory_space<vmem>>, %arg26: memref<1x32xf32, #tpu.memory_space<vmem>>, %arg27: memref<1x32xf32, #tpu.memory_space<vmem>>, %arg28: memref<32x128xf32, #tpu.memory_space<vmem>>, %arg29: memref<1x128xf32, #tpu.memory_space<vmem>>, %arg30: memref<128x32xf32, #tpu.memory_space<vmem>>, %arg31: memref<1x32xf32, #tpu.memory_space<vmem>>, %arg32: memref<1x32xf32, #tpu.memory_space<vmem>>, %arg33: memref<1x32xf32, #tpu.memory_space<vmem>>, %arg34: memref<2x32xf32, #tpu.memory_space<vmem>>, %arg35: memref<2x32xf32, #tpu.memory_space<vmem>>) attributes {dimension_semantics = [#tpu.dimension_semantics<arbitrary>], iteration_bounds = array<i64: 1>, scalar_prefetch = 0 : i64, scratch_operands = 0 : i64, tpu.core_type = #tpu.core_type<tc>, window_params = [{pipeline_mode = #tpu.pipeline_mode<synchronous>, transform_indices = @transform_0, window_bounds = array<i64: 16, 1>}, {pipeline_mode = #tpu.pipeline_mode<synchronous>, transform_indices = @transform_1, window_bounds = array<i64: 16, 1>}, {pipeline_mode = #tpu.pipeline_mode<synchronous>, transform_indices = @transform_2, window_bounds = array<i64: 16, 1>}, {pipeline_mode = #tpu.pipeline_mode<synchronous>, transform_indices = @transform_3, window_bounds = array<i64: 2, 8>}, {pipeline_mode = #tpu.pipeline_mode<synchronous>, transform_indices = @transform_4, window_bounds = array<i64: 128, 32>}, {pipeline_mode = #tpu.pipeline_mode<synchronous>, transform_indices = @transform_5, window_bounds = array<i64: 64, 32>}, {pipeline_mode = #tpu.pipeline_mode<synchronous>, transform_indices = @transform_6, window_bounds = array<i64: 8, 32>}, {pipeline_mode = #tpu.pipeline_mode<synchronous>, transform_indices = @transform_7, window_bounds = array<i64: 1, 32>}, {pipeline_mode = #tpu.pipeline_mode<synchronous>, transform_indices = @transform_8, window_bounds = array<i64: 1, 32>}, {pipeline_mode = #tpu.pipeline_mode<synchronous>, transform_indices = @transform_9, window_bounds = array<i64: 32, 96>}, {pipeline_mode = #tpu.pipeline_mode<synchronous>, transform_indices = @transform_10, window_bounds = array<i64: 1, 96>}, {pipeline_mode = #tpu.pipeline_mode<synchronous>, transform_indices = @transform_11, window_bounds = array<i64: 32, 32>}, {pipeline_mode = #tpu.pipeline_mode<synchronous>, transform_indices = @transform_12, window_bounds = array<i64: 1, 32>}, {pipeline_mode = #tpu.pipeline_mode<synchronous>, transform_indices = @transform_13, window_bounds = array<i64: 1, 32>}, {pipeline_mode = #tpu.pipeline_mode<synchronous>, transform_indices = @transform_14, window_bounds = array<i64: 1, 32>}, {pipeline_mode = #tpu.pipeline_mode<synchronous>, transform_indices = @transform_15, window_bounds = array<i64: 32, 128>}, {pipeline_mode = #tpu.pipeline_mode<synchronous>, transform_indices = @transform_16, window_bounds = array<i64: 1, 128>}, {pipeline_mode = #tpu.pipeline_mode<synchronous>, transform_indices = @transform_17, window_bounds = array<i64: 128, 32>}, {pipeline_mode = #tpu.pipeline_mode<synchronous>, transform_indices = @transform_18, window_bounds = array<i64: 1, 32>}, {pipeline_mode = #tpu.pipeline_mode<synchronous>, transform_indices = @transform_19, window_bounds = array<i64: 1, 32>}, {pipeline_mode = #tpu.pipeline_mode<synchronous>, transform_indices = @transform_20, window_bounds = array<i64: 1, 32>}, {pipeline_mode = #tpu.pipeline_mode<synchronous>, transform_indices = @transform_21, window_bounds = array<i64: 32, 96>}, {pipeline_mode = #tpu.pipeline_mode<synchronous>, transform_indices = @transform_22, window_bounds = array<i64: 1, 96>}, {pipeline_mode = #tpu.pipeline_mode<synchronous>, transform_indices = @transform_23, window_bounds = array<i64: 32, 32>}, {pipeline_mode = #tpu.pipeline_mode<synchronous>, transform_indices = @transform_24, window_bounds = array<i64: 1, 32>}, {pipeline_mode = #tpu.pipeline_mode<synchronous>, transform_indices = @transform_25, window_bounds = array<i64: 1, 32>}, {pipeline_mode = #tpu.pipeline_mode<synchronous>, transform_indices = @transform_26, window_bounds = array<i64: 1, 32>}, {pipeline_mode = #tpu.pipeline_mode<synchronous>, transform_indices = @transform_27, window_bounds = array<i64: 32, 128>}, {pipeline_mode = #tpu.pipeline_mode<synchronous>, transform_indices = @transform_28, window_bounds = array<i64: 1, 128>}, {pipeline_mode = #tpu.pipeline_mode<synchronous>, transform_indices = @transform_29, window_bounds = array<i64: 128, 32>}, {pipeline_mode = #tpu.pipeline_mode<synchronous>, transform_indices = @transform_30, window_bounds = array<i64: 1, 32>}, {pipeline_mode = #tpu.pipeline_mode<synchronous>, transform_indices = @transform_31, window_bounds = array<i64: 1, 32>}, {pipeline_mode = #tpu.pipeline_mode<synchronous>, transform_indices = @transform_32, window_bounds = array<i64: 1, 32>}, {pipeline_mode = #tpu.pipeline_mode<synchronous>, transform_indices = @transform_33, window_bounds = array<i64: 2, 32>}, {pipeline_mode = #tpu.pipeline_mode<synchronous>, transform_indices = @transform_34, window_bounds = array<i64: 2, 32>}]} {
    %c0 = arith.constant 0 : index
    %c0_0 = arith.constant 0 : index
    %0 = vector.load %arg1[%c0, %c0_0] : memref<16x1xi32, #tpu.memory_space<vmem>>, vector<16x1xi32>
    %1 = tpu.iota {dimensions = array<i32: 1>} : vector<16x128xi32>
    %2 = vector.broadcast %0 : vector<16x1xi32> to vector<16x128xi32>
    %3 = arith.cmpi eq, %1, %2 : vector<16x128xi32>
    %cst = arith.constant 1.000000e+00 : f32
    %cst_1 = arith.constant 0.000000e+00 : f32
    %4 = vector.broadcast %cst : f32 to vector<16x128xf32>
    %5 = vector.broadcast %cst_1 : f32 to vector<16x128xf32>
    %6 = arith.select %3, %4, %5 : vector<16x128xi1>, vector<16x128xf32>
    %c0_2 = arith.constant 0 : index
    %c0_3 = arith.constant 0 : index
    %7 = vector.load %arg5[%c0_2, %c0_3] : memref<128x32xf32, #tpu.memory_space<vmem>>, vector<128x32xf32>
    %cst_4 = arith.constant dense<0.000000e+00> : vector<16x32xf32>
    %8 = tpu.matmul %6, %7, %cst_4 {dimension_numbers = #tpu.dot_dimension_numbers<[1], [0], [0], [1], [0, 0, 1, 1], [], []>} : vector<16x128xf32>, vector<128x32xf32>, vector<16x32xf32> -> vector<16x32xf32>
    %c0_5 = arith.constant 0 : index
    %c0_6 = arith.constant 0 : index
    %9 = vector.load %arg3[%c0_5, %c0_6] : memref<16x1xi32, #tpu.memory_space<vmem>>, vector<16x1xi32>
    %10 = tpu.iota {dimensions = array<i32: 1>} : vector<16x64xi32>
    %11 = vector.broadcast %9 : vector<16x1xi32> to vector<16x64xi32>
    %12 = arith.cmpi eq, %10, %11 : vector<16x64xi32>
    %cst_7 = arith.constant 1.000000e+00 : f32
    %cst_8 = arith.constant 0.000000e+00 : f32
    %13 = vector.broadcast %cst_7 : f32 to vector<16x64xf32>
    %14 = vector.broadcast %cst_8 : f32 to vector<16x64xf32>
    %15 = arith.select %12, %13, %14 : vector<16x64xi1>, vector<16x64xf32>
    %c0_9 = arith.constant 0 : index
    %c0_10 = arith.constant 0 : index
    %16 = vector.load %arg6[%c0_9, %c0_10] : memref<64x32xf32, #tpu.memory_space<vmem>>, vector<64x32xf32>
    %cst_11 = arith.constant dense<0.000000e+00> : vector<16x32xf32>
    %17 = tpu.matmul %15, %16, %cst_11 {dimension_numbers = #tpu.dot_dimension_numbers<[1], [0], [0], [1], [0, 0, 1, 1], [], []>} : vector<16x64xf32>, vector<64x32xf32>, vector<16x32xf32> -> vector<16x32xf32>
    %18 = arith.addf %8, %17 : vector<16x32xf32>
    %c0_12 = arith.constant 0 : index
    %c0_13 = arith.constant 0 : index
    %19 = vector.load %arg2[%c0_12, %c0_13] : memref<16x1xi32, #tpu.memory_space<vmem>>, vector<16x1xi32>
    %20 = tpu.iota {dimensions = array<i32: 1>} : vector<16x8xi32>
    %21 = vector.broadcast %19 : vector<16x1xi32> to vector<16x8xi32>
    %22 = arith.cmpi eq, %20, %21 : vector<16x8xi32>
    %cst_14 = arith.constant 1.000000e+00 : f32
    %cst_15 = arith.constant 0.000000e+00 : f32
    %23 = vector.broadcast %cst_14 : f32 to vector<16x8xf32>
    %24 = vector.broadcast %cst_15 : f32 to vector<16x8xf32>
    %25 = arith.select %22, %23, %24 : vector<16x8xi1>, vector<16x8xf32>
    %c0_16 = arith.constant 0 : index
    %c0_17 = arith.constant 0 : index
    %26 = vector.load %arg7[%c0_16, %c0_17] : memref<8x32xf32, #tpu.memory_space<vmem>>, vector<8x32xf32>
    %cst_18 = arith.constant dense<0.000000e+00> : vector<16x32xf32>
    %27 = tpu.matmul %25, %26, %cst_18 {dimension_numbers = #tpu.dot_dimension_numbers<[1], [0], [0], [1], [0, 0, 1, 1], [], []>} : vector<16x8xf32>, vector<8x32xf32>, vector<16x32xf32> -> vector<16x32xf32>
    %28 = arith.addf %18, %27 : vector<16x32xf32>
    %c0_19 = arith.constant 0 : index
    %c0_20 = arith.constant 0 : index
    %29 = vector.load %arg8[%c0_19, %c0_20] : memref<1x32xf32, #tpu.memory_space<vmem>>, vector<1x32xf32>
    %c0_21 = arith.constant 0 : index
    %c0_22 = arith.constant 0 : index
    %30 = vector.load %arg9[%c0_21, %c0_22] : memref<1x32xf32, #tpu.memory_space<vmem>>, vector<1x32xf32>
    %cst_23 = arith.constant dense<0.000000e+00> : vector<16xf32>
    %31 = vector.multi_reduction <add>, %28, %cst_23 [1] : vector<16x32xf32> to vector<16xf32>
    %32 = vector.shape_cast %31 : vector<16xf32> to vector<16x1xf32>
    %cst_24 = arith.constant 3.200000e+01 : f32
    %33 = vector.broadcast %cst_24 : f32 to vector<16x1xf32>
    %34 = arith.divf %32, %33 : vector<16x1xf32>
    %35 = vector.broadcast %34 : vector<16x1xf32> to vector<16x32xf32>
    %36 = arith.subf %28, %35 : vector<16x32xf32>
    %37 = arith.mulf %36, %36 : vector<16x32xf32>
    %cst_25 = arith.constant dense<0.000000e+00> : vector<16xf32>
    %38 = vector.multi_reduction <add>, %37, %cst_25 [1] : vector<16x32xf32> to vector<16xf32>
    %39 = vector.shape_cast %38 : vector<16xf32> to vector<16x1xf32>
    %cst_26 = arith.constant 3.200000e+01 : f32
    %40 = vector.broadcast %cst_26 : f32 to vector<16x1xf32>
    %41 = arith.divf %39, %40 : vector<16x1xf32>
    %42 = vector.broadcast %34 : vector<16x1xf32> to vector<16x32xf32>
    %43 = arith.subf %28, %42 : vector<16x32xf32>
    %cst_27 = arith.constant 9.99999996E-13 : f32
    %44 = vector.broadcast %cst_27 : f32 to vector<16x1xf32>
    %45 = arith.addf %41, %44 : vector<16x1xf32>
    %46 = math.rsqrt %45 : vector<16x1xf32>
    %47 = vector.broadcast %46 : vector<16x1xf32> to vector<16x32xf32>
    %48 = arith.mulf %43, %47 : vector<16x32xf32>
    %49 = vector.broadcast %29 : vector<1x32xf32> to vector<16x32xf32>
    %50 = arith.mulf %48, %49 : vector<16x32xf32>
    %51 = vector.broadcast %30 : vector<1x32xf32> to vector<16x32xf32>
    %52 = arith.addf %50, %51 : vector<16x32xf32>
    %c0_28 = arith.constant 0 : index
    %c0_29 = arith.constant 0 : index
    %53 = vector.load %arg4[%c0_28, %c0_29] : memref<2x8xi32, #tpu.memory_space<vmem>>, vector<2x8xi32>
    %54 = arith.sitofp %53 : vector<2x8xi32> to vector<2x8xf32>
    %cst_30 = arith.constant 1.000000e+00 : f32
    %55 = vector.broadcast %cst_30 : f32 to vector<2x8xf32>
    %56 = arith.subf %55, %54 : vector<2x8xf32>
    %cst_31 = arith.constant -1.000000e+04 : f32
    %57 = vector.broadcast %cst_31 : f32 to vector<2x8xf32>
    %58 = arith.mulf %56, %57 : vector<2x8xf32>
    %c0_32 = arith.constant 0 : index
    %c0_33 = arith.constant 0 : index
    %59 = vector.load %arg10[%c0_32, %c0_33] : memref<32x96xf32, #tpu.memory_space<vmem>>, vector<32x96xf32>
    %cst_34 = arith.constant dense<0.000000e+00> : vector<16x96xf32>
    %60 = tpu.matmul %52, %59, %cst_34 {dimension_numbers = #tpu.dot_dimension_numbers<[1], [0], [0], [1], [0, 0, 1, 1], [], []>} : vector<16x32xf32>, vector<32x96xf32>, vector<16x96xf32> -> vector<16x96xf32>
    %c0_35 = arith.constant 0 : index
    %c0_36 = arith.constant 0 : index
    %61 = vector.load %arg11[%c0_35, %c0_36] : memref<1x96xf32, #tpu.memory_space<vmem>>, vector<1x96xf32>
    %62 = vector.broadcast %61 : vector<1x96xf32> to vector<16x96xf32>
    %63 = arith.addf %60, %62 : vector<16x96xf32>
    %64 = vector.extract_strided_slice %63 {offsets = [0, 0], sizes = [16, 32], strides = [1, 1]} : vector<16x96xf32> to vector<16x32xf32>
    %65 = vector.extract_strided_slice %63 {offsets = [0, 32], sizes = [16, 32], strides = [1, 1]} : vector<16x96xf32> to vector<16x32xf32>
    %66 = vector.extract_strided_slice %63 {offsets = [0, 64], sizes = [16, 32], strides = [1, 1]} : vector<16x96xf32> to vector<16x32xf32>
    %67 = vector.extract_strided_slice %58 {offsets = [0, 0], sizes = [1, 8], strides = [1, 1]} : vector<2x8xf32> to vector<1x8xf32>
    %68 = vector.extract_strided_slice %64 {offsets = [0, 0], sizes = [8, 16], strides = [1, 1]} : vector<16x32xf32> to vector<8x16xf32>
    %69 = vector.extract_strided_slice %65 {offsets = [0, 0], sizes = [8, 16], strides = [1, 1]} : vector<16x32xf32> to vector<8x16xf32>
    %70 = vector.extract_strided_slice %66 {offsets = [0, 0], sizes = [8, 16], strides = [1, 1]} : vector<16x32xf32> to vector<8x16xf32>
    %cst_37 = arith.constant dense<0.000000e+00> : vector<8x8xf32>
    %71 = tpu.matmul %68, %69, %cst_37 {dimension_numbers = #tpu.dot_dimension_numbers<[1], [1], [0], [0], [0, 0, 1, 0], [], []>} : vector<8x16xf32>, vector<8x16xf32>, vector<8x8xf32> -> vector<8x8xf32>
    %cst_38 = arith.constant 2.500000e-01 : f32
    %72 = vector.broadcast %cst_38 : f32 to vector<8x8xf32>
    %73 = arith.mulf %71, %72 : vector<8x8xf32>
    %74 = vector.broadcast %67 : vector<1x8xf32> to vector<8x8xf32>
    %75 = arith.addf %73, %74 : vector<8x8xf32>
    %cst_39 = arith.constant dense<0xFF800000> : vector<8xf32>
    %76 = vector.multi_reduction <maximumf>, %75, %cst_39 [1] : vector<8x8xf32> to vector<8xf32>
    %77 = vector.shape_cast %76 : vector<8xf32> to vector<8x1xf32>
    %78 = vector.broadcast %77 : vector<8x1xf32> to vector<8x8xf32>
    %79 = arith.subf %75, %78 : vector<8x8xf32>
    %80 = math.exp %79 : vector<8x8xf32>
    %cst_40 = arith.constant dense<0.000000e+00> : vector<8xf32>
    %81 = vector.multi_reduction <add>, %80, %cst_40 [1] : vector<8x8xf32> to vector<8xf32>
    %82 = vector.shape_cast %81 : vector<8xf32> to vector<8x1xf32>
    %83 = vector.broadcast %82 : vector<8x1xf32> to vector<8x8xf32>
    %84 = arith.divf %80, %83 : vector<8x8xf32>
    %cst_41 = arith.constant dense<0.000000e+00> : vector<8x16xf32>
    %85 = tpu.matmul %84, %70, %cst_41 {dimension_numbers = #tpu.dot_dimension_numbers<[1], [0], [0], [1], [0, 0, 1, 1], [], []>} : vector<8x8xf32>, vector<8x16xf32>, vector<8x16xf32> -> vector<8x16xf32>
    %86 = vector.extract_strided_slice %64 {offsets = [0, 16], sizes = [8, 16], strides = [1, 1]} : vector<16x32xf32> to vector<8x16xf32>
    %87 = vector.extract_strided_slice %65 {offsets = [0, 16], sizes = [8, 16], strides = [1, 1]} : vector<16x32xf32> to vector<8x16xf32>
    %88 = vector.extract_strided_slice %66 {offsets = [0, 16], sizes = [8, 16], strides = [1, 1]} : vector<16x32xf32> to vector<8x16xf32>
    %cst_42 = arith.constant dense<0.000000e+00> : vector<8x8xf32>
    %89 = tpu.matmul %86, %87, %cst_42 {dimension_numbers = #tpu.dot_dimension_numbers<[1], [1], [0], [0], [0, 0, 1, 0], [], []>} : vector<8x16xf32>, vector<8x16xf32>, vector<8x8xf32> -> vector<8x8xf32>
    %cst_43 = arith.constant 2.500000e-01 : f32
    %90 = vector.broadcast %cst_43 : f32 to vector<8x8xf32>
    %91 = arith.mulf %89, %90 : vector<8x8xf32>
    %92 = vector.broadcast %67 : vector<1x8xf32> to vector<8x8xf32>
    %93 = arith.addf %91, %92 : vector<8x8xf32>
    %cst_44 = arith.constant dense<0xFF800000> : vector<8xf32>
    %94 = vector.multi_reduction <maximumf>, %93, %cst_44 [1] : vector<8x8xf32> to vector<8xf32>
    %95 = vector.shape_cast %94 : vector<8xf32> to vector<8x1xf32>
    %96 = vector.broadcast %95 : vector<8x1xf32> to vector<8x8xf32>
    %97 = arith.subf %93, %96 : vector<8x8xf32>
    %98 = math.exp %97 : vector<8x8xf32>
    %cst_45 = arith.constant dense<0.000000e+00> : vector<8xf32>
    %99 = vector.multi_reduction <add>, %98, %cst_45 [1] : vector<8x8xf32> to vector<8xf32>
    %100 = vector.shape_cast %99 : vector<8xf32> to vector<8x1xf32>
    %101 = vector.broadcast %100 : vector<8x1xf32> to vector<8x8xf32>
    %102 = arith.divf %98, %101 : vector<8x8xf32>
    %cst_46 = arith.constant dense<0.000000e+00> : vector<8x16xf32>
    %103 = tpu.matmul %102, %88, %cst_46 {dimension_numbers = #tpu.dot_dimension_numbers<[1], [0], [0], [1], [0, 0, 1, 1], [], []>} : vector<8x8xf32>, vector<8x16xf32>, vector<8x16xf32> -> vector<8x16xf32>
    %104 = tpu.concatenate %85, %103 in 1 : vector<8x16xf32>, vector<8x16xf32> -> vector<8x32xf32>
    %105 = vector.extract_strided_slice %58 {offsets = [1, 0], sizes = [1, 8], strides = [1, 1]} : vector<2x8xf32> to vector<1x8xf32>
    %106 = vector.extract_strided_slice %64 {offsets = [8, 0], sizes = [8, 16], strides = [1, 1]} : vector<16x32xf32> to vector<8x16xf32>
    %107 = vector.extract_strided_slice %65 {offsets = [8, 0], sizes = [8, 16], strides = [1, 1]} : vector<16x32xf32> to vector<8x16xf32>
    %108 = vector.extract_strided_slice %66 {offsets = [8, 0], sizes = [8, 16], strides = [1, 1]} : vector<16x32xf32> to vector<8x16xf32>
    %cst_47 = arith.constant dense<0.000000e+00> : vector<8x8xf32>
    %109 = tpu.matmul %106, %107, %cst_47 {dimension_numbers = #tpu.dot_dimension_numbers<[1], [1], [0], [0], [0, 0, 1, 0], [], []>} : vector<8x16xf32>, vector<8x16xf32>, vector<8x8xf32> -> vector<8x8xf32>
    %cst_48 = arith.constant 2.500000e-01 : f32
    %110 = vector.broadcast %cst_48 : f32 to vector<8x8xf32>
    %111 = arith.mulf %109, %110 : vector<8x8xf32>
    %112 = vector.broadcast %105 : vector<1x8xf32> to vector<8x8xf32>
    %113 = arith.addf %111, %112 : vector<8x8xf32>
    %cst_49 = arith.constant dense<0xFF800000> : vector<8xf32>
    %114 = vector.multi_reduction <maximumf>, %113, %cst_49 [1] : vector<8x8xf32> to vector<8xf32>
    %115 = vector.shape_cast %114 : vector<8xf32> to vector<8x1xf32>
    %116 = vector.broadcast %115 : vector<8x1xf32> to vector<8x8xf32>
    %117 = arith.subf %113, %116 : vector<8x8xf32>
    %118 = math.exp %117 : vector<8x8xf32>
    %cst_50 = arith.constant dense<0.000000e+00> : vector<8xf32>
    %119 = vector.multi_reduction <add>, %118, %cst_50 [1] : vector<8x8xf32> to vector<8xf32>
    %120 = vector.shape_cast %119 : vector<8xf32> to vector<8x1xf32>
    %121 = vector.broadcast %120 : vector<8x1xf32> to vector<8x8xf32>
    %122 = arith.divf %118, %121 : vector<8x8xf32>
    %cst_51 = arith.constant dense<0.000000e+00> : vector<8x16xf32>
    %123 = tpu.matmul %122, %108, %cst_51 {dimension_numbers = #tpu.dot_dimension_numbers<[1], [0], [0], [1], [0, 0, 1, 1], [], []>} : vector<8x8xf32>, vector<8x16xf32>, vector<8x16xf32> -> vector<8x16xf32>
    %124 = vector.extract_strided_slice %64 {offsets = [8, 16], sizes = [8, 16], strides = [1, 1]} : vector<16x32xf32> to vector<8x16xf32>
    %125 = vector.extract_strided_slice %65 {offsets = [8, 16], sizes = [8, 16], strides = [1, 1]} : vector<16x32xf32> to vector<8x16xf32>
    %126 = vector.extract_strided_slice %66 {offsets = [8, 16], sizes = [8, 16], strides = [1, 1]} : vector<16x32xf32> to vector<8x16xf32>
    %cst_52 = arith.constant dense<0.000000e+00> : vector<8x8xf32>
    %127 = tpu.matmul %124, %125, %cst_52 {dimension_numbers = #tpu.dot_dimension_numbers<[1], [1], [0], [0], [0, 0, 1, 0], [], []>} : vector<8x16xf32>, vector<8x16xf32>, vector<8x8xf32> -> vector<8x8xf32>
    %cst_53 = arith.constant 2.500000e-01 : f32
    %128 = vector.broadcast %cst_53 : f32 to vector<8x8xf32>
    %129 = arith.mulf %127, %128 : vector<8x8xf32>
    %130 = vector.broadcast %105 : vector<1x8xf32> to vector<8x8xf32>
    %131 = arith.addf %129, %130 : vector<8x8xf32>
    %cst_54 = arith.constant dense<0xFF800000> : vector<8xf32>
    %132 = vector.multi_reduction <maximumf>, %131, %cst_54 [1] : vector<8x8xf32> to vector<8xf32>
    %133 = vector.shape_cast %132 : vector<8xf32> to vector<8x1xf32>
    %134 = vector.broadcast %133 : vector<8x1xf32> to vector<8x8xf32>
    %135 = arith.subf %131, %134 : vector<8x8xf32>
    %136 = math.exp %135 : vector<8x8xf32>
    %cst_55 = arith.constant dense<0.000000e+00> : vector<8xf32>
    %137 = vector.multi_reduction <add>, %136, %cst_55 [1] : vector<8x8xf32> to vector<8xf32>
    %138 = vector.shape_cast %137 : vector<8xf32> to vector<8x1xf32>
    %139 = vector.broadcast %138 : vector<8x1xf32> to vector<8x8xf32>
    %140 = arith.divf %136, %139 : vector<8x8xf32>
    %cst_56 = arith.constant dense<0.000000e+00> : vector<8x16xf32>
    %141 = tpu.matmul %140, %126, %cst_56 {dimension_numbers = #tpu.dot_dimension_numbers<[1], [0], [0], [1], [0, 0, 1, 1], [], []>} : vector<8x8xf32>, vector<8x16xf32>, vector<8x16xf32> -> vector<8x16xf32>
    %142 = tpu.concatenate %123, %141 in 1 : vector<8x16xf32>, vector<8x16xf32> -> vector<8x32xf32>
    %143 = tpu.concatenate %104, %142 in 0 : vector<8x32xf32>, vector<8x32xf32> -> vector<16x32xf32>
    %c0_57 = arith.constant 0 : index
    %c0_58 = arith.constant 0 : index
    %144 = vector.load %arg12[%c0_57, %c0_58] : memref<32x32xf32, #tpu.memory_space<vmem>>, vector<32x32xf32>
    %cst_59 = arith.constant dense<0.000000e+00> : vector<16x32xf32>
    %145 = tpu.matmul %143, %144, %cst_59 {dimension_numbers = #tpu.dot_dimension_numbers<[1], [0], [0], [1], [0, 0, 1, 1], [], []>} : vector<16x32xf32>, vector<32x32xf32>, vector<16x32xf32> -> vector<16x32xf32>
    %c0_60 = arith.constant 0 : index
    %c0_61 = arith.constant 0 : index
    %146 = vector.load %arg13[%c0_60, %c0_61] : memref<1x32xf32, #tpu.memory_space<vmem>>, vector<1x32xf32>
    %147 = vector.broadcast %146 : vector<1x32xf32> to vector<16x32xf32>
    %148 = arith.addf %145, %147 : vector<16x32xf32>
    %149 = arith.addf %148, %52 : vector<16x32xf32>
    %c0_62 = arith.constant 0 : index
    %c0_63 = arith.constant 0 : index
    %150 = vector.load %arg14[%c0_62, %c0_63] : memref<1x32xf32, #tpu.memory_space<vmem>>, vector<1x32xf32>
    %c0_64 = arith.constant 0 : index
    %c0_65 = arith.constant 0 : index
    %151 = vector.load %arg15[%c0_64, %c0_65] : memref<1x32xf32, #tpu.memory_space<vmem>>, vector<1x32xf32>
    %cst_66 = arith.constant dense<0.000000e+00> : vector<16xf32>
    %152 = vector.multi_reduction <add>, %149, %cst_66 [1] : vector<16x32xf32> to vector<16xf32>
    %153 = vector.shape_cast %152 : vector<16xf32> to vector<16x1xf32>
    %cst_67 = arith.constant 3.200000e+01 : f32
    %154 = vector.broadcast %cst_67 : f32 to vector<16x1xf32>
    %155 = arith.divf %153, %154 : vector<16x1xf32>
    %156 = vector.broadcast %155 : vector<16x1xf32> to vector<16x32xf32>
    %157 = arith.subf %149, %156 : vector<16x32xf32>
    %158 = arith.mulf %157, %157 : vector<16x32xf32>
    %cst_68 = arith.constant dense<0.000000e+00> : vector<16xf32>
    %159 = vector.multi_reduction <add>, %158, %cst_68 [1] : vector<16x32xf32> to vector<16xf32>
    %160 = vector.shape_cast %159 : vector<16xf32> to vector<16x1xf32>
    %cst_69 = arith.constant 3.200000e+01 : f32
    %161 = vector.broadcast %cst_69 : f32 to vector<16x1xf32>
    %162 = arith.divf %160, %161 : vector<16x1xf32>
    %163 = vector.broadcast %155 : vector<16x1xf32> to vector<16x32xf32>
    %164 = arith.subf %149, %163 : vector<16x32xf32>
    %cst_70 = arith.constant 9.99999996E-13 : f32
    %165 = vector.broadcast %cst_70 : f32 to vector<16x1xf32>
    %166 = arith.addf %162, %165 : vector<16x1xf32>
    %167 = math.rsqrt %166 : vector<16x1xf32>
    %168 = vector.broadcast %167 : vector<16x1xf32> to vector<16x32xf32>
    %169 = arith.mulf %164, %168 : vector<16x32xf32>
    %170 = vector.broadcast %150 : vector<1x32xf32> to vector<16x32xf32>
    %171 = arith.mulf %169, %170 : vector<16x32xf32>
    %172 = vector.broadcast %151 : vector<1x32xf32> to vector<16x32xf32>
    %173 = arith.addf %171, %172 : vector<16x32xf32>
    %c0_71 = arith.constant 0 : index
    %c0_72 = arith.constant 0 : index
    %174 = vector.load %arg16[%c0_71, %c0_72] : memref<32x128xf32, #tpu.memory_space<vmem>>, vector<32x128xf32>
    %cst_73 = arith.constant dense<0.000000e+00> : vector<16x128xf32>
    %175 = tpu.matmul %173, %174, %cst_73 {dimension_numbers = #tpu.dot_dimension_numbers<[1], [0], [0], [1], [0, 0, 1, 1], [], []>} : vector<16x32xf32>, vector<32x128xf32>, vector<16x128xf32> -> vector<16x128xf32>
    %c0_74 = arith.constant 0 : index
    %c0_75 = arith.constant 0 : index
    %176 = vector.load %arg17[%c0_74, %c0_75] : memref<1x128xf32, #tpu.memory_space<vmem>>, vector<1x128xf32>
    %177 = vector.broadcast %176 : vector<1x128xf32> to vector<16x128xf32>
    %178 = arith.addf %175, %177 : vector<16x128xf32>
    %cst_76 = arith.constant 5.000000e-01 : f32
    %179 = vector.broadcast %cst_76 : f32 to vector<16x128xf32>
    %180 = arith.mulf %179, %178 : vector<16x128xf32>
    %cst_77 = arith.constant 0.707106769 : f32
    %181 = vector.broadcast %cst_77 : f32 to vector<16x128xf32>
    %182 = arith.mulf %178, %181 : vector<16x128xf32>
    %183 = math.absf %182 : vector<16x128xf32>
    %cst_78 = arith.constant 0.327591091 : f32
    %184 = vector.broadcast %cst_78 : f32 to vector<16x128xf32>
    %185 = arith.mulf %184, %183 : vector<16x128xf32>
    %cst_79 = arith.constant 1.000000e+00 : f32
    %186 = vector.broadcast %cst_79 : f32 to vector<16x128xf32>
    %187 = arith.addf %186, %185 : vector<16x128xf32>
    %cst_80 = arith.constant 1.000000e+00 : f32
    %188 = vector.broadcast %cst_80 : f32 to vector<16x128xf32>
    %189 = arith.divf %188, %187 : vector<16x128xf32>
    %cst_81 = arith.constant 1.06140542 : f32
    %190 = vector.broadcast %cst_81 : f32 to vector<16x128xf32>
    %191 = arith.mulf %190, %189 : vector<16x128xf32>
    %cst_82 = arith.constant -1.45315206 : f32
    %192 = vector.broadcast %cst_82 : f32 to vector<16x128xf32>
    %193 = arith.addf %191, %192 : vector<16x128xf32>
    %194 = arith.mulf %193, %189 : vector<16x128xf32>
    %cst_83 = arith.constant 1.42141378 : f32
    %195 = vector.broadcast %cst_83 : f32 to vector<16x128xf32>
    %196 = arith.addf %194, %195 : vector<16x128xf32>
    %197 = arith.mulf %196, %189 : vector<16x128xf32>
    %cst_84 = arith.constant -0.284496725 : f32
    %198 = vector.broadcast %cst_84 : f32 to vector<16x128xf32>
    %199 = arith.addf %197, %198 : vector<16x128xf32>
    %200 = arith.mulf %199, %189 : vector<16x128xf32>
    %cst_85 = arith.constant 0.254829586 : f32
    %201 = vector.broadcast %cst_85 : f32 to vector<16x128xf32>
    %202 = arith.addf %200, %201 : vector<16x128xf32>
    %203 = arith.mulf %202, %189 : vector<16x128xf32>
    %cst_86 = arith.constant 0.000000e+00 : f32
    %204 = vector.broadcast %cst_86 : f32 to vector<16x128xf32>
    %205 = arith.subf %204, %183 : vector<16x128xf32>
    %206 = arith.mulf %205, %183 : vector<16x128xf32>
    %207 = math.exp %206 : vector<16x128xf32>
    %208 = arith.mulf %203, %207 : vector<16x128xf32>
    %cst_87 = arith.constant 1.000000e+00 : f32
    %209 = vector.broadcast %cst_87 : f32 to vector<16x128xf32>
    %210 = arith.subf %209, %208 : vector<16x128xf32>
    %cst_88 = arith.constant 0.000000e+00 : f32
    %211 = vector.broadcast %cst_88 : f32 to vector<16x128xf32>
    %212 = arith.cmpf oge, %182, %211 : vector<16x128xf32>
    %cst_89 = arith.constant 0.000000e+00 : f32
    %213 = vector.broadcast %cst_89 : f32 to vector<16x128xf32>
    %214 = arith.subf %213, %210 : vector<16x128xf32>
    %215 = arith.select %212, %210, %214 : vector<16x128xi1>, vector<16x128xf32>
    %cst_90 = arith.constant 1.000000e+00 : f32
    %216 = vector.broadcast %cst_90 : f32 to vector<16x128xf32>
    %217 = arith.addf %216, %215 : vector<16x128xf32>
    %218 = arith.mulf %180, %217 : vector<16x128xf32>
    %c0_91 = arith.constant 0 : index
    %c0_92 = arith.constant 0 : index
    %219 = vector.load %arg18[%c0_91, %c0_92] : memref<128x32xf32, #tpu.memory_space<vmem>>, vector<128x32xf32>
    %cst_93 = arith.constant dense<0.000000e+00> : vector<16x32xf32>
    %220 = tpu.matmul %218, %219, %cst_93 {dimension_numbers = #tpu.dot_dimension_numbers<[1], [0], [0], [1], [0, 0, 1, 1], [], []>} : vector<16x128xf32>, vector<128x32xf32>, vector<16x32xf32> -> vector<16x32xf32>
    %c0_94 = arith.constant 0 : index
    %c0_95 = arith.constant 0 : index
    %221 = vector.load %arg19[%c0_94, %c0_95] : memref<1x32xf32, #tpu.memory_space<vmem>>, vector<1x32xf32>
    %222 = vector.broadcast %221 : vector<1x32xf32> to vector<16x32xf32>
    %223 = arith.addf %220, %222 : vector<16x32xf32>
    %224 = arith.addf %223, %173 : vector<16x32xf32>
    %c0_96 = arith.constant 0 : index
    %c0_97 = arith.constant 0 : index
    %225 = vector.load %arg20[%c0_96, %c0_97] : memref<1x32xf32, #tpu.memory_space<vmem>>, vector<1x32xf32>
    %c0_98 = arith.constant 0 : index
    %c0_99 = arith.constant 0 : index
    %226 = vector.load %arg21[%c0_98, %c0_99] : memref<1x32xf32, #tpu.memory_space<vmem>>, vector<1x32xf32>
    %cst_100 = arith.constant dense<0.000000e+00> : vector<16xf32>
    %227 = vector.multi_reduction <add>, %224, %cst_100 [1] : vector<16x32xf32> to vector<16xf32>
    %228 = vector.shape_cast %227 : vector<16xf32> to vector<16x1xf32>
    %cst_101 = arith.constant 3.200000e+01 : f32
    %229 = vector.broadcast %cst_101 : f32 to vector<16x1xf32>
    %230 = arith.divf %228, %229 : vector<16x1xf32>
    %231 = vector.broadcast %230 : vector<16x1xf32> to vector<16x32xf32>
    %232 = arith.subf %224, %231 : vector<16x32xf32>
    %233 = arith.mulf %232, %232 : vector<16x32xf32>
    %cst_102 = arith.constant dense<0.000000e+00> : vector<16xf32>
    %234 = vector.multi_reduction <add>, %233, %cst_102 [1] : vector<16x32xf32> to vector<16xf32>
    %235 = vector.shape_cast %234 : vector<16xf32> to vector<16x1xf32>
    %cst_103 = arith.constant 3.200000e+01 : f32
    %236 = vector.broadcast %cst_103 : f32 to vector<16x1xf32>
    %237 = arith.divf %235, %236 : vector<16x1xf32>
    %238 = vector.broadcast %230 : vector<16x1xf32> to vector<16x32xf32>
    %239 = arith.subf %224, %238 : vector<16x32xf32>
    %cst_104 = arith.constant 9.99999996E-13 : f32
    %240 = vector.broadcast %cst_104 : f32 to vector<16x1xf32>
    %241 = arith.addf %237, %240 : vector<16x1xf32>
    %242 = math.rsqrt %241 : vector<16x1xf32>
    %243 = vector.broadcast %242 : vector<16x1xf32> to vector<16x32xf32>
    %244 = arith.mulf %239, %243 : vector<16x32xf32>
    %245 = vector.broadcast %225 : vector<1x32xf32> to vector<16x32xf32>
    %246 = arith.mulf %244, %245 : vector<16x32xf32>
    %247 = vector.broadcast %226 : vector<1x32xf32> to vector<16x32xf32>
    %248 = arith.addf %246, %247 : vector<16x32xf32>
    %c0_105 = arith.constant 0 : index
    %c0_106 = arith.constant 0 : index
    %249 = vector.load %arg22[%c0_105, %c0_106] : memref<32x96xf32, #tpu.memory_space<vmem>>, vector<32x96xf32>
    %cst_107 = arith.constant dense<0.000000e+00> : vector<16x96xf32>
    %250 = tpu.matmul %248, %249, %cst_107 {dimension_numbers = #tpu.dot_dimension_numbers<[1], [0], [0], [1], [0, 0, 1, 1], [], []>} : vector<16x32xf32>, vector<32x96xf32>, vector<16x96xf32> -> vector<16x96xf32>
    %c0_108 = arith.constant 0 : index
    %c0_109 = arith.constant 0 : index
    %251 = vector.load %arg23[%c0_108, %c0_109] : memref<1x96xf32, #tpu.memory_space<vmem>>, vector<1x96xf32>
    %252 = vector.broadcast %251 : vector<1x96xf32> to vector<16x96xf32>
    %253 = arith.addf %250, %252 : vector<16x96xf32>
    %254 = vector.extract_strided_slice %253 {offsets = [0, 0], sizes = [16, 32], strides = [1, 1]} : vector<16x96xf32> to vector<16x32xf32>
    %255 = vector.extract_strided_slice %253 {offsets = [0, 32], sizes = [16, 32], strides = [1, 1]} : vector<16x96xf32> to vector<16x32xf32>
    %256 = vector.extract_strided_slice %253 {offsets = [0, 64], sizes = [16, 32], strides = [1, 1]} : vector<16x96xf32> to vector<16x32xf32>
    %257 = vector.extract_strided_slice %58 {offsets = [0, 0], sizes = [1, 8], strides = [1, 1]} : vector<2x8xf32> to vector<1x8xf32>
    %258 = vector.extract_strided_slice %254 {offsets = [0, 0], sizes = [8, 16], strides = [1, 1]} : vector<16x32xf32> to vector<8x16xf32>
    %259 = vector.extract_strided_slice %255 {offsets = [0, 0], sizes = [8, 16], strides = [1, 1]} : vector<16x32xf32> to vector<8x16xf32>
    %260 = vector.extract_strided_slice %256 {offsets = [0, 0], sizes = [8, 16], strides = [1, 1]} : vector<16x32xf32> to vector<8x16xf32>
    %cst_110 = arith.constant dense<0.000000e+00> : vector<8x8xf32>
    %261 = tpu.matmul %258, %259, %cst_110 {dimension_numbers = #tpu.dot_dimension_numbers<[1], [1], [0], [0], [0, 0, 1, 0], [], []>} : vector<8x16xf32>, vector<8x16xf32>, vector<8x8xf32> -> vector<8x8xf32>
    %cst_111 = arith.constant 2.500000e-01 : f32
    %262 = vector.broadcast %cst_111 : f32 to vector<8x8xf32>
    %263 = arith.mulf %261, %262 : vector<8x8xf32>
    %264 = vector.broadcast %257 : vector<1x8xf32> to vector<8x8xf32>
    %265 = arith.addf %263, %264 : vector<8x8xf32>
    %cst_112 = arith.constant dense<0xFF800000> : vector<8xf32>
    %266 = vector.multi_reduction <maximumf>, %265, %cst_112 [1] : vector<8x8xf32> to vector<8xf32>
    %267 = vector.shape_cast %266 : vector<8xf32> to vector<8x1xf32>
    %268 = vector.broadcast %267 : vector<8x1xf32> to vector<8x8xf32>
    %269 = arith.subf %265, %268 : vector<8x8xf32>
    %270 = math.exp %269 : vector<8x8xf32>
    %cst_113 = arith.constant dense<0.000000e+00> : vector<8xf32>
    %271 = vector.multi_reduction <add>, %270, %cst_113 [1] : vector<8x8xf32> to vector<8xf32>
    %272 = vector.shape_cast %271 : vector<8xf32> to vector<8x1xf32>
    %273 = vector.broadcast %272 : vector<8x1xf32> to vector<8x8xf32>
    %274 = arith.divf %270, %273 : vector<8x8xf32>
    %cst_114 = arith.constant dense<0.000000e+00> : vector<8x16xf32>
    %275 = tpu.matmul %274, %260, %cst_114 {dimension_numbers = #tpu.dot_dimension_numbers<[1], [0], [0], [1], [0, 0, 1, 1], [], []>} : vector<8x8xf32>, vector<8x16xf32>, vector<8x16xf32> -> vector<8x16xf32>
    %276 = vector.extract_strided_slice %254 {offsets = [0, 16], sizes = [8, 16], strides = [1, 1]} : vector<16x32xf32> to vector<8x16xf32>
    %277 = vector.extract_strided_slice %255 {offsets = [0, 16], sizes = [8, 16], strides = [1, 1]} : vector<16x32xf32> to vector<8x16xf32>
    %278 = vector.extract_strided_slice %256 {offsets = [0, 16], sizes = [8, 16], strides = [1, 1]} : vector<16x32xf32> to vector<8x16xf32>
    %cst_115 = arith.constant dense<0.000000e+00> : vector<8x8xf32>
    %279 = tpu.matmul %276, %277, %cst_115 {dimension_numbers = #tpu.dot_dimension_numbers<[1], [1], [0], [0], [0, 0, 1, 0], [], []>} : vector<8x16xf32>, vector<8x16xf32>, vector<8x8xf32> -> vector<8x8xf32>
    %cst_116 = arith.constant 2.500000e-01 : f32
    %280 = vector.broadcast %cst_116 : f32 to vector<8x8xf32>
    %281 = arith.mulf %279, %280 : vector<8x8xf32>
    %282 = vector.broadcast %257 : vector<1x8xf32> to vector<8x8xf32>
    %283 = arith.addf %281, %282 : vector<8x8xf32>
    %cst_117 = arith.constant dense<0xFF800000> : vector<8xf32>
    %284 = vector.multi_reduction <maximumf>, %283, %cst_117 [1] : vector<8x8xf32> to vector<8xf32>
    %285 = vector.shape_cast %284 : vector<8xf32> to vector<8x1xf32>
    %286 = vector.broadcast %285 : vector<8x1xf32> to vector<8x8xf32>
    %287 = arith.subf %283, %286 : vector<8x8xf32>
    %288 = math.exp %287 : vector<8x8xf32>
    %cst_118 = arith.constant dense<0.000000e+00> : vector<8xf32>
    %289 = vector.multi_reduction <add>, %288, %cst_118 [1] : vector<8x8xf32> to vector<8xf32>
    %290 = vector.shape_cast %289 : vector<8xf32> to vector<8x1xf32>
    %291 = vector.broadcast %290 : vector<8x1xf32> to vector<8x8xf32>
    %292 = arith.divf %288, %291 : vector<8x8xf32>
    %cst_119 = arith.constant dense<0.000000e+00> : vector<8x16xf32>
    %293 = tpu.matmul %292, %278, %cst_119 {dimension_numbers = #tpu.dot_dimension_numbers<[1], [0], [0], [1], [0, 0, 1, 1], [], []>} : vector<8x8xf32>, vector<8x16xf32>, vector<8x16xf32> -> vector<8x16xf32>
    %294 = tpu.concatenate %275, %293 in 1 : vector<8x16xf32>, vector<8x16xf32> -> vector<8x32xf32>
    %295 = vector.extract_strided_slice %58 {offsets = [1, 0], sizes = [1, 8], strides = [1, 1]} : vector<2x8xf32> to vector<1x8xf32>
    %296 = vector.extract_strided_slice %254 {offsets = [8, 0], sizes = [8, 16], strides = [1, 1]} : vector<16x32xf32> to vector<8x16xf32>
    %297 = vector.extract_strided_slice %255 {offsets = [8, 0], sizes = [8, 16], strides = [1, 1]} : vector<16x32xf32> to vector<8x16xf32>
    %298 = vector.extract_strided_slice %256 {offsets = [8, 0], sizes = [8, 16], strides = [1, 1]} : vector<16x32xf32> to vector<8x16xf32>
    %cst_120 = arith.constant dense<0.000000e+00> : vector<8x8xf32>
    %299 = tpu.matmul %296, %297, %cst_120 {dimension_numbers = #tpu.dot_dimension_numbers<[1], [1], [0], [0], [0, 0, 1, 0], [], []>} : vector<8x16xf32>, vector<8x16xf32>, vector<8x8xf32> -> vector<8x8xf32>
    %cst_121 = arith.constant 2.500000e-01 : f32
    %300 = vector.broadcast %cst_121 : f32 to vector<8x8xf32>
    %301 = arith.mulf %299, %300 : vector<8x8xf32>
    %302 = vector.broadcast %295 : vector<1x8xf32> to vector<8x8xf32>
    %303 = arith.addf %301, %302 : vector<8x8xf32>
    %cst_122 = arith.constant dense<0xFF800000> : vector<8xf32>
    %304 = vector.multi_reduction <maximumf>, %303, %cst_122 [1] : vector<8x8xf32> to vector<8xf32>
    %305 = vector.shape_cast %304 : vector<8xf32> to vector<8x1xf32>
    %306 = vector.broadcast %305 : vector<8x1xf32> to vector<8x8xf32>
    %307 = arith.subf %303, %306 : vector<8x8xf32>
    %308 = math.exp %307 : vector<8x8xf32>
    %cst_123 = arith.constant dense<0.000000e+00> : vector<8xf32>
    %309 = vector.multi_reduction <add>, %308, %cst_123 [1] : vector<8x8xf32> to vector<8xf32>
    %310 = vector.shape_cast %309 : vector<8xf32> to vector<8x1xf32>
    %311 = vector.broadcast %310 : vector<8x1xf32> to vector<8x8xf32>
    %312 = arith.divf %308, %311 : vector<8x8xf32>
    %cst_124 = arith.constant dense<0.000000e+00> : vector<8x16xf32>
    %313 = tpu.matmul %312, %298, %cst_124 {dimension_numbers = #tpu.dot_dimension_numbers<[1], [0], [0], [1], [0, 0, 1, 1], [], []>} : vector<8x8xf32>, vector<8x16xf32>, vector<8x16xf32> -> vector<8x16xf32>
    %314 = vector.extract_strided_slice %254 {offsets = [8, 16], sizes = [8, 16], strides = [1, 1]} : vector<16x32xf32> to vector<8x16xf32>
    %315 = vector.extract_strided_slice %255 {offsets = [8, 16], sizes = [8, 16], strides = [1, 1]} : vector<16x32xf32> to vector<8x16xf32>
    %316 = vector.extract_strided_slice %256 {offsets = [8, 16], sizes = [8, 16], strides = [1, 1]} : vector<16x32xf32> to vector<8x16xf32>
    %cst_125 = arith.constant dense<0.000000e+00> : vector<8x8xf32>
    %317 = tpu.matmul %314, %315, %cst_125 {dimension_numbers = #tpu.dot_dimension_numbers<[1], [1], [0], [0], [0, 0, 1, 0], [], []>} : vector<8x16xf32>, vector<8x16xf32>, vector<8x8xf32> -> vector<8x8xf32>
    %cst_126 = arith.constant 2.500000e-01 : f32
    %318 = vector.broadcast %cst_126 : f32 to vector<8x8xf32>
    %319 = arith.mulf %317, %318 : vector<8x8xf32>
    %320 = vector.broadcast %295 : vector<1x8xf32> to vector<8x8xf32>
    %321 = arith.addf %319, %320 : vector<8x8xf32>
    %cst_127 = arith.constant dense<0xFF800000> : vector<8xf32>
    %322 = vector.multi_reduction <maximumf>, %321, %cst_127 [1] : vector<8x8xf32> to vector<8xf32>
    %323 = vector.shape_cast %322 : vector<8xf32> to vector<8x1xf32>
    %324 = vector.broadcast %323 : vector<8x1xf32> to vector<8x8xf32>
    %325 = arith.subf %321, %324 : vector<8x8xf32>
    %326 = math.exp %325 : vector<8x8xf32>
    %cst_128 = arith.constant dense<0.000000e+00> : vector<8xf32>
    %327 = vector.multi_reduction <add>, %326, %cst_128 [1] : vector<8x8xf32> to vector<8xf32>
    %328 = vector.shape_cast %327 : vector<8xf32> to vector<8x1xf32>
    %329 = vector.broadcast %328 : vector<8x1xf32> to vector<8x8xf32>
    %330 = arith.divf %326, %329 : vector<8x8xf32>
    %cst_129 = arith.constant dense<0.000000e+00> : vector<8x16xf32>
    %331 = tpu.matmul %330, %316, %cst_129 {dimension_numbers = #tpu.dot_dimension_numbers<[1], [0], [0], [1], [0, 0, 1, 1], [], []>} : vector<8x8xf32>, vector<8x16xf32>, vector<8x16xf32> -> vector<8x16xf32>
    %332 = tpu.concatenate %313, %331 in 1 : vector<8x16xf32>, vector<8x16xf32> -> vector<8x32xf32>
    %333 = tpu.concatenate %294, %332 in 0 : vector<8x32xf32>, vector<8x32xf32> -> vector<16x32xf32>
    %c0_130 = arith.constant 0 : index
    %c0_131 = arith.constant 0 : index
    %334 = vector.load %arg24[%c0_130, %c0_131] : memref<32x32xf32, #tpu.memory_space<vmem>>, vector<32x32xf32>
    %cst_132 = arith.constant dense<0.000000e+00> : vector<16x32xf32>
    %335 = tpu.matmul %333, %334, %cst_132 {dimension_numbers = #tpu.dot_dimension_numbers<[1], [0], [0], [1], [0, 0, 1, 1], [], []>} : vector<16x32xf32>, vector<32x32xf32>, vector<16x32xf32> -> vector<16x32xf32>
    %c0_133 = arith.constant 0 : index
    %c0_134 = arith.constant 0 : index
    %336 = vector.load %arg25[%c0_133, %c0_134] : memref<1x32xf32, #tpu.memory_space<vmem>>, vector<1x32xf32>
    %337 = vector.broadcast %336 : vector<1x32xf32> to vector<16x32xf32>
    %338 = arith.addf %335, %337 : vector<16x32xf32>
    %339 = arith.addf %338, %248 : vector<16x32xf32>
    %c0_135 = arith.constant 0 : index
    %c0_136 = arith.constant 0 : index
    %340 = vector.load %arg26[%c0_135, %c0_136] : memref<1x32xf32, #tpu.memory_space<vmem>>, vector<1x32xf32>
    %c0_137 = arith.constant 0 : index
    %c0_138 = arith.constant 0 : index
    %341 = vector.load %arg27[%c0_137, %c0_138] : memref<1x32xf32, #tpu.memory_space<vmem>>, vector<1x32xf32>
    %cst_139 = arith.constant dense<0.000000e+00> : vector<16xf32>
    %342 = vector.multi_reduction <add>, %339, %cst_139 [1] : vector<16x32xf32> to vector<16xf32>
    %343 = vector.shape_cast %342 : vector<16xf32> to vector<16x1xf32>
    %cst_140 = arith.constant 3.200000e+01 : f32
    %344 = vector.broadcast %cst_140 : f32 to vector<16x1xf32>
    %345 = arith.divf %343, %344 : vector<16x1xf32>
    %346 = vector.broadcast %345 : vector<16x1xf32> to vector<16x32xf32>
    %347 = arith.subf %339, %346 : vector<16x32xf32>
    %348 = arith.mulf %347, %347 : vector<16x32xf32>
    %cst_141 = arith.constant dense<0.000000e+00> : vector<16xf32>
    %349 = vector.multi_reduction <add>, %348, %cst_141 [1] : vector<16x32xf32> to vector<16xf32>
    %350 = vector.shape_cast %349 : vector<16xf32> to vector<16x1xf32>
    %cst_142 = arith.constant 3.200000e+01 : f32
    %351 = vector.broadcast %cst_142 : f32 to vector<16x1xf32>
    %352 = arith.divf %350, %351 : vector<16x1xf32>
    %353 = vector.broadcast %345 : vector<16x1xf32> to vector<16x32xf32>
    %354 = arith.subf %339, %353 : vector<16x32xf32>
    %cst_143 = arith.constant 9.99999996E-13 : f32
    %355 = vector.broadcast %cst_143 : f32 to vector<16x1xf32>
    %356 = arith.addf %352, %355 : vector<16x1xf32>
    %357 = math.rsqrt %356 : vector<16x1xf32>
    %358 = vector.broadcast %357 : vector<16x1xf32> to vector<16x32xf32>
    %359 = arith.mulf %354, %358 : vector<16x32xf32>
    %360 = vector.broadcast %340 : vector<1x32xf32> to vector<16x32xf32>
    %361 = arith.mulf %359, %360 : vector<16x32xf32>
    %362 = vector.broadcast %341 : vector<1x32xf32> to vector<16x32xf32>
    %363 = arith.addf %361, %362 : vector<16x32xf32>
    %c0_144 = arith.constant 0 : index
    %c0_145 = arith.constant 0 : index
    %364 = vector.load %arg28[%c0_144, %c0_145] : memref<32x128xf32, #tpu.memory_space<vmem>>, vector<32x128xf32>
    %cst_146 = arith.constant dense<0.000000e+00> : vector<16x128xf32>
    %365 = tpu.matmul %363, %364, %cst_146 {dimension_numbers = #tpu.dot_dimension_numbers<[1], [0], [0], [1], [0, 0, 1, 1], [], []>} : vector<16x32xf32>, vector<32x128xf32>, vector<16x128xf32> -> vector<16x128xf32>
    %c0_147 = arith.constant 0 : index
    %c0_148 = arith.constant 0 : index
    %366 = vector.load %arg29[%c0_147, %c0_148] : memref<1x128xf32, #tpu.memory_space<vmem>>, vector<1x128xf32>
    %367 = vector.broadcast %366 : vector<1x128xf32> to vector<16x128xf32>
    %368 = arith.addf %365, %367 : vector<16x128xf32>
    %cst_149 = arith.constant 5.000000e-01 : f32
    %369 = vector.broadcast %cst_149 : f32 to vector<16x128xf32>
    %370 = arith.mulf %369, %368 : vector<16x128xf32>
    %cst_150 = arith.constant 0.707106769 : f32
    %371 = vector.broadcast %cst_150 : f32 to vector<16x128xf32>
    %372 = arith.mulf %368, %371 : vector<16x128xf32>
    %373 = math.absf %372 : vector<16x128xf32>
    %cst_151 = arith.constant 0.327591091 : f32
    %374 = vector.broadcast %cst_151 : f32 to vector<16x128xf32>
    %375 = arith.mulf %374, %373 : vector<16x128xf32>
    %cst_152 = arith.constant 1.000000e+00 : f32
    %376 = vector.broadcast %cst_152 : f32 to vector<16x128xf32>
    %377 = arith.addf %376, %375 : vector<16x128xf32>
    %cst_153 = arith.constant 1.000000e+00 : f32
    %378 = vector.broadcast %cst_153 : f32 to vector<16x128xf32>
    %379 = arith.divf %378, %377 : vector<16x128xf32>
    %cst_154 = arith.constant 1.06140542 : f32
    %380 = vector.broadcast %cst_154 : f32 to vector<16x128xf32>
    %381 = arith.mulf %380, %379 : vector<16x128xf32>
    %cst_155 = arith.constant -1.45315206 : f32
    %382 = vector.broadcast %cst_155 : f32 to vector<16x128xf32>
    %383 = arith.addf %381, %382 : vector<16x128xf32>
    %384 = arith.mulf %383, %379 : vector<16x128xf32>
    %cst_156 = arith.constant 1.42141378 : f32
    %385 = vector.broadcast %cst_156 : f32 to vector<16x128xf32>
    %386 = arith.addf %384, %385 : vector<16x128xf32>
    %387 = arith.mulf %386, %379 : vector<16x128xf32>
    %cst_157 = arith.constant -0.284496725 : f32
    %388 = vector.broadcast %cst_157 : f32 to vector<16x128xf32>
    %389 = arith.addf %387, %388 : vector<16x128xf32>
    %390 = arith.mulf %389, %379 : vector<16x128xf32>
    %cst_158 = arith.constant 0.254829586 : f32
    %391 = vector.broadcast %cst_158 : f32 to vector<16x128xf32>
    %392 = arith.addf %390, %391 : vector<16x128xf32>
    %393 = arith.mulf %392, %379 : vector<16x128xf32>
    %cst_159 = arith.constant 0.000000e+00 : f32
    %394 = vector.broadcast %cst_159 : f32 to vector<16x128xf32>
    %395 = arith.subf %394, %373 : vector<16x128xf32>
    %396 = arith.mulf %395, %373 : vector<16x128xf32>
    %397 = math.exp %396 : vector<16x128xf32>
    %398 = arith.mulf %393, %397 : vector<16x128xf32>
    %cst_160 = arith.constant 1.000000e+00 : f32
    %399 = vector.broadcast %cst_160 : f32 to vector<16x128xf32>
    %400 = arith.subf %399, %398 : vector<16x128xf32>
    %cst_161 = arith.constant 0.000000e+00 : f32
    %401 = vector.broadcast %cst_161 : f32 to vector<16x128xf32>
    %402 = arith.cmpf oge, %372, %401 : vector<16x128xf32>
    %cst_162 = arith.constant 0.000000e+00 : f32
    %403 = vector.broadcast %cst_162 : f32 to vector<16x128xf32>
    %404 = arith.subf %403, %400 : vector<16x128xf32>
    %405 = arith.select %402, %400, %404 : vector<16x128xi1>, vector<16x128xf32>
    %cst_163 = arith.constant 1.000000e+00 : f32
    %406 = vector.broadcast %cst_163 : f32 to vector<16x128xf32>
    %407 = arith.addf %406, %405 : vector<16x128xf32>
    %408 = arith.mulf %370, %407 : vector<16x128xf32>
    %c0_164 = arith.constant 0 : index
    %c0_165 = arith.constant 0 : index
    %409 = vector.load %arg30[%c0_164, %c0_165] : memref<128x32xf32, #tpu.memory_space<vmem>>, vector<128x32xf32>
    %cst_166 = arith.constant dense<0.000000e+00> : vector<16x32xf32>
    %410 = tpu.matmul %408, %409, %cst_166 {dimension_numbers = #tpu.dot_dimension_numbers<[1], [0], [0], [1], [0, 0, 1, 1], [], []>} : vector<16x128xf32>, vector<128x32xf32>, vector<16x32xf32> -> vector<16x32xf32>
    %c0_167 = arith.constant 0 : index
    %c0_168 = arith.constant 0 : index
    %411 = vector.load %arg31[%c0_167, %c0_168] : memref<1x32xf32, #tpu.memory_space<vmem>>, vector<1x32xf32>
    %412 = vector.broadcast %411 : vector<1x32xf32> to vector<16x32xf32>
    %413 = arith.addf %410, %412 : vector<16x32xf32>
    %414 = arith.addf %413, %363 : vector<16x32xf32>
    %c0_169 = arith.constant 0 : index
    %c0_170 = arith.constant 0 : index
    %415 = vector.load %arg32[%c0_169, %c0_170] : memref<1x32xf32, #tpu.memory_space<vmem>>, vector<1x32xf32>
    %c0_171 = arith.constant 0 : index
    %c0_172 = arith.constant 0 : index
    %416 = vector.load %arg33[%c0_171, %c0_172] : memref<1x32xf32, #tpu.memory_space<vmem>>, vector<1x32xf32>
    %cst_173 = arith.constant dense<0.000000e+00> : vector<16xf32>
    %417 = vector.multi_reduction <add>, %414, %cst_173 [1] : vector<16x32xf32> to vector<16xf32>
    %418 = vector.shape_cast %417 : vector<16xf32> to vector<16x1xf32>
    %cst_174 = arith.constant 3.200000e+01 : f32
    %419 = vector.broadcast %cst_174 : f32 to vector<16x1xf32>
    %420 = arith.divf %418, %419 : vector<16x1xf32>
    %421 = vector.broadcast %420 : vector<16x1xf32> to vector<16x32xf32>
    %422 = arith.subf %414, %421 : vector<16x32xf32>
    %423 = arith.mulf %422, %422 : vector<16x32xf32>
    %cst_175 = arith.constant dense<0.000000e+00> : vector<16xf32>
    %424 = vector.multi_reduction <add>, %423, %cst_175 [1] : vector<16x32xf32> to vector<16xf32>
    %425 = vector.shape_cast %424 : vector<16xf32> to vector<16x1xf32>
    %cst_176 = arith.constant 3.200000e+01 : f32
    %426 = vector.broadcast %cst_176 : f32 to vector<16x1xf32>
    %427 = arith.divf %425, %426 : vector<16x1xf32>
    %428 = vector.broadcast %420 : vector<16x1xf32> to vector<16x32xf32>
    %429 = arith.subf %414, %428 : vector<16x32xf32>
    %cst_177 = arith.constant 9.99999996E-13 : f32
    %430 = vector.broadcast %cst_177 : f32 to vector<16x1xf32>
    %431 = arith.addf %427, %430 : vector<16x1xf32>
    %432 = math.rsqrt %431 : vector<16x1xf32>
    %433 = vector.broadcast %432 : vector<16x1xf32> to vector<16x32xf32>
    %434 = arith.mulf %429, %433 : vector<16x32xf32>
    %435 = vector.broadcast %415 : vector<1x32xf32> to vector<16x32xf32>
    %436 = arith.mulf %434, %435 : vector<16x32xf32>
    %437 = vector.broadcast %416 : vector<1x32xf32> to vector<16x32xf32>
    %438 = arith.addf %436, %437 : vector<16x32xf32>
    %439 = arith.addf %438, %248 : vector<16x32xf32>
    %440 = vector.extract_strided_slice %439 {offsets = [0, 0], sizes = [8, 32], strides = [1, 1]} : vector<16x32xf32> to vector<8x32xf32>
    %cst_178 = arith.constant dense<0.000000e+00> : vector<32xf32>
    %441 = vector.multi_reduction <add>, %440, %cst_178 [0] : vector<8x32xf32> to vector<32xf32>
    %442 = vector.shape_cast %441 : vector<32xf32> to vector<1x32xf32>
    %cst_179 = arith.constant 8.000000e+00 : f32
    %443 = vector.broadcast %cst_179 : f32 to vector<1x32xf32>
    %444 = arith.divf %442, %443 : vector<1x32xf32>
    %445 = vector.extract_strided_slice %439 {offsets = [8, 0], sizes = [8, 32], strides = [1, 1]} : vector<16x32xf32> to vector<8x32xf32>
    %cst_180 = arith.constant dense<0.000000e+00> : vector<32xf32>
    %446 = vector.multi_reduction <add>, %445, %cst_180 [0] : vector<8x32xf32> to vector<32xf32>
    %447 = vector.shape_cast %446 : vector<32xf32> to vector<1x32xf32>
    %cst_181 = arith.constant 8.000000e+00 : f32
    %448 = vector.broadcast %cst_181 : f32 to vector<1x32xf32>
    %449 = arith.divf %447, %448 : vector<1x32xf32>
    %450 = tpu.concatenate %444, %449 in 0 : vector<1x32xf32>, vector<1x32xf32> -> vector<2x32xf32>
    %c0_182 = arith.constant 0 : index
    %c0_183 = arith.constant 0 : index
    %451 = vector.load %arg34[%c0_182, %c0_183] : memref<2x32xf32, #tpu.memory_space<vmem>>, vector<2x32xf32>
    tpu.vector_store %arg34[%c0_182, %c0_183], %450 {strides = array<i32>} : memref<2x32xf32, #tpu.memory_space<vmem>>, vector<2x32xf32>,
    %452 = vector.extract_strided_slice %438 {offsets = [7, 0], sizes = [1, 32], strides = [1, 1]} : vector<16x32xf32> to vector<1x32xf32>
    %453 = vector.extract_strided_slice %438 {offsets = [15, 0], sizes = [1, 32], strides = [1, 1]} : vector<16x32xf32> to vector<1x32xf32>
    %454 = tpu.concatenate %452, %453 in 0 : vector<1x32xf32>, vector<1x32xf32> -> vector<2x32xf32>
    %c0_184 = arith.constant 0 : index
    %c0_185 = arith.constant 0 : index
    %455 = vector.load %arg35[%c0_184, %c0_185] : memref<2x32xf32, #tpu.memory_space<vmem>>, vector<2x32xf32>
    tpu.vector_store %arg35[%c0_184, %c0_185], %454 {strides = array<i32>} : memref<2x32xf32, #tpu.memory_space<vmem>>, vector<2x32xf32>,
    return
  }
  func.func @transform_0(%arg0: i32) -> (i32, i32) {
    %c0_i32 = arith.constant 0 : i32
    %c0_i32_0 = arith.constant 0 : i32
    %c0_i32_1 = arith.constant 0 : i32
    return %c0_i32, %c0_i32_0 : i32, i32
  }
  func.func @transform_1(%arg0: i32) -> (i32, i32) {
    %c0_i32 = arith.constant 0 : i32
    %c0_i32_0 = arith.constant 0 : i32
    %c0_i32_1 = arith.constant 0 : i32
    return %c0_i32, %c0_i32_0 : i32, i32
  }
  func.func @transform_2(%arg0: i32) -> (i32, i32) {
    %c0_i32 = arith.constant 0 : i32
    %c0_i32_0 = arith.constant 0 : i32
    %c0_i32_1 = arith.constant 0 : i32
    return %c0_i32, %c0_i32_0 : i32, i32
  }
  func.func @transform_3(%arg0: i32) -> (i32, i32) {
    %c0_i32 = arith.constant 0 : i32
    %c0_i32_0 = arith.constant 0 : i32
    %c0_i32_1 = arith.constant 0 : i32
    return %c0_i32, %c0_i32_0 : i32, i32
  }
  func.func @transform_4(%arg0: i32) -> (i32, i32) {
    %c0_i32 = arith.constant 0 : i32
    %c0_i32_0 = arith.constant 0 : i32
    %c0_i32_1 = arith.constant 0 : i32
    return %c0_i32, %c0_i32_0 : i32, i32
  }
  func.func @transform_5(%arg0: i32) -> (i32, i32) {
    %c0_i32 = arith.constant 0 : i32
    %c0_i32_0 = arith.constant 0 : i32
    %c0_i32_1 = arith.constant 0 : i32
    return %c0_i32, %c0_i32_0 : i32, i32
  }
  func.func @transform_6(%arg0: i32) -> (i32, i32) {
    %c0_i32 = arith.constant 0 : i32
    %c0_i32_0 = arith.constant 0 : i32
    %c0_i32_1 = arith.constant 0 : i32
    return %c0_i32, %c0_i32_0 : i32, i32
  }
  func.func @transform_7(%arg0: i32) -> (i32, i32) {
    %c0_i32 = arith.constant 0 : i32
    %c0_i32_0 = arith.constant 0 : i32
    %c0_i32_1 = arith.constant 0 : i32
    return %c0_i32, %c0_i32_0 : i32, i32
  }
  func.func @transform_8(%arg0: i32) -> (i32, i32) {
    %c0_i32 = arith.constant 0 : i32
    %c0_i32_0 = arith.constant 0 : i32
    %c0_i32_1 = arith.constant 0 : i32
    return %c0_i32, %c0_i32_0 : i32, i32
  }
  func.func @transform_9(%arg0: i32) -> (i32, i32) {
    %c0_i32 = arith.constant 0 : i32
    %c0_i32_0 = arith.constant 0 : i32
    %c0_i32_1 = arith.constant 0 : i32
    return %c0_i32, %c0_i32_0 : i32, i32
  }
  func.func @transform_10(%arg0: i32) -> (i32, i32) {
    %c0_i32 = arith.constant 0 : i32
    %c0_i32_0 = arith.constant 0 : i32
    %c0_i32_1 = arith.constant 0 : i32
    return %c0_i32, %c0_i32_0 : i32, i32
  }
  func.func @transform_11(%arg0: i32) -> (i32, i32) {
    %c0_i32 = arith.constant 0 : i32
    %c0_i32_0 = arith.constant 0 : i32
    %c0_i32_1 = arith.constant 0 : i32
    return %c0_i32, %c0_i32_0 : i32, i32
  }
  func.func @transform_12(%arg0: i32) -> (i32, i32) {
    %c0_i32 = arith.constant 0 : i32
    %c0_i32_0 = arith.constant 0 : i32
    %c0_i32_1 = arith.constant 0 : i32
    return %c0_i32, %c0_i32_0 : i32, i32
  }
  func.func @transform_13(%arg0: i32) -> (i32, i32) {
    %c0_i32 = arith.constant 0 : i32
    %c0_i32_0 = arith.constant 0 : i32
    %c0_i32_1 = arith.constant 0 : i32
    return %c0_i32, %c0_i32_0 : i32, i32
  }
  func.func @transform_14(%arg0: i32) -> (i32, i32) {
    %c0_i32 = arith.constant 0 : i32
    %c0_i32_0 = arith.constant 0 : i32
    %c0_i32_1 = arith.constant 0 : i32
    return %c0_i32, %c0_i32_0 : i32, i32
  }
  func.func @transform_15(%arg0: i32) -> (i32, i32) {
    %c0_i32 = arith.constant 0 : i32
    %c0_i32_0 = arith.constant 0 : i32
    %c0_i32_1 = arith.constant 0 : i32
    return %c0_i32, %c0_i32_0 : i32, i32
  }
  func.func @transform_16(%arg0: i32) -> (i32, i32) {
    %c0_i32 = arith.constant 0 : i32
    %c0_i32_0 = arith.constant 0 : i32
    %c0_i32_1 = arith.constant 0 : i32
    return %c0_i32, %c0_i32_0 : i32, i32
  }
  func.func @transform_17(%arg0: i32) -> (i32, i32) {
    %c0_i32 = arith.constant 0 : i32
    %c0_i32_0 = arith.constant 0 : i32
    %c0_i32_1 = arith.constant 0 : i32
    return %c0_i32, %c0_i32_0 : i32, i32
  }
  func.func @transform_18(%arg0: i32) -> (i32, i32) {
    %c0_i32 = arith.constant 0 : i32
    %c0_i32_0 = arith.constant 0 : i32
    %c0_i32_1 = arith.constant 0 : i32
    return %c0_i32, %c0_i32_0 : i32, i32
  }
  func.func @transform_19(%arg0: i32) -> (i32, i32) {
    %c0_i32 = arith.constant 0 : i32
    %c0_i32_0 = arith.constant 0 : i32
    %c0_i32_1 = arith.constant 0 : i32
    return %c0_i32, %c0_i32_0 : i32, i32
  }
  func.func @transform_20(%arg0: i32) -> (i32, i32) {
    %c0_i32 = arith.constant 0 : i32
    %c0_i32_0 = arith.constant 0 : i32
    %c0_i32_1 = arith.constant 0 : i32
    return %c0_i32, %c0_i32_0 : i32, i32
  }
  func.func @transform_21(%arg0: i32) -> (i32, i32) {
    %c0_i32 = arith.constant 0 : i32
    %c0_i32_0 = arith.constant 0 : i32
    %c0_i32_1 = arith.constant 0 : i32
    return %c0_i32, %c0_i32_0 : i32, i32
  }
  func.func @transform_22(%arg0: i32) -> (i32, i32) {
    %c0_i32 = arith.constant 0 : i32
    %c0_i32_0 = arith.constant 0 : i32
    %c0_i32_1 = arith.constant 0 : i32
    return %c0_i32, %c0_i32_0 : i32, i32
  }
  func.func @transform_23(%arg0: i32) -> (i32, i32) {
    %c0_i32 = arith.constant 0 : i32
    %c0_i32_0 = arith.constant 0 : i32
    %c0_i32_1 = arith.constant 0 : i32
    return %c0_i32, %c0_i32_0 : i32, i32
  }
  func.func @transform_24(%arg0: i32) -> (i32, i32) {
    %c0_i32 = arith.constant 0 : i32
    %c0_i32_0 = arith.constant 0 : i32
    %c0_i32_1 = arith.constant 0 : i32
    return %c0_i32, %c0_i32_0 : i32, i32
  }
  func.func @transform_25(%arg0: i32) -> (i32, i32) {
    %c0_i32 = arith.constant 0 : i32
    %c0_i32_0 = arith.constant 0 : i32
    %c0_i32_1 = arith.constant 0 : i32
    return %c0_i32, %c0_i32_0 : i32, i32
  }
  func.func @transform_26(%arg0: i32) -> (i32, i32) {
    %c0_i32 = arith.constant 0 : i32
    %c0_i32_0 = arith.constant 0 : i32
    %c0_i32_1 = arith.constant 0 : i32
    return %c0_i32, %c0_i32_0 : i32, i32
  }
  func.func @transform_27(%arg0: i32) -> (i32, i32) {
    %c0_i32 = arith.constant 0 : i32
    %c0_i32_0 = arith.constant 0 : i32
    %c0_i32_1 = arith.constant 0 : i32
    return %c0_i32, %c0_i32_0 : i32, i32
  }
  func.func @transform_28(%arg0: i32) -> (i32, i32) {
    %c0_i32 = arith.constant 0 : i32
    %c0_i32_0 = arith.constant 0 : i32
    %c0_i32_1 = arith.constant 0 : i32
    return %c0_i32, %c0_i32_0 : i32, i32
  }
  func.func @transform_29(%arg0: i32) -> (i32, i32) {
    %c0_i32 = arith.constant 0 : i32
    %c0_i32_0 = arith.constant 0 : i32
    %c0_i32_1 = arith.constant 0 : i32
    return %c0_i32, %c0_i32_0 : i32, i32
  }
  func.func @transform_30(%arg0: i32) -> (i32, i32) {
    %c0_i32 = arith.constant 0 : i32
    %c0_i32_0 = arith.constant 0 : i32
    %c0_i32_1 = arith.constant 0 : i32
    return %c0_i32, %c0_i32_0 : i32, i32
  }
  func.func @transform_31(%arg0: i32) -> (i32, i32) {
    %c0_i32 = arith.constant 0 : i32
    %c0_i32_0 = arith.constant 0 : i32
    %c0_i32_1 = arith.constant 0 : i32
    return %c0_i32, %c0_i32_0 : i32, i32
  }
  func.func @transform_32(%arg0: i32) -> (i32, i32) {
    %c0_i32 = arith.constant 0 : i32
    %c0_i32_0 = arith.constant 0 : i32
    %c0_i32_1 = arith.constant 0 : i32
    return %c0_i32, %c0_i32_0 : i32, i32
  }
  func.func @transform_33(%arg0: i32) -> (i32, i32) {
    %c0_i32 = arith.constant 0 : i32
    %c0_i32_0 = arith.constant 0 : i32
    %c0_i32_1 = arith.constant 0 : i32
    return %c0_i32, %c0_i32_0 : i32, i32
  }
  func.func @transform_34(%arg0: i32) -> (i32, i32) {
    %c0_i32 = arith.constant 0 : i32
    %c0_i32_0 = arith.constant 0 : i32
    %c0_i32_1 = arith.constant 0 : i32
    return %c0_i32, %c0_i32_0 : i32, i32
  }
}

</mosaic_0001>

<bundles_post_ra>
// kernel: tpu_custom_call.1
= control target key start
LH: loop header
LB: loop body
LE: loop exit
PB: predicated region body
PF: predicated region fallthrough
CT: control target
= control target key end

     0   :  { %s2055_s6 = smov 1   ;;  %s2056_s10 = smov 2   ;;  %s2668_s0 = inlined_call_operand.smem [shape: u32[35], index: -1, kind: input, shape index: {}] }
   0x1   :  { %s2110_s5 = sld [smem:[%s2668_s0]]   ;;  %s2057_s14 = smov 3  }
   0x2   :  { %s2115_s9 = sld [smem:[%s2668_s0 + %s2055_s6]]   ;;  %s2058_s18 = smov 4  }
   0x3   :  { %s2120_s13 = sld [smem:[%s2668_s0 + %s2056_s10]]   ;;  %s2059_s22 = smov 5  }
   0x4   :  { %s2125_s17 = sld [smem:[%s2668_s0 + %s2057_s14]]   ;;  %s2060_s26 = smov 6  }
   0x5   :  { %s2130_s21 = sld [smem:[%s2668_s0 + %s2058_s18]]   ;;  %s2061_s30 = smov 7  }
   0x6   :  { %s2135_s25 = sld [smem:[%s2668_s0 + %s2059_s22]]   ;;  %s2062_s4 = smov 8  }
   0x7   :  { %s2140_s29 = sld [smem:[%s2668_s0 + %s2060_s26]]   ;;  %s2063_s10 = smov 9  }
   0x8   :  { %s2145_s3 = sld [smem:[%s2668_s0 + %s2061_s30]]   ;;  %s2064_s15 = smov 10  }
   0x9   :  { %s2150_s8 = sld [smem:[%s2668_s0 + %s2062_s4]]   ;;  %s2065_s20 = smov 11  }
   0xa   :  { %s2155_s14 = sld [smem:[%s2668_s0 + %s2063_s10]]   ;;  %s2066_s26 = smov 12  }
   0xb   :  { %s2160_s19 = sld [smem:[%s2668_s0 + %s2064_s15]]   ;;  %s2067_s1 = smov 13  }
   0xc   :  { %s2165_s24 = sld [smem:[%s2668_s0 + %s2065_s20]]   ;;  %s2068_s7 = smov 14  }
   0xd   :  { %s2170_s30 = sld [smem:[%s2668_s0 + %s2066_s26]]   ;;  %s2069_s15 = smov 15  }
   0xe   :  { %s2175_s6 = sld [smem:[%s2668_s0 + %s2067_s1]]   ;;  %s2070_s22 = smov 16  }
   0xf   :  { %s2180_s12 = sld [smem:[%s2668_s0 + %s2068_s7]]   ;;  %s2071_s28 = smov 17  }
  0x10   :  { %s2185_s20 = sld [smem:[%s2668_s0 + %s2069_s15]]   ;;  %s2072_s7 = smov 18  }
  0x11   :  { %s2190_s27 = sld [smem:[%s2668_s0 + %s2070_s22]]   ;;  %s2073_s15 = smov 19  }
  0x12   :  { %s2195_s4 = sld [smem:[%s2668_s0 + %s2071_s28]]   ;;  %s2074_s22 = smov 20  }
  0x13   :  { %s2075_s28 = smov 21  }
  0x14   :  { %2674 = sst [smem:[#allocation8_spill]] %s2175_s6 }
  0x15   :  { %2675 = sst [smem:[#allocation9_spill]] %s2180_s12 }
  0x16   :  { %s2200_s12 = sld [smem:[%s2668_s0 + %s2072_s7]]   ;;  %s2076_s7 = smov 22  }
  0x17   :  { %2676 = sst [smem:[#allocation10_spill]] %s2190_s27 }
  0x18   :  { %2677 = sst [smem:[#allocation11_spill]] %s2195_s4 }
  0x19   :  { %s2205_s6 = sld [smem:[%s2668_s0 + %s2073_s15]]   ;;  %s2077_s15 = smov 23  }
  0x1a   :  { %s2210_s27 = sld [smem:[%s2668_s0 + %s2074_s22]]   ;;  %s2078_s22 = smov 24  }
  0x1b   :  { %s2215_s4 = sld [smem:[%s2668_s0 + %s2075_s28]]   ;;  %s2079_s28 = smov 25  }
  0x1c   :  { %2678 = sst [smem:[#allocation12_spill]] %s2200_s12 }
  0x1d   :  { %s2220_s12 = sld [smem:[%s2668_s0 + %s2076_s7]]   ;;  %s2080_s7 = smov 26  }
  0x1f   :  { %2679 = sst [smem:[#allocation13_spill]] %s2205_s6 }
  0x20   :  { %2680 = sst [smem:[#allocation14_spill]] %s2210_s27 }
  0x21   :  { %2681 = sst [smem:[#allocation15_spill]] %s2215_s4 }
  0x22   :  { %s2225_s6 = sld [smem:[%s2668_s0 + %s2077_s15]]   ;;  %s2081_s15 = smov 27  }
  0x23   :  { %2682 = sst [smem:[#allocation16_spill]] %s2220_s12 }
  0x24   :  { %s2230_s27 = sld [smem:[%s2668_s0 + %s2078_s22]]   ;;  %s2082_s22 = smov 28  }
  0x25   :  { %s2235_s4 = sld [smem:[%s2668_s0 + %s2079_s28]]   ;;  %s2083_s28 = smov 29  }
  0x26   :  { %s2240_s12 = sld [smem:[%s2668_s0 + %s2080_s7]]   ;;  %s2084_s7 = smov 30  }
  0x28   :  { %2683 = sst [smem:[#allocation17_spill]] %s2225_s6 }
  0x29   :  { %s2245_s6 = sld [smem:[%s2668_s0 + %s2081_s15]]   ;;  %s2085_s15 = smov 31  }
  0x2a   :  { %2684 = sst [smem:[#allocation18_spill]] %s2230_s27 }
  0x2b   :  { %2685 = sst [smem:[#allocation19_spill]] %s2235_s4 }
  0x2c   :  { %2686 = sst [smem:[#allocation20_spill]] %s2240_s12 }
  0x2d   :  { %s2250_s27 = sld [smem:[%s2668_s0 + %s2082_s22]]   ;;  %s2086_s22 = smov 32  }
  0x2e   :  { %s2255_s4 = sld [smem:[%s2668_s0 + %s2083_s28]]   ;;  %s2087_s28 = smov 33  }
  0x2f   :  { %2687 = sst [smem:[#allocation21_spill]] %s2245_s6 }
  0x30   :  { %s2260_s12 = sld [smem:[%s2668_s0 + %s2084_s7]]   ;;  %s2088_s7 = smov 34  }
  0x31   :  { %s2265_s6 = sld [smem:[%s2668_s0 + %s2085_s15]]  }
  0x33   :  { %2688 = sst [smem:[#allocation22_spill]] %s2250_s27 }
  0x34   :  { %2689 = sst [smem:[#allocation23_spill]] %s2255_s4 }
  0x35   :  { %s2270_s27 = sld [smem:[%s2668_s0 + %s2086_s22]]  }
  0x36   :  { %2690 = sst [smem:[#allocation24_spill]] %s2260_s12 }
  0x37   :  { %s2275_s4 = sld [smem:[%s2668_s0 + %s2087_s28]]  }
  0x38   :  { %s2280_s12 = sld [smem:[%s2668_s0 + %s2088_s7]]  }
  0x39   :  { %75 = vsyncpa [#allocation3], 0  ;;  %v246_v0 = vld [vmem:[%s2115_s9] sm:$0xff]  ;;  %v2089_v2 = vmov 0   ;;  %v172_v3 = vld [vmem:[%s2130_s21 + $0x78] sm:$0xff] }
  0x3a   :  { %v143_v1 = vld [vmem:[%s2110_s5] sm:$0xff]  ;;  %1910 = vset.pattern.permute.xlu0 %v2089_v2  ;;  %1911 = vset.pattern.permute.xlu1 %v2089_v2  ;;  %v171_v4 = vld [vmem:[%s2130_s21 + $0x70] sm:$0xff]  ;;  %v170_v5 = vld [vmem:[%s2130_s21 + $0x68] sm:$0xff] }
  0x3b   :  { %249 = vperm.xlu0 %1910, %v246_v0   ;;  %148 = vperm.xlu1 %1911, %v143_v1   ;;  %v192_v6 = vld [vmem:[%s2135_s25 + $0x38] sm:$0xff]  ;;  %v173_v7 = vld [vmem:[%s2120_s13] sm:$0xff]  ;;  %v191_v9 = vld [vmem:[%s2135_s25 + $0x30] sm:$0xff] }
  0x3c   :  { %223 = vmatpush.msra.mxu1 %v172_v3  ;;  %1912 = vset.pattern.permute.xlu2 %v2089_v2  ;;  %v169_v8 = vld [vmem:[%s2130_s21 + $0x60] sm:$0xff]  ;;  %v168_v10 = vld [vmem:[%s2130_s21 + $0x58] sm:$0xff]  ;;  %v190_v11 = vld [vmem:[%s2135_s25 + $0x28] sm:$0xff] }
  0x3d   :  { %208 = vmatpush.msra.mxu0 %v192_v6  ;;  %v167_v12 = vld [vmem:[%s2130_s21 + $0x50] sm:$0xff]  ;;  %v166_v13 = vld [vmem:[%s2130_s21 + $0x48] sm:$0xff] }
  0x3e   :  { %224 = vmatpush.msra.mxu1 %v171_v4 }
  0x3f   :  { %209 = vmatpush.msra.mxu0 %v191_v9 }
  0x40   :  { %225 = vmatpush.msra.mxu1 %v170_v5 }
  0x41   :  { %210 = vmatpush.msra.mxu0 %v190_v11 }
  0x42   :  { %226 = vmatpush.msra.mxu1 %v169_v8 }
  0x43   :  { %176 = vperm.xlu0 %1910, %v173_v7  }
  0x44   :  { %227 = vmatpush.msra.mxu1 %v168_v10 }
  0x45   :  { %76 = vsyncpa [#allocation5], 0  ;;  %v165_v14 = vld [vmem:[%s2130_s21 + $0x40] sm:$0xff]  ;;  %v174_v15 = vld [vmem:[%s2120_s13 + $0x8] sm:$0xff]  ;;  %v145_v31 = vlaneseq  ;;  %vm259_vm0 = vcmask 64512   ;;  %v2090_v35 = vmov 0.0  }
  0x46   :  { %228 = vmatpush.msra.mxu1 %v167_v12  ;;  %v164_v16 = vld [vmem:[%s2130_s21 + $0x38] sm:$0xff]  ;;  %v163_v17 = vld [vmem:[%s2130_s21 + $0x30] sm:$0xff]  ;;  %v162_v18 = vld [vmem:[%s2130_s21 + $0x28] sm:$0xff]  ;;  %v2091_v37 = vmov 1.0   ;;  %vm193_vm3 = vcmask 523264   ;;  %vm293_vm7 = vcmask 261120  }
  0x47   :  { %v144_v19 = vld [vmem:[%s2110_s5 + $0x8] sm:$0xff]  ;;  %v189_v20 = vld [vmem:[%s2135_s25 + $0x20] sm:$0xff]  ;;  %v188_v23 = vld [vmem:[%s2135_s25 + $0x18] sm:$0xff]  ;;  %v2312_v32 = vand.u32 127, %v145_v31  ;;  %v2092_v49 = vmov 32.0   ;;  %s2093_s0 = smov 80  }
  0x48   :  { %229 = vmatpush.msra.mxu1 %v166_v13  ;;  %v161_v21 = vld [vmem:[%s2130_s21 + $0x20] sm:$0xff]  ;;  %211 = vmatpush.msra.mxu0 %v189_v20  ;;  %v160_v24 = vld [vmem:[%s2130_s21 + $0x18] sm:$0xff]  ;;  %v187_v25 = vld [vmem:[%s2135_s25 + $0x10] sm:$0xff]  ;;  %1931 = vrcp.f32 %v2092_v49  ;;  %s2094_s5 = smov 96   ;;  %vm399_vm13 = vcmask 130048   ;;  %s2096_s13 = smov 48  }
  0x49   :  { %v258_v22 = vld [vmem:[%s2140_s29] sm:$0xff]  ;;  %v159_v26 = vld [vmem:[%s2130_s21 + $0x10] sm:$0xff]  ;;  %v186_v27 = vld [vmem:[%s2135_s25 + $0x8] sm:$0xff]  ;;  %s2692_s29 = sld [smem:[#allocation9_spill]]  ;;  %s1773_s2 = sshll.u32 %s2280_s12, 4  ;;  %s1774_s2 = int_to_ptr.hbm [resolvable:$true] %s1773_s2 }
  0x4a   :  { %230 = vmatpush.msra.mxu1 %v165_v14  ;;  %281 = vmatpush.msra.mxu2 %v258_v22  ;;  %v158_v28 = vld [vmem:[%s2130_s21 + $0x8] sm:$0xff]  ;;  %v185_v29 = vld [vmem:[%s2135_s25] sm:$0xff]  ;;  %v362_v62 = vld [vmem:[%s2155_s14 + $0x18] sm:$0xff]  ;;  %s2691_s25 = sld [smem:[#allocation8_spill]]  ;;  %s2015_s7 = sshra.s32 %s1774_s2, 4  ;;  %s2016_s7 = int_to_ptr.hbm [resolvable:$true] %s2015_s7 }
  0x4b   :  { %179 = vperm.xlu0 %1910, %v174_v15   ;;  %212 = vmatpush.msra.mxu0 %v188_v23  ;;  %v157_v30 = vld [vmem:[%s2130_s21] sm:$0xff]  ;;  %v247_v61 = vld [vmem:[%s2115_s9 + $0x8] sm:$0xff]  ;;  %v361_v63 = vld [vmem:[%s2155_s14 + $0x10] sm:$0xff]  ;;  %s2095_s9 = smov 112   ;;  %s2098_s21 = smov 16  }
  0x4c   :  { %231 = vmatpush.msra.mxu1 %v164_v16  ;;  %385 = vmatpush.msra.mxu3 %v362_v62  ;;  %v360_v0 = vld [vmem:[%s2155_s14 + $0x8] sm:$0xff]  ;;  %v359_v1 = vld [vmem:[%s2155_s14] sm:$0xff]  ;;  %s2695_s14 = sld [smem:[#allocation12_spill]]  ;;  %s2017_s10 = scalar_lea.hbm %s2016_s7, 2 }
  0x4d   :  { %213 = vmatpush.msra.mxu0 %v187_v25  ;;  %v2334_v13 = vld [vmem:[%s2145_s3] ss:$0 sm:$0xff]  ;;  %s2693_s3 = sld [smem:[#allocation11_spill]]  ;;  %p2018_p0 = scmp.ne.s32.totalorder %s2016_s7, %s2017_s10 }
  0x4e   :  { %232 = vmatpush.msra.mxu1 %v163_v17  ;;  %v1932_v50 = vpop.eup %1931  ;;  %386 = vmatpush.msra.mxu3 %v361_v63  ;;  %v2337_v16 = vld [vmem:[%s2150_s8] ss:$0 sm:$0xff]  ;;  %s2694_s8 = sld [smem:[#allocation10_spill]]  ;;  %s2019_s11 = scalar_lea.hbm %s2280_s12, 2 }
  0x4f   :  { %214 = vmatpush.msra.mxu0 %v186_v27  ;;  %v301_v51 = vmul.f32 32.0, %v1932_v50  ;;  %vm305_vm8 = vweird.f32 %v1932_v50  ;;  %s2700_s15 = sld [smem:[#allocation17_spill]]  ;;  %p2020_p1 = scmp.lt.s32.totalorder %s2016_s7, %s2280_s12 }
  0x50   :  { %233 = vmatpush.msra.mxu1 %v162_v18  ;;  %387 = vmatpush.msra.mxu3 %v360_v0  ;;  %s2701_s16 = sld [smem:[#allocation18_spill]]  ;;  %p2021_p2 = scmp.lt.s32.totalorder %s2019_s11, %s2017_s10 }
  0x51   :  { %215 = vmatpush.msra.mxu0 %v185_v29  ;;  %v302_v52 = vsub.f32 1.0, %v301_v51  ;;  %s2702_s18 = sld [smem:[#allocation21_spill]] }
  0x52   :  { %234 = vmatpush.msra.mxu1 %v161_v21  ;;  %388 = vmatpush.msra.mxu3 %v359_v1  ;;  %s2703_s22 = sld [smem:[#allocation19_spill]]  ;;  %p2022_p3 = por %p2021_p2, %p2020_p1 }
  0x53   :  { %151 = vperm.xlu0 %1910, %v144_v19   ;;  %v303_v53 = vmul.f32 %v1932_v50, %v302_v52  ;;  %v2346_v19 = vld [vmem:[%s2160_s19] ss:$0 sm:$0xff]  ;;  %s2696_s19 = sld [smem:[#allocation15_spill]] }
  0x54   :  { %235 = vmatpush.msra.mxu1 %v160_v24  ;;  %s2704_s23 = sld [smem:[#allocation20_spill]]  ;;  %p2023_p4 = pnand %p2022_p3, %p2018_p0 }
  0x55   :  { %v304_v54 = vadd.f32 %v1932_v50, %v303_v53  ;;  %s2705_s26 = sld [smem:[#allocation23_spill]] }
  0x56   :  { %236 = vmatpush.msra.mxu1 %v159_v26  ;;  %s2706_s28 = sld [smem:[#allocation22_spill]] }
  0x57   :  { %v2321_v55 = vsel %vm305_vm8, %v1932_v50, %v304_v54  ;;  %s2707_s1 = sld [smem:[#allocation24_spill]] }
  0x58   :  { %237 = vmatpush.msra.mxu1 %v158_v28 }
  0x5a   :  { %238 = vmatpush.msra.mxu1 %v157_v30 }
  0xad   :  { %v250_v33 = vpop.permute.xlu0 %249  ;;  %v149_v34 = vpop.permute.xlu1 %148 }
  0xae   :  { %vm254_vm1 = vcmp.eq.s32.totalorder %v2312_v32, %v250_v33  ;;  %vm153_vm2 = vcmp.eq.s32.totalorder %v2312_v32, %v149_v34 }
  0xaf   :  { %v256_v36 = vsel %vm254_vm1, 1.0, %v2090_v35  ;;  %1823 = vmatmul.msk.f32.vlgmr.msra.gmra.mxu1 %vm153_vm2, %v2091_v37 }
  0xb0   :  { %1825 = vmatmul.msk.f32.vlgmr.msra.gmra.mxu2 %vm259_vm0, %v256_v36  ;;  %v355_v36 = vld [vmem:[%s2125_s17] sm:$0x3]  ;;  %s2097_s17 = smov 64  }
  0xb5   :  { %v177_v38 = vpop.permute.xlu0 %176 }
  0xb6   :  { %vm181_vm4 = vcmp.eq.s32.totalorder %v2312_v32, %v177_v38 }
  0xb7   :  { %v183_v39 = vsel %vm181_vm4, 1.0, %v2090_v35 }
  0xb8   :  { %1821 = vmatmul.msk.f32.vlgmr.msra.gmra.mxu0 %vm193_vm3, %v183_v39 }
  0xbd   :  { %v180_v40 = vpop.permute.xlu0 %179 }
  0xbe   :  { %vm182_vm5 = vcmp.eq.s32.totalorder %v2312_v32, %v180_v40 }
  0xbf   :  { %v184_v41 = vsel %vm182_vm5, 1.0, %v2090_v35 }
  0xc0   :  { %1822 = vmatmul.msk.f32.gmra.mxu0 %vm193_vm3, %v184_v41 }
  0xc5   :  { %v152_v42 = vpop.permute.xlu0 %151 }
  0xc6   :  { %vm154_vm6 = vcmp.eq.s32.totalorder %v2312_v32, %v152_v42 }
  0xc7   :  { %1824 = vmatmul.msk.f32.gmra.mxu1 %vm154_vm6, %v2091_v37  ;;  %v356_v37 = vcvt.s32.f32 %v355_v36 }
  0xc9   :  { %v357_v39 = vsub.f32 1.0, %v356_v37 }
  0xcb   :  { %v2366_v40 = vmul.f32 -10000.0, %v357_v39 }
 0x12c   :  { %v240_v43 = vpop.f32.mrf.mxu1 }
 0x133   :  { %v283_v46 = vpop.f32.mrf.mxu2 }
 0x135   :  { %v217_v44 = vpop.f32.mrf.mxu0 }
 0x136   :  { %v241_v45 = vadd.f32 %v240_v43, %v217_v44  ;;  %v2369_v43 = vperm.slane %v2366_v40, 0 }
 0x138   :  { %v289_v47 = vadd.f32 %v283_v46, %v241_v45 }
 0x13a   :  { %v294_v48 = vsel %vm293_vm7, %v289_v47, 0.0 }
 0x13b   :  { %295 = vadd.xlane.f32.xlu1 %v294_v48 }
 0x13d   :  { %v220_v23 = vpop.f32.mrf.mxu0 }
 0x144   :  { %v243_v22 = vpop.f32.mrf.mxu1 }
 0x145   :  { %v244_v25 = vadd.f32 %v243_v22, %v220_v23 }
 0x1ae   :  { %v296_v56 = vpop.xlane.xlu1 %295 }
 0x1af   :  { %v307_v57 = vmul.f32 %v2321_v55, %v296_v56 }
 0x1b1   :  { %v309_v58 = vsub.f32 %v289_v47, %v307_v57 }
 0x1b3   :  { %v311_v59 = vmul.f32 %v309_v58, %v309_v58 }
 0x1b5   :  { %v313_v60 = vsel %vm293_vm7, %v311_v59, 0.0 }
 0x1b6   :  { %314 = vadd.xlane.f32.xlu2 %v313_v60 }
 0x1ce   :  { %252 = vperm.xlu2 %1912, %v247_v61  }
 0x229   :  { %v315_v2 = vpop.xlane.xlu2 %314 }
 0x22a   :  { %v319_v3 = vmul.f32 %v315_v2, %v2321_v55 }
 0x22c   :  { %v321_v4 = vadd.f32 1e-12, %v319_v3 }
 0x22e   :  { %1933 = vrsqrt.f32 %v321_v4  ;;  %vm329_vm11 = vweird.f32 %v321_v4 }
 0x231   :  { %v253_v5 = vpop.permute.xlu2 %252 }
 0x232   :  { %vm255_vm9 = vcmp.eq.s32.totalorder %v2312_v32, %v253_v5 }
 0x233   :  { %v257_v6 = vsel %vm255_vm9, 1.0, %v2090_v35 }
 0x234   :  { %v1934_v7 = vpop.eup %1933  ;;  %1826 = vmatmul.msk.f32.gmra.mxu2 %vm259_vm0, %v257_v6 }
 0x235   :  { %v324_v8 = vmul.f32 %v1934_v7, %v321_v4  ;;  %vm330_vm10 = vweird.f32 %v1934_v7 }
 0x236   :  { %vm331_vm12 = vmor %vm329_vm11, %vm330_vm10 }
 0x237   :  { %v325_v9 = vmul.f32 %v1934_v7, %v324_v8 }
 0x239   :  { %v326_v10 = vmul.f32 0.5, %v325_v9 }
 0x23b   :  { %v327_v11 = vsub.f32 1.5, %v326_v10 }
 0x23d   :  { %v328_v12 = vmul.f32 %v1934_v7, %v327_v11 }
 0x23f   :  { %v332_v14 = vsel %vm331_vm12, %v1934_v7, %v328_v12 }
 0x240   :  { %v343_v15 = vmul.f32 %v332_v14, %v309_v58 }
 0x242   :  { %v348_v17 = vmul.f32 %v2334_v13, %v343_v15 }
 0x244   :  { %v2341_v18 = vadd.f32 %v2337_v16, %v348_v17 }
 0x246   :  { %1827 = vmatmul.msk.f32.vlgmr.msra.gmra.mxu3 %vm293_vm7, %v2341_v18 }
 0x2b7   :  { %v286_v24 = vpop.f32.mrf.mxu2 }
 0x2b8   :  { %v290_v26 = vadd.f32 %v286_v24, %v244_v25 }
 0x2ba   :  { %v297_v27 = vsel %vm293_vm7, %v290_v26, 0.0 }
 0x2c9   :  { %v390_v20 = vpop.f32.mrf.mxu3 }
 0x2ca   :  { %v2349_v21 = vadd.f32 %v2346_v19, %v390_v20 }
 0x2cc   :  { %479 = vrot.lane.b32.xlu2 %v2349_v21, %s2093_s0  ;;  %397 = vrot.lane.b32.xlu0 %v2349_v21, %s2094_s5 }
 0x2d4   :  { %477 = vrot.lane.b32.xlu0 %v2349_v21, %s2095_s9 }
 0x2f5   :  { %298 = vadd.xlane.f32.xlu2 %v297_v27 }
 0x326   :  { %v480_v29 = vpop.permute.xlu2 %479 }
 0x33e   :  { %v398_v28 = vpop.permute.xlu0 %397 }
 0x33f   :  { %1829 = vmatpush.xpose.msk.msrb.mxu2 %vm399_vm13, %v398_v28 }
 0x342   :  { %1830 = vmatmul.msk.f32.vlgmr.msrb.gmra.mxu2 %vm399_vm13, %v2349_v21 }
 0x343   :  { %1832 = vmatpush.xpose.msk.msra.mxu2 %vm399_vm13, %v480_v29 }
 0x346   :  { %v478_v30 = vpop.permute.xlu0 %477 }
 0x34a   :  { %1833 = vmatmul.msk.f32.vlgmr.msra.gmra.mxu2 %vm399_vm13, %v478_v30 }
 0x368   :  { %v299_v31 = vpop.xlane.xlu2 %298 }
 0x369   :  { %v308_v32 = vmul.f32 %v2321_v55, %v299_v31 }
 0x36b   :  { %v310_v33 = vsub.f32 %v290_v26, %v308_v32 }
 0x36d   :  { %v312_v34 = vmul.f32 %v310_v33, %v310_v33 }
 0x36f   :  { %v316_v35 = vsel %vm293_vm7, %v312_v34, 0.0 }
 0x370   :  { %317 = vadd.xlane.f32.xlu0 %v316_v35 }
 0x3c5   :  { %v421_v38 = vpop.f32.mrf.mxu2 }
 0x3c6   :  { %v424_v45 = vmul.f32 0.25, %v421_v38 }
 0x3c8   :  { %v426_v47 = vadd.f32 %v2369_v43, %v424_v45 }
 0x3ca   :  { %v427_v48 = vsel %vm259_vm0, %v426_v47, -inf }
 0x3cd   :  { %v502_v41 = vpop.f32.mrf.mxu2 }
 0x3ce   :  { %v505_v42 = vmul.f32 0.25, %v502_v41 }
 0x3d0   :  { %v506_v44 = vadd.f32 %v505_v42, %v2369_v43 }
 0x3d2   :  { %v507_v46 = vsel %vm259_vm0, %v506_v44, -inf }
 0x3d3   :  { %508 = vmax.xlane.f32.xlu1 %v507_v46 }
 0x3db   :  { %428 = vmax.xlane.f32.xlu1 %v427_v48 }
 0x3e3   :  { %v318_v49 = vpop.xlane.xlu0 %317 }
 0x3e4   :  { %v320_v50 = vmul.f32 %v318_v49, %v2321_v55 }
 0x3e6   :  { %v322_v51 = vadd.f32 1e-12, %v320_v50 }
 0x3e8   :  { %1935 = vrsqrt.f32 %v322_v51  ;;  %vm339_vm15 = vweird.f32 %v322_v51 }
 0x3ee   :  { %v1936_v52 = vpop.eup %1935 }
 0x3ef   :  { %v334_v53 = vmul.f32 %v1936_v52, %v322_v51  ;;  %vm340_vm14 = vweird.f32 %v1936_v52 }
 0x3f0   :  { %vm341_vm1 = vmor %vm339_vm15, %vm340_vm14 }
 0x3f1   :  { %v335_v54 = vmul.f32 %v1936_v52, %v334_v53  ;;  %v730_v53 = vld [vmem:[%s2165_s24 + $0x18] sm:$0xff] }
 0x3f3   :  { %v336_v56 = vmul.f32 0.5, %v335_v54  ;;  %v729_v54 = vld [vmem:[%s2165_s24 + $0x10] sm:$0xff] }
 0x3f5   :  { %v337_v57 = vsub.f32 1.5, %v336_v56  ;;  %v728_v56 = vld [vmem:[%s2165_s24 + $0x8] sm:$0xff] }
 0x3f7   :  { %v338_v58 = vmul.f32 %v1936_v52, %v337_v57  ;;  %v727_v57 = vld [vmem:[%s2165_s24] sm:$0xff]  ;;  %s2697_s24 = sld [smem:[#allocation13_spill]] }
 0x3f9   :  { %v342_v59 = vsel %vm341_vm1, %v1936_v52, %v338_v58 }
 0x3fa   :  { %v344_v60 = vmul.f32 %v342_v59, %v310_v33 }
 0x3fc   :  { %v349_v61 = vmul.f32 %v2334_v13, %v344_v60 }
 0x3fe   :  { %v2378_v62 = vadd.f32 %v2337_v16, %v349_v61 }
 0x400   :  { %1828 = vmatmul.msk.f32.gmra.mxu3 %vm293_vm7, %v2378_v62 }
 0x446   :  { %v509_v63 = vpop.xlane.xlu1 %508 }
 0x447   :  { %v510_v0 = vsub.f32 %v506_v44, %v509_v63  ;;  %v2405_v44 = vperm.slane %v2366_v40, 1 }
 0x449   :  { %v511_v1 = vmul.f32 1.442695, %v510_v0 }
 0x44b   :  { %1937 = vpow2.f32 %v511_v1 }
 0x44e   :  { %v429_v4 = vpop.xlane.xlu1 %428 }
 0x44f   :  { %v430_v6 = vsub.f32 %v426_v47, %v429_v4 }
 0x451   :  { %v1938_v2 = vpop.eup %1937  ;;  %v431_v8 = vmul.f32 1.442695, %v430_v6 }
 0x452   :  { %v513_v3 = vsel %vm259_vm0, %v1938_v2, 0.0 }
 0x453   :  { %514 = vadd.xlane.f32.xlu1 %v513_v3  ;;  %1939 = vpow2.f32 %v431_v8 }
 0x459   :  { %v1940_v9 = vpop.eup %1939 }
 0x45a   :  { %v433_v10 = vsel %vm259_vm0, %v1940_v9, 0.0 }
 0x46c   :  { %531 = vrot.lane.b32.xlu1 %v2349_v21, %s2096_s13 }
 0x483   :  { %v393_v5 = vpop.f32.mrf.mxu3 }
 0x484   :  { %v2386_v7 = vadd.f32 %v2346_v19, %v393_v5 }
 0x486   :  { %642 = vrot.lane.b32.xlu0 %v2386_v7, %s2095_s9  ;;  %644 = vrot.lane.b32.xlu2 %v2386_v7, %s2093_s0 }
 0x48e   :  { %563 = vrot.lane.b32.xlu0 %v2386_v7, %s2094_s5  ;;  %451 = vrot.lane.b32.xlu2 %v2349_v21, %s2097_s17 }
 0x496   :  { %434 = vadd.xlane.f32.xlu1 %v433_v10 }
 0x4c6   :  { %v515_v11 = vpop.xlane.xlu1 %514 }
 0x4c7   :  { %1941 = vrcp.f32 %v515_v11  ;;  %v527_v17 = vand.u32 2147483648, %v515_v11  ;;  %vm521_vm3 = vweird.f32 %v515_v11  ;;  %v525_v19 = vand.u32 2147483647, %v515_v11 }
 0x4c9   :  { %v528_v22 = vor.u32 1.1754944e-38, %v527_v17  ;;  %vm526_vm5 = vcmp.eq.f32.partialorder %v525_v19, 8.507059e+37 }
 0x4cd   :  { %v1942_v12 = vpop.eup %1941 }
 0x4ce   :  { %v517_v13 = vmul.f32 %v1942_v12, %v515_v11  ;;  %vm522_vm2 = vweird.f32 %v1942_v12 }
 0x4cf   :  { %vm523_vm4 = vmor %vm521_vm3, %vm522_vm2 }
 0x4d0   :  { %v518_v14 = vsub.f32 1.0, %v517_v13 }
 0x4d2   :  { %v519_v15 = vmul.f32 %v1942_v12, %v518_v14 }
 0x4d4   :  { %v520_v16 = vadd.f32 %v1942_v12, %v519_v15 }
 0x4d6   :  { %v524_v20 = vsel %vm523_vm4, %v1942_v12, %v520_v16 }
 0x4d7   :  { %v529_v21 = vsel %vm526_vm5, %v528_v22, %v524_v20 }
 0x4d8   :  { %v530_v24 = vmul.f32 %v1938_v2, %v529_v21 }
 0x4de   :  { %v532_v23 = vpop.permute.xlu1 %531 }
 0x4df   :  { %552 = vmatpush.msrb.mxu0 %v532_v23 }
 0x4e0   :  { %1834 = vmatmul.msk.f32.vlgmr.msrb.gmra.mxu0 %vm259_vm0, %v530_v24  ;;  %v645_v25 = vpop.permute.xlu2 %644 }
 0x4e1   :  { %1838 = vmatpush.xpose.msk.msra.mxu0 %vm399_vm13, %v645_v25 }
 0x4e5   :  { %753 = vmatpush.msrb.mxu0 %v730_v53 }
 0x4e7   :  { %754 = vmatpush.msrb.mxu0 %v729_v54 }
 0x4e8   :  { %v452_v26 = vpop.permute.xlu2 %451 }
 0x4e9   :  { %472 = vmatpush.msrb.mxu3 %v452_v26  ;;  %755 = vmatpush.msrb.mxu0 %v728_v56 }
 0x4eb   :  { %756 = vmatpush.msrb.mxu0 %v727_v57 }
 0x4f8   :  { %v643_v27 = vpop.permute.xlu0 %642 }
 0x4f9   :  { %1839 = vmatmul.msk.f32.vlgmr.msra.gmra.mxu0 %vm399_vm13, %v643_v27 }
 0x500   :  { %v564_v28 = vpop.permute.xlu0 %563 }
 0x501   :  { %1835 = vmatpush.xpose.msk.msra.mxu3 %vm399_vm13, %v564_v28 }
 0x509   :  { %v435_v29 = vpop.xlane.xlu1 %434 }
 0x50a   :  { %1943 = vrcp.f32 %v435_v29  ;;  %v447_v33 = vand.u32 2147483648, %v435_v29  ;;  %v445_v35 = vand.u32 2147483647, %v435_v29  ;;  %vm441_vm8 = vweird.f32 %v435_v29 }
 0x50c   :  { %v448_v37 = vor.u32 1.1754944e-38, %v447_v33  ;;  %vm446_vm10 = vcmp.eq.f32.partialorder %v445_v35, 8.507059e+37 }
 0x510   :  { %v1944_v30 = vpop.eup %1943 }
 0x511   :  { %v437_v31 = vmul.f32 %v1944_v30, %v435_v29  ;;  %vm442_vm6 = vweird.f32 %v1944_v30 }
 0x512   :  { %vm443_vm9 = vmor %vm441_vm8, %vm442_vm6 }
 0x513   :  { %v438_v32 = vsub.f32 1.0, %v437_v31 }
 0x515   :  { %v439_v34 = vmul.f32 %v1944_v30, %v438_v32 }
 0x517   :  { %v440_v36 = vadd.f32 %v1944_v30, %v439_v34 }
 0x519   :  { %v444_v38 = vsel %vm443_vm9, %v1944_v30, %v440_v36 }
 0x51a   :  { %v449_v39 = vsel %vm446_vm10, %v448_v37, %v444_v38 }
 0x51b   :  { %v450_v41 = vmul.f32 %v1940_v9, %v449_v39  ;;  %v2425_v9 = vld [vmem:[%s2170_s30] ss:$0 sm:$0xff]  ;;  %s2698_s30 = sld [smem:[#allocation14_spill]] }
 0x51d   :  { %1831 = vmatmul.msk.f32.vlgmr.msrb.gmra.mxu3 %vm259_vm0, %v450_v41 }
 0x525   :  { %1836 = vmatmul.msk.f32.vlgmr.msra.gmra.mxu3 %vm399_vm13, %v2386_v7 }
 0x55d   :  { %v554_v42 = vpop.f32.mrf.mxu0 }
 0x576   :  { %v667_v45 = vpop.f32.mrf.mxu0 }
 0x577   :  { %v670_v46 = vmul.f32 0.25, %v667_v45 }
 0x579   :  { %v671_v47 = vadd.f32 %v670_v46, %v2405_v44 }
 0x57b   :  { %v672_v48 = vsel %vm259_vm0, %v671_v47, -inf }
 0x57c   :  { %673 = vmax.xlane.f32.xlu2 %v672_v48 }
 0x594   :  { %558 = vrot.lane.b32.xlu2 %v554_v42, %s2098_s21 }
 0x5a0   :  { %v474_v49 = vpop.f32.mrf.mxu3 }
 0x5a8   :  { %v586_v50 = vpop.f32.mrf.mxu3 }
 0x5a9   :  { %v589_v51 = vmul.f32 0.25, %v586_v50  ;;  %v825_v50 = vld [vmem:[%s2185_s20 + $0x18] sm:$0xff] }
 0x5aa   :  { %848 = vmatpush.msra.mxu0 %v825_v50 }
 0x5ab   :  { %v591_v52 = vadd.f32 %v2405_v44, %v589_v51  ;;  %v824_v51 = vld [vmem:[%s2185_s20 + $0x10] sm:$0xff] }
 0x5ac   :  { %849 = vmatpush.msra.mxu0 %v824_v51 }
 0x5ad   :  { %v592_v40 = vsel %vm259_vm0, %v591_v52, -inf }
 0x5ae   :  { %593 = vmax.xlane.f32.xlu0 %v592_v40  ;;  %v822_v40 = vld [vmem:[%s2185_s20] sm:$0xff] }
 0x5ef   :  { %v674_v58 = vpop.xlane.xlu2 %673 }
 0x5f0   :  { %v675_v59 = vsub.f32 %v671_v47, %v674_v58 }
 0x5f2   :  { %v676_v60 = vmul.f32 1.442695, %v675_v59 }
 0x5f4   :  { %1945 = vpow2.f32 %v676_v60 }
 0x5f7   :  { %v559_v61 = vpop.permute.xlu2 %558 }
 0x5f8   :  { %v561_v63 = vsel %vm399_vm13, %v474_v49, %v559_v61 }
 0x5f9   :  { %1841 = vmatmul.msk.f32.vlgmr.msrb.gmra.mxu0 %vm293_vm7, %v561_v63 }
 0x5fa   :  { %v1946_v0 = vpop.eup %1945 }
 0x5fb   :  { %v678_v1 = vsel %vm259_vm0, %v1946_v0, 0.0 }
 0x5fc   :  { %679 = vadd.xlane.f32.xlu1 %v678_v1 }
 0x615   :  { %696 = vrot.lane.b32.xlu1 %v2386_v7, %s2096_s13 }
 0x621   :  { %v594_v2 = vpop.xlane.xlu0 %593 }
 0x622   :  { %v595_v3 = vsub.f32 %v591_v52, %v594_v2  ;;  %v823_v52 = vld [vmem:[%s2185_s20 + $0x8] sm:$0xff]  ;;  %s2699_s20 = sld [smem:[#allocation16_spill]] }
 0x623   :  { %850 = vmatpush.msra.mxu0 %v823_v52 }
 0x624   :  { %v596_v4 = vmul.f32 1.442695, %v595_v3  ;;  %v2446_v3 = vld [vmem:[%s2692_s29] ss:$0 sm:$0xff] }
 0x625   :  { %851 = vmatpush.msra.mxu0 %v822_v40 }
 0x626   :  { %1947 = vpow2.f32 %v596_v4 }
 0x62c   :  { %v1948_v5 = vpop.eup %1947 }
 0x62d   :  { %v598_v6 = vsel %vm259_vm0, %v1948_v5, 0.0 }
 0x62e   :  { %599 = vadd.xlane.f32.xlu0 %v598_v6 }
 0x642   :  { %616 = vrot.lane.b32.xlu0 %v2386_v7, %s2097_s17 }
 0x66f   :  { %v680_v8 = vpop.xlane.xlu1 %679 }
 0x670   :  { %1949 = vrcp.f32 %v680_v8  ;;  %v692_v20 = vand.u32 2147483648, %v680_v8  ;;  %vm686_vm12 = vweird.f32 %v680_v8  ;;  %v690_v7 = vand.u32 2147483647, %v680_v8 }
 0x672   :  { %v693_v21 = vor.u32 1.1754944e-38, %v692_v20  ;;  %vm691_vm15 = vcmp.eq.f32.partialorder %v690_v7, 8.507059e+37  ;;  %v947_v7 = vld [vmem:[%s2693_s3 + $0x40] sm:$0xff] }
 0x676   :  { %v1950_v10 = vpop.eup %1949  ;;  %v758_v11 = vpop.f32.mrf.mxu0 }
 0x677   :  { %v682_v12 = vmul.f32 %v1950_v10, %v680_v8  ;;  %v759_v13 = vadd.f32 %v2425_v9, %v758_v11  ;;  %vm687_vm11 = vweird.f32 %v1950_v10 }
 0x678   :  { %vm688_vm14 = vmor %vm686_vm12, %vm687_vm11 }
 0x679   :  { %v683_v14 = vsub.f32 1.0, %v682_v12  ;;  %v764_v15 = vadd.f32 %v759_v13, %v2341_v18  ;;  %v954_v12 = vld [vmem:[%s2693_s3 + $0x78] sm:$0xff]  ;;  %v953_v13 = vld [vmem:[%s2693_s3 + $0x70] sm:$0xff] }
 0x67a   :  { %959 = vmatpush.msrb.mxu1 %v954_v12 }
 0x67b   :  { %v684_v16 = vmul.f32 %v1950_v10, %v683_v14  ;;  %v768_v17 = vsel %vm293_vm7, %v764_v15, 0.0  ;;  %v952_v14 = vld [vmem:[%s2693_s3 + $0x68] sm:$0xff] }
 0x67c   :  { %769 = vadd.xlane.f32.xlu2 %v768_v17  ;;  %960 = vmatpush.msrb.mxu1 %v953_v13 }
 0x67d   :  { %v685_v19 = vadd.f32 %v1950_v10, %v684_v16  ;;  %v950_v16 = vld [vmem:[%s2693_s3 + $0x58] sm:$0xff] }
 0x67e   :  { %961 = vmatpush.msrb.mxu1 %v952_v14 }
 0x67f   :  { %v689_v22 = vsel %vm688_vm14, %v1950_v10, %v685_v19  ;;  %v948_v19 = vld [vmem:[%s2693_s3 + $0x48] sm:$0xff] }
 0x680   :  { %v694_v23 = vsel %vm691_vm15, %v693_v21, %v689_v22  ;;  %v946_v21 = vld [vmem:[%s2693_s3 + $0x38] sm:$0xff] }
 0x681   :  { %v695_v25 = vmul.f32 %v1946_v0, %v694_v23  ;;  %v2443_v0 = vld [vmem:[%s2691_s25] ss:$0 sm:$0xff] }
 0x687   :  { %v697_v24 = vpop.permute.xlu1 %696 }
 0x688   :  { %717 = vmatpush.msrb.mxu3 %v697_v24  ;;  %v945_v24 = vld [vmem:[%s2693_s3 + $0x30] sm:$0xff] }
 0x689   :  { %1840 = vmatmul.msk.f32.vlgmr.msrb.gmra.mxu3 %vm259_vm0, %v695_v25 }
 0x6a1   :  { %v600_v18 = vpop.xlane.xlu0 %599 }
 0x6a2   :  { %1951 = vrcp.f32 %v600_v18  ;;  %v612_v29 = vand.u32 2147483648, %v600_v18  ;;  %v610_v31 = vand.u32 2147483647, %v600_v18  ;;  %vm606_vm2 = vweird.f32 %v600_v18 }
 0x6a4   :  { %v613_v33 = vor.u32 1.1754944e-38, %v612_v29  ;;  %vm611_vm4 = vcmp.eq.f32.partialorder %v610_v31, 8.507059e+37 }
 0x6a8   :  { %v1952_v26 = vpop.eup %1951 }
 0x6a9   :  { %v602_v27 = vmul.f32 %v1952_v26, %v600_v18  ;;  %vm607_vm1 = vweird.f32 %v1952_v26  ;;  %v944_v18 = vld [vmem:[%s2693_s3 + $0x28] sm:$0xff] }
 0x6aa   :  { %vm608_vm3 = vmor %vm606_vm2, %vm607_vm1 }
 0x6ab   :  { %v603_v28 = vsub.f32 1.0, %v602_v27  ;;  %v943_v27 = vld [vmem:[%s2693_s3 + $0x20] sm:$0xff] }
 0x6ad   :  { %v604_v30 = vmul.f32 %v1952_v26, %v603_v28  ;;  %v942_v28 = vld [vmem:[%s2693_s3 + $0x18] sm:$0xff] }
 0x6af   :  { %v605_v32 = vadd.f32 %v1952_v26, %v604_v30 }
 0x6b1   :  { %v609_v34 = vsel %vm608_vm3, %v1952_v26, %v605_v32  ;;  %v941_v32 = vld [vmem:[%s2693_s3 + $0x10] sm:$0xff] }
 0x6b2   :  { %v614_v35 = vsel %vm611_vm4, %v613_v33, %v609_v34 }
 0x6b3   :  { %v615_v36 = vmul.f32 %v1948_v5, %v614_v35 }
 0x6b4   :  { %v617_v37 = vpop.permute.xlu0 %616 }
 0x6b5   :  { %637 = vmatpush.msrb.mxu2 %v617_v37  ;;  %v939_v37 = vld [vmem:[%s2693_s3] sm:$0xff] }
 0x6b6   :  { %1837 = vmatmul.msk.f32.vlgmr.msrb.gmra.mxu2 %vm259_vm0, %v615_v36  ;;  %v940_v36 = vld [vmem:[%s2693_s3 + $0x8] sm:$0xff] }
 0x6ef   :  { %v770_v39 = vpop.xlane.xlu2 %769 }
 0x6f0   :  { %v774_v41 = vmul.f32 %v770_v39, %v2321_v55 }
 0x6f2   :  { %v776_v42 = vsub.f32 %v764_v15, %v774_v41  ;;  %v951_v15 = vld [vmem:[%s2693_s3 + $0x60] sm:$0xff] }
 0x6f3   :  { %962 = vmatpush.msrb.mxu1 %v951_v15 }
 0x6f4   :  { %v778_v45 = vmul.f32 %v776_v42, %v776_v42 }
 0x6f5   :  { %963 = vmatpush.msrb.mxu1 %v950_v16  ;;  %v2485_v16 = vld [vmem:[%s2695_s14] ss:$0 sm:$0xff] }
 0x6f6   :  { %v780_v46 = vsel %vm293_vm7, %v778_v45, 0.0 }
 0x70c   :  { %v719_v38 = vpop.f32.mrf.mxu3 }
 0x70d   :  { %723 = vrot.lane.b32.xlu1 %v719_v38, %s2098_s21 }
 0x737   :  { %781 = vadd.xlane.f32.xlu1 %v780_v46 }
 0x739   :  { %v639_v47 = vpop.f32.mrf.mxu2 }
 0x77f   :  { %v724_v48 = vpop.permute.xlu1 %723 }
 0x780   :  { %v726_v49 = vsel %vm399_vm13, %v639_v47, %v724_v48 }
 0x781   :  { %1842 = vmatmul.msk.f32.gmra.mxu0 %vm293_vm7, %v726_v49 }
 0x7aa   :  { %v782_v53 = vpop.xlane.xlu1 %781 }
 0x7ab   :  { %v786_v54 = vmul.f32 %v782_v53, %v2321_v55 }
 0x7ad   :  { %v788_v56 = vadd.f32 1e-12, %v786_v54 }
 0x7af   :  { %1953 = vrsqrt.f32 %v788_v56  ;;  %vm796_vm6 = vweird.f32 %v788_v56 }
 0x7b5   :  { %v1954_v57 = vpop.eup %1953 }
 0x7b6   :  { %v791_v58 = vmul.f32 %v1954_v57, %v788_v56  ;;  %vm797_vm5 = vweird.f32 %v1954_v57 }
 0x7b7   :  { %vm798_vm8 = vmor %vm796_vm6, %vm797_vm5 }
 0x7b8   :  { %v792_v59 = vmul.f32 %v1954_v57, %v791_v58 }
 0x7ba   :  { %v793_v60 = vmul.f32 0.5, %v792_v59 }
 0x7bc   :  { %v794_v61 = vsub.f32 1.5, %v793_v60 }
 0x7be   :  { %v795_v63 = vmul.f32 %v1954_v57, %v794_v61 }
 0x7c0   :  { %v799_v1 = vsel %vm798_vm8, %v1954_v57, %v795_v63 }
 0x7c1   :  { %v810_v2 = vmul.f32 %v799_v1, %v776_v42 }
 0x7c3   :  { %v815_v4 = vmul.f32 %v2443_v0, %v810_v2 }
 0x7c5   :  { %v2450_v5 = vadd.f32 %v2446_v3, %v815_v4 }
 0x7c7   :  { %1843 = vmatmul.msk.f32.vlgmr.msra.gmra.mxu0 %vm293_vm7, %v2450_v5 }
 0x7fe   :  { %v761_v6 = vpop.f32.mrf.mxu0 }
 0x7ff   :  { %v762_v8 = vadd.f32 %v2425_v9, %v761_v6  ;;  %v2466_v9 = vld [vmem:[%s2694_s8] ss:$0 sm:$0xff] }
 0x801   :  { %v2456_v10 = vadd.f32 %v762_v8, %v2378_v62  ;;  %v949_v62 = vld [vmem:[%s2693_s3 + $0x50] sm:$0xff] }
 0x802   :  { %964 = vmatpush.msrb.mxu1 %v949_v62 }
 0x803   :  { %v771_v11 = vsel %vm293_vm7, %v2456_v10, 0.0 }
 0x804   :  { %772 = vadd.xlane.f32.xlu0 %v771_v11  ;;  %965 = vmatpush.msrb.mxu1 %v948_v19 }
 0x806   :  { %966 = vmatpush.msrb.mxu1 %v947_v7 }
 0x808   :  { %967 = vmatpush.msrb.mxu1 %v946_v21 }
 0x80a   :  { %968 = vmatpush.msrb.mxu1 %v945_v24 }
 0x80c   :  { %969 = vmatpush.msrb.mxu1 %v944_v18 }
 0x80e   :  { %970 = vmatpush.msrb.mxu1 %v943_v27 }
 0x810   :  { %971 = vmatpush.msrb.mxu1 %v942_v28 }
 0x812   :  { %972 = vmatpush.msrb.mxu1 %v941_v32 }
 0x814   :  { %973 = vmatpush.msrb.mxu1 %v940_v36 }
 0x816   :  { %974 = vmatpush.msrb.mxu1 %v939_v37 }
 0x844   :  { %v853_v17 = vpop.f32.mrf.mxu0 }
 0x845   :  { %v854_v20 = vadd.f32 %v2466_v9, %v853_v17 }
 0x847   :  { %v861_v22 = vmul.f32 0.70710677, %v854_v20  ;;  %v859_v2 = vmul.f32 0.5, %v854_v20 }
 0x849   :  { %v863_v23 = vand.u32 2147483647, %v861_v22  ;;  %vm929_vm14 = vcmp.ge.f32.partialorder %v861_v22, 0.0 }
 0x84b   :  { %v865_v25 = vmul.f32 0.3275911, %v863_v23  ;;  %v917_v42 = vsub.f32 0.0, %v863_v23 }
 0x84d   :  { %v867_v26 = vadd.f32 1.0, %v865_v25  ;;  %v919_v48 = vmul.f32 %v917_v42, %v863_v23 }
 0x84f   :  { %1955 = vrcp.f32 %v867_v26  ;;  %v880_v33 = vand.u32 2147483648, %v867_v26  ;;  %v878_v35 = vand.u32 2147483647, %v867_v26  ;;  %vm874_vm10 = vweird.f32 %v867_v26 }
 0x850   :  { %v921_v51 = vmul.f32 1.442695, %v919_v48 }
 0x851   :  { %v881_v39 = vor.u32 1.1754944e-38, %v880_v33  ;;  %vm879_vm12 = vcmp.eq.f32.partialorder %v878_v35, 8.507059e+37 }
 0x852   :  { %1957 = vpow2.f32 %v921_v51 }
 0x855   :  { %v1956_v29 = vpop.eup %1955 }
 0x856   :  { %v870_v30 = vmul.f32 %v1956_v29, %v867_v26  ;;  %vm875_vm9 = vweird.f32 %v1956_v29 }
 0x857   :  { %vm876_vm11 = vmor %vm874_vm10, %vm875_vm9 }
 0x858   :  { %v871_v31 = vsub.f32 1.0, %v870_v30  ;;  %v1958_v57 = vpop.eup %1957 }
 0x85a   :  { %v872_v34 = vmul.f32 %v1956_v29, %v871_v31 }
 0x85c   :  { %v873_v38 = vadd.f32 %v1956_v29, %v872_v34 }
 0x85e   :  { %v877_v41 = vsel %vm876_vm11, %v1956_v29, %v873_v38 }
 0x85f   :  { %v882_v45 = vsel %vm879_vm12, %v881_v39, %v877_v41 }
 0x860   :  { %v899_v46 = vmul.f32 1.0614054, %v882_v45 }
 0x862   :  { %v901_v47 = vadd.f32 -1.4531521, %v899_v46 }
 0x864   :  { %v903_v49 = vmul.f32 %v901_v47, %v882_v45 }
 0x866   :  { %v905_v50 = vadd.f32 1.4214138, %v903_v49 }
 0x868   :  { %v907_v52 = vmul.f32 %v905_v50, %v882_v45 }
 0x86a   :  { %v909_v40 = vadd.f32 -0.28449672, %v907_v52 }
 0x86c   :  { %v911_v53 = vmul.f32 %v909_v40, %v882_v45 }
 0x86e   :  { %v913_v54 = vadd.f32 0.2548296, %v911_v53 }
 0x870   :  { %v915_v56 = vmul.f32 %v913_v54, %v882_v45 }
 0x872   :  { %v925_v58 = vmul.f32 %v1958_v57, %v915_v56 }
 0x874   :  { %v927_v59 = vsub.f32 1.0, %v925_v58 }
 0x876   :  { %v931_v60 = vsub.f32 0.0, %v927_v59 }
 0x877   :  { %v773_v61 = vpop.xlane.xlu0 %772 }
 0x878   :  { %v775_v63 = vmul.f32 %v773_v61, %v2321_v55  ;;  %v933_v1 = vsel %vm929_vm14, %v927_v59, %v931_v60 }
 0x879   :  { %v935_v4 = vadd.f32 1.0, %v933_v1 }
 0x87a   :  { %v777_v6 = vsub.f32 %v2456_v10, %v775_v63 }
 0x87b   :  { %v937_v8 = vmul.f32 %v935_v4, %v859_v2 }
 0x87c   :  { %v779_v11 = vmul.f32 %v777_v6, %v777_v6 }
 0x87d   :  { %975 = vmatmul.f32.vlgmr.msrb.gmra.mxu1 %v937_v8 }
 0x87e   :  { %v783_v12 = vsel %vm293_vm7, %v779_v11, 0.0  ;;  %v1043_v11 = vld [vmem:[%s2696_s19 + $0x18] sm:$0xff] }
 0x87f   :  { %784 = vadd.xlane.f32.xlu2 %v783_v12  ;;  %1066 = vmatpush.msra.mxu3 %v1043_v11  ;;  %v1042_v12 = vld [vmem:[%s2696_s19 + $0x10] sm:$0xff] }
 0x881   :  { %1067 = vmatpush.msra.mxu3 %v1042_v12 }
 0x8f2   :  { %v785_v13 = vpop.xlane.xlu2 %784 }
 0x8f3   :  { %v787_v14 = vmul.f32 %v785_v13, %v2321_v55  ;;  %v1041_v13 = vld [vmem:[%s2696_s19 + $0x8] sm:$0xff] }
 0x8f4   :  { %1068 = vmatpush.msra.mxu3 %v1041_v13 }
 0x8f5   :  { %v789_v15 = vadd.f32 1e-12, %v787_v14  ;;  %v1040_v14 = vld [vmem:[%s2696_s19] sm:$0xff] }
 0x8f6   :  { %1069 = vmatpush.msra.mxu3 %v1040_v14 }
 0x8f7   :  { %1959 = vrsqrt.f32 %v789_v15  ;;  %vm806_vm1 = vweird.f32 %v789_v15 }
 0x8fa   :  { %v976_v62 = vpop.f32.mrf.mxu1 }
 0x8fb   :  { %v977_v17 = vadd.f32 %v2485_v16, %v976_v62 }
 0x8fd   :  { %v1960_v19 = vpop.eup %1959  ;;  %v982_v20 = vadd.f32 %v977_v17, %v2450_v5 }
 0x8fe   :  { %v801_v10 = vmul.f32 %v1960_v19, %v789_v15  ;;  %vm807_vm15 = vweird.f32 %v1960_v19 }
 0x8ff   :  { %v986_v7 = vsel %vm293_vm7, %v982_v20, 0.0  ;;  %vm808_vm2 = vmor %vm806_vm1, %vm807_vm15 }
 0x900   :  { %v802_v22 = vmul.f32 %v1960_v19, %v801_v10  ;;  %987 = vadd.xlane.f32.xlu1 %v986_v7 }
 0x902   :  { %v803_v21 = vmul.f32 0.5, %v802_v22 }
 0x904   :  { %v804_v23 = vsub.f32 1.5, %v803_v21 }
 0x906   :  { %v805_v24 = vmul.f32 %v1960_v19, %v804_v23  ;;  %v1921_v23 = vld [vmem:[%s2697_s24] ss:$0 sm:$0xff] }
 0x908   :  { %v809_v25 = vsel %vm808_vm2, %v1960_v19, %v805_v24 }
 0x909   :  { %v811_v18 = vmul.f32 %v809_v25, %v777_v6 }
 0x90b   :  { %v816_v26 = vmul.f32 %v2443_v0, %v811_v18  ;;  %v1922_v18 = vld [vmem:[%s2698_s30] ss:$0 sm:$0xff] }
 0x90d   :  { %v2492_v27 = vadd.f32 %v2446_v3, %v816_v26 }
 0x90f   :  { %1844 = vmatmul.msk.f32.gmra.mxu0 %vm293_vm7, %v2492_v27 }
 0x973   :  { %v988_v5 = vpop.xlane.xlu1 %987 }
 0x974   :  { %v992_v28 = vmul.f32 %v988_v5, %v2321_v55 }
 0x976   :  { %v2497_v29 = vsub.f32 %v982_v20, %v992_v28 }
 0x978   :  { %v996_v30 = vmul.f32 %v2497_v29, %v2497_v29 }
 0x97a   :  { %v998_v31 = vsel %vm293_vm7, %v996_v30, 0.0 }
 0x97b   :  { %999 = vadd.xlane.f32.xlu2 %v998_v31 }
 0x98c   :  { %v856_v32 = vpop.f32.mrf.mxu0 }
 0x98d   :  { %v857_v0 = vadd.f32 %v2466_v9, %v856_v32 }
 0x98f   :  { %v862_v33 = vmul.f32 0.70710677, %v857_v0  ;;  %v860_v4 = vmul.f32 0.5, %v857_v0  ;;  %v1923_v0 = vld [vmem:[%s2699_s20] ss:$0 sm:$0xff] }
 0x991   :  { %v864_v3 = vand.u32 2147483647, %v862_v33  ;;  %vm930_vm8 = vcmp.ge.f32.partialorder %v862_v33, 0.0 }
 0x993   :  { %v866_v34 = vmul.f32 0.3275911, %v864_v3  ;;  %v918_v48 = vsub.f32 0.0, %v864_v3 }
 0x995   :  { %v868_v35 = vadd.f32 1.0, %v866_v34  ;;  %v920_v51 = vmul.f32 %v918_v48, %v864_v3 }
 0x997   :  { %1961 = vrcp.f32 %v868_v35  ;;  %v895_v39 = vand.u32 2147483648, %v868_v35  ;;  %v893_v42 = vand.u32 2147483647, %v868_v35  ;;  %vm889_vm4 = vweird.f32 %v868_v35 }
 0x998   :  { %v923_v53 = vmul.f32 1.442695, %v920_v51 }
 0x999   :  { %v896_v46 = vor.u32 1.1754944e-38, %v895_v39  ;;  %vm894_vm6 = vcmp.eq.f32.partialorder %v893_v42, 8.507059e+37 }
 0x99a   :  { %1963 = vpow2.f32 %v923_v53 }
 0x99d   :  { %v1962_v36 = vpop.eup %1961 }
 0x99e   :  { %v885_v37 = vmul.f32 %v1962_v36, %v868_v35  ;;  %vm890_vm3 = vweird.f32 %v1962_v36 }
 0x99f   :  { %vm891_vm5 = vmor %vm889_vm4, %vm890_vm3 }
 0x9a0   :  { %v886_v38 = vsub.f32 1.0, %v885_v37  ;;  %v1964_v60 = vpop.eup %1963 }
 0x9a2   :  { %v887_v41 = vmul.f32 %v1962_v36, %v886_v38 }
 0x9a4   :  { %v888_v45 = vadd.f32 %v1962_v36, %v887_v41 }
 0x9a6   :  { %v892_v47 = vsel %vm891_vm5, %v1962_v36, %v888_v45 }
 0x9a7   :  { %v897_v9 = vsel %vm894_vm6, %v896_v46, %v892_v47 }
 0x9a8   :  { %v900_v49 = vmul.f32 1.0614054, %v897_v9 }
 0x9aa   :  { %v902_v50 = vadd.f32 -1.4531521, %v900_v49 }
 0x9ac   :  { %v904_v52 = vmul.f32 %v902_v50, %v897_v9 }
 0x9ae   :  { %v906_v40 = vadd.f32 1.4214138, %v904_v52 }
 0x9b0   :  { %v908_v54 = vmul.f32 %v906_v40, %v897_v9 }
 0x9b2   :  { %v910_v56 = vadd.f32 -0.28449672, %v908_v54 }
 0x9b4   :  { %v912_v57 = vmul.f32 %v910_v56, %v897_v9 }
 0x9b6   :  { %v914_v58 = vadd.f32 0.2548296, %v912_v57 }
 0x9b8   :  { %v916_v59 = vmul.f32 %v914_v58, %v897_v9 }
 0x9ba   :  { %v926_v61 = vmul.f32 %v1964_v60, %v916_v59 }
 0x9bc   :  { %v928_v63 = vsub.f32 1.0, %v926_v61 }
 0x9be   :  { %v932_v1 = vsub.f32 0.0, %v928_v63 }
 0x9c0   :  { %v934_v2 = vsel %vm930_vm8, %v928_v63, %v932_v1 }
 0x9c1   :  { %v936_v6 = vadd.f32 1.0, %v934_v2 }
 0x9c3   :  { %v938_v8 = vmul.f32 %v936_v6, %v860_v4 }
 0x9c5   :  { %978 = vmatmul.f32.gmra.mxu1 %v938_v8 }
 0x9ee   :  { %v1000_v15 = vpop.xlane.xlu2 %999 }
 0x9ef   :  { %v1004_v62 = vmul.f32 %v1000_v15, %v2321_v55 }
 0x9f1   :  { %v1006_v17 = vadd.f32 1e-12, %v1004_v62 }
 0x9f3   :  { %1965 = vrsqrt.f32 %v1006_v17  ;;  %vm1014_vm10 = vweird.f32 %v1006_v17 }
 0x9f9   :  { %v1966_v19 = vpop.eup %1965 }
 0x9fa   :  { %v1009_v20 = vmul.f32 %v1966_v19, %v1006_v17  ;;  %vm1015_vm9 = vweird.f32 %v1966_v19 }
 0x9fb   :  { %vm1016_vm11 = vmor %vm1014_vm10, %vm1015_vm9 }
 0x9fc   :  { %v1010_v10 = vmul.f32 %v1966_v19, %v1009_v20 }
 0x9fe   :  { %v1011_v7 = vmul.f32 0.5, %v1010_v10 }
 0xa00   :  { %v1012_v22 = vsub.f32 1.5, %v1011_v7 }
 0xa02   :  { %v1013_v21 = vmul.f32 %v1966_v19, %v1012_v22 }
 0xa04   :  { %v1017_v24 = vsel %vm1016_vm11, %v1966_v19, %v1013_v21 }
 0xa05   :  { %v1028_v25 = vmul.f32 %v1017_v24, %v2497_v29 }
 0xa07   :  { %v1033_v26 = vmul.f32 %v1921_v23, %v1028_v25 }
 0xa09   :  { %v2511_v5 = vadd.f32 %v1922_v18, %v1033_v26 }
 0xa0b   :  { %1845 = vmatmul.msk.f32.vlgmr.msra.gmra.mxu3 %vm293_vm7, %v2511_v5 }
 0xa42   :  { %v979_v28 = vpop.f32.mrf.mxu1 }
 0xa43   :  { %v980_v30 = vadd.f32 %v2485_v16, %v979_v28 }
 0xa45   :  { %v983_v31 = vadd.f32 %v980_v30, %v2492_v27 }
 0xa47   :  { %v989_v32 = vsel %vm293_vm7, %v983_v31, 0.0 }
 0xa48   :  { %990 = vadd.xlane.f32.xlu0 %v989_v32 }
 0xa8e   :  { %v1071_v33 = vpop.f32.mrf.mxu3 }
 0xa8f   :  { %v1072_v3 = vadd.f32 %v1923_v0, %v1071_v33 }
 0xa91   :  { %1156 = vrot.lane.b32.xlu0 %v1072_v3, %s2095_s9  ;;  %1158 = vrot.lane.b32.xlu2 %v1072_v3, %s2093_s0 }
 0xabb   :  { %v991_v29 = vpop.xlane.xlu0 %990 }
 0xabc   :  { %v993_v34 = vmul.f32 %v991_v29, %v2321_v55 }
 0xabe   :  { %v995_v35 = vsub.f32 %v983_v31, %v993_v34 }
 0xac0   :  { %v997_v36 = vmul.f32 %v995_v35, %v995_v35 }
 0xac2   :  { %v1001_v37 = vsel %vm293_vm7, %v997_v36, 0.0 }
 0xac3   :  { %1002 = vadd.xlane.f32.xlu1 %v1001_v37 }
 0xadc   :  { %1078 = vrot.lane.b32.xlu1 %v1072_v3, %s2094_s5 }
 0xaeb   :  { %v1159_v16 = vpop.permute.xlu2 %1158 }
 0xaec   :  { %1850 = vmatpush.xpose.msk.msrb.mxu3 %vm399_vm13, %v1159_v16 }
 0xb03   :  { %v1157_v40 = vpop.permute.xlu0 %1156 }
 0xb36   :  { %v1003_v27 = vpop.xlane.xlu1 %1002 }
 0xb37   :  { %v1005_v38 = vmul.f32 %v1003_v27, %v2321_v55 }
 0xb39   :  { %v1007_v39 = vadd.f32 1e-12, %v1005_v38 }
 0xb3b   :  { %1967 = vrsqrt.f32 %v1007_v39  ;;  %vm1024_vm14 = vweird.f32 %v1007_v39 }
 0xb41   :  { %v1968_v41 = vpop.eup %1967 }
 0xb42   :  { %v1019_v42 = vmul.f32 %v1968_v41, %v1007_v39  ;;  %vm1025_vm12 = vweird.f32 %v1968_v41 }
 0xb43   :  { %vm1026_vm15 = vmor %vm1024_vm14, %vm1025_vm12 }
 0xb44   :  { %v1020_v45 = vmul.f32 %v1968_v41, %v1019_v42 }
 0xb46   :  { %v1021_v46 = vmul.f32 0.5, %v1020_v45 }
 0xb48   :  { %v1022_v47 = vsub.f32 1.5, %v1021_v46 }
 0xb4a   :  { %v1023_v48 = vmul.f32 %v1968_v41, %v1022_v47 }
 0xb4c   :  { %v1027_v9 = vsel %vm1026_vm15, %v1968_v41, %v1023_v48 }
 0xb4d   :  { %v1029_v49 = vmul.f32 %v1027_v9, %v995_v35 }
 0xb4e   :  { %v1079_v50 = vpop.permute.xlu1 %1078 }
 0xb4f   :  { %1847 = vmatpush.xpose.msk.msra.mxu1 %vm399_vm13, %v1079_v50  ;;  %v1034_v51 = vmul.f32 %v1921_v23, %v1029_v49 }
 0xb51   :  { %v2527_v52 = vadd.f32 %v1922_v18, %v1034_v51 }
 0xb52   :  { %1848 = vmatmul.msk.f32.vlgmr.msra.gmra.mxu1 %vm399_vm13, %v1072_v3 }
 0xb53   :  { %1846 = vmatmul.msk.f32.gmra.mxu3 %vm293_vm7, %v2527_v52 }
 0xb5b   :  { %1851 = vmatmul.msk.f32.vlgmr.msrb.gmra.mxu3 %vm399_vm13, %v1157_v40  ;;  %v1408_v40 = vld [vmem:[%s2700_s15 + $0x18] sm:$0xff] }
 0xb5c   :  { %1431 = vmatpush.msrb.mxu1 %v1408_v40  ;;  %v1502_v40 = vld [vmem:[%s2702_s18 + $0x10] sm:$0xff] }
 0xbcf   :  { %v1101_v53 = vpop.f32.mrf.mxu1 }
 0xbd0   :  { %v1104_v54 = vmul.f32 0.25, %v1101_v53  ;;  %v1407_v53 = vld [vmem:[%s2700_s15 + $0x10] sm:$0xff] }
 0xbd1   :  { %1432 = vmatpush.msrb.mxu1 %v1407_v53  ;;  %v1501_v53 = vld [vmem:[%s2702_s18 + $0x8] sm:$0xff] }
 0xbd2   :  { %v1105_v56 = vadd.f32 %v1104_v54, %v2369_v43  ;;  %v1406_v54 = vld [vmem:[%s2700_s15 + $0x8] sm:$0xff] }
 0xbd3   :  { %1433 = vmatpush.msrb.mxu1 %v1406_v54  ;;  %v1500_v54 = vld [vmem:[%s2702_s18] sm:$0xff] }
 0xbd4   :  { %v1106_v57 = vsel %vm259_vm0, %v1105_v56, -inf }
 0xbd5   :  { %1107 = vmax.xlane.f32.xlu2 %v1106_v57 }
 0xbd6   :  { %v1074_v58 = vpop.f32.mrf.mxu3 }
 0xbd7   :  { %v2537_v1 = vadd.f32 %v1923_v0, %v1074_v58 }
 0xbde   :  { %v1181_v59 = vpop.f32.mrf.mxu3 }
 0xbdf   :  { %v1184_v60 = vmul.f32 0.25, %v1181_v59 }
 0xbe1   :  { %v1185_v61 = vadd.f32 %v1184_v60, %v2369_v43 }
 0xbe3   :  { %v1186_v63 = vsel %vm259_vm0, %v1185_v61, -inf }
 0xbe4   :  { %1187 = vmax.xlane.f32.xlu0 %v1186_v63 }
 0xbed   :  { %1322 = vrot.lane.b32.xlu2 %v2537_v1, %s2093_s0 }
 0xbf5   :  { %1130 = vrot.lane.b32.xlu2 %v1072_v3, %s2097_s17 }
 0xbf8   :  { %1210 = vrot.lane.b32.xlu0 %v1072_v3, %s2096_s13 }
 0xc48   :  { %v1108_v2 = vpop.xlane.xlu2 %1107 }
 0xc49   :  { %v1109_v4 = vsub.f32 %v1105_v56, %v1108_v2  ;;  %v1405_v56 = vld [vmem:[%s2700_s15] sm:$0xff] }
 0xc4a   :  { %1434 = vmatpush.msrb.mxu1 %v1405_v56 }
 0xc4b   :  { %v1110_v6 = vmul.f32 1.442695, %v1109_v4 }
 0xc4d   :  { %1969 = vpow2.f32 %v1110_v6 }
 0xc50   :  { %v1323_v8 = vpop.permute.xlu2 %1322 }
 0xc53   :  { %v1970_v11 = vpop.eup %1969 }
 0xc54   :  { %v1112_v43 = vsel %vm259_vm0, %v1970_v11, 0.0 }
 0xc55   :  { %1113 = vadd.xlane.f32.xlu0 %v1112_v43 }
 0xc57   :  { %v1188_v12 = vpop.xlane.xlu0 %1187 }
 0xc58   :  { %v1189_v13 = vsub.f32 %v1185_v61, %v1188_v12  ;;  %v1131_v14 = vpop.permute.xlu2 %1130 }
 0xc59   :  { %1151 = vmatpush.msrb.mxu0 %v1131_v14 }
 0xc5a   :  { %v1190_v15 = vmul.f32 1.442695, %v1189_v13 }
 0xc5c   :  { %1971 = vpow2.f32 %v1190_v15 }
 0xc62   :  { %v1972_v62 = vpop.eup %1971 }
 0xc63   :  { %v1192_v17 = vsel %vm259_vm0, %v1972_v62, 0.0 }
 0xc64   :  { %1193 = vadd.xlane.f32.xlu1 %v1192_v17 }
 0xc6a   :  { %v1211_v19 = vpop.permute.xlu0 %1210 }
 0xc6b   :  { %1231 = vmatpush.msra.mxu2 %v1211_v19 }
 0xc6d   :  { %1856 = vmatpush.xpose.msk.msrb.mxu2 %vm399_vm13, %v1323_v8 }
 0xc7d   :  { %1320 = vrot.lane.b32.xlu1 %v2537_v1, %s2095_s9 }
 0xc85   :  { %1242 = vrot.lane.b32.xlu1 %v2537_v1, %s2094_s5 }
 0xcc8   :  { %v1114_v20 = vpop.xlane.xlu0 %1113 }
 0xcc9   :  { %1973 = vrcp.f32 %v1114_v20  ;;  %v1126_v21 = vand.u32 2147483648, %v1114_v20  ;;  %v1124_v24 = vand.u32 2147483647, %v1114_v20  ;;  %vm1120_vm2 = vweird.f32 %v1114_v20 }
 0xccb   :  { %v1127_v18 = vor.u32 1.1754944e-38, %v1126_v21  ;;  %vm1125_vm4 = vcmp.eq.f32.partialorder %v1124_v24, 8.507059e+37 }
 0xccf   :  { %v1974_v10 = vpop.eup %1973 }
 0xcd0   :  { %v1116_v7 = vmul.f32 %v1974_v10, %v1114_v20  ;;  %vm1121_vm1 = vweird.f32 %v1974_v10 }
 0xcd1   :  { %vm1122_vm3 = vmor %vm1120_vm2, %vm1121_vm1 }
 0xcd2   :  { %v1117_v22 = vsub.f32 1.0, %v1116_v7 }
 0xcd4   :  { %v1118_v23 = vmul.f32 %v1974_v10, %v1117_v22 }
 0xcd6   :  { %v1119_v25 = vadd.f32 %v1974_v10, %v1118_v23 }
 0xcd7   :  { %v1194_v26 = vpop.xlane.xlu1 %1193 }
 0xcd8   :  { %v1123_v28 = vsel %vm1122_vm3, %v1974_v10, %v1119_v25  ;;  %1975 = vrcp.f32 %v1194_v26  ;;  %v1206_v3 = vand.u32 2147483648, %v1194_v26  ;;  %v1204_v34 = vand.u32 2147483647, %v1194_v26 }
 0xcd9   :  { %v1128_v30 = vsel %vm1125_vm4, %v1127_v18, %v1123_v28  ;;  %vm1200_vm6 = vweird.f32 %v1194_v26 }
 0xcda   :  { %v1129_v31 = vmul.f32 %v1970_v11, %v1128_v30  ;;  %v1207_v36 = vor.u32 1.1754944e-38, %v1206_v3  ;;  %vm1205_vm9 = vcmp.eq.f32.partialorder %v1204_v34, 8.507059e+37  ;;  %v1924_v34 = vld [vmem:[%s2701_s16] ss:$0 sm:$0xff] }
 0xcdc   :  { %1849 = vmatmul.msk.f32.vlgmr.msrb.gmra.mxu0 %vm259_vm0, %v1129_v31 }
 0xcde   :  { %v1976_v32 = vpop.eup %1975 }
 0xcdf   :  { %v1196_v0 = vmul.f32 %v1976_v32, %v1194_v26  ;;  %vm1201_vm5 = vweird.f32 %v1976_v32 }
 0xce0   :  { %vm1202_vm8 = vmor %vm1200_vm6, %vm1201_vm5 }
 0xce1   :  { %v1197_v33 = vsub.f32 1.0, %v1196_v0 }
 0xce3   :  { %v1198_v29 = vmul.f32 %v1976_v32, %v1197_v33 }
 0xce5   :  { %v1199_v35 = vadd.f32 %v1976_v32, %v1198_v29 }
 0xce7   :  { %v1203_v37 = vsel %vm1202_vm8, %v1976_v32, %v1199_v35 }
 0xce8   :  { %v1208_v16 = vsel %vm1205_vm9, %v1207_v36, %v1203_v37 }
 0xce9   :  { %v1209_v27 = vmul.f32 %v1972_v62, %v1208_v16 }
 0xceb   :  { %1852 = vmatmul.msk.f32.vlgmr.msra.gmra.mxu2 %vm259_vm0, %v1209_v27 }
 0xcef   :  { %v1321_v38 = vpop.permute.xlu1 %1320 }
 0xcf3   :  { %1857 = vmatmul.msk.f32.vlgmr.msrb.gmra.mxu2 %vm399_vm13, %v1321_v38 }
 0xcf7   :  { %v1243_v39 = vpop.permute.xlu1 %1242 }
 0xcf8   :  { %1853 = vmatpush.xpose.msk.msra.mxu0 %vm399_vm13, %v1243_v39 }
 0xcfb   :  { %1854 = vmatmul.msk.f32.vlgmr.msra.gmra.mxu0 %vm399_vm13, %v2537_v1 }
 0xd59   :  { %v1153_v42 = vpop.f32.mrf.mxu0 }
 0xd6e   :  { %v1233_v41 = vpop.f32.mrf.mxu2 }
 0xd76   :  { %v1345_v45 = vpop.f32.mrf.mxu2 }
 0xd77   :  { %v1348_v46 = vmul.f32 0.25, %v1345_v45 }
 0xd78   :  { %v1265_v47 = vpop.f32.mrf.mxu0 }
 0xd79   :  { %v1268_v48 = vmul.f32 0.25, %v1265_v47  ;;  %v1349_v9 = vadd.f32 %v1348_v46, %v2405_v44 }
 0xd7b   :  { %v1350_v49 = vsel %vm259_vm0, %v1349_v9, -inf  ;;  %v1269_v50 = vadd.f32 %v1268_v48, %v2405_v44 }
 0xd7c   :  { %1351 = vmax.xlane.f32.xlu2 %v1350_v49 }
 0xd7d   :  { %v1270_v51 = vsel %vm259_vm0, %v1269_v50, -inf }
 0xd7e   :  { %1271 = vmax.xlane.f32.xlu1 %v1270_v51  ;;  %v1503_v51 = vld [vmem:[%s2702_s18 + $0x18] sm:$0xff] }
 0xd97   :  { %1237 = vrot.lane.b32.xlu1 %v1233_v41, %s2098_s21 }
 0xdef   :  { %v1352_v57 = vpop.xlane.xlu2 %1351 }
 0xdf0   :  { %v1353_v58 = vsub.f32 %v1349_v9, %v1352_v57 }
 0xdf1   :  { %v1272_v59 = vpop.xlane.xlu1 %1271 }
 0xdf2   :  { %v1354_v60 = vmul.f32 1.442695, %v1353_v58  ;;  %v1273_v61 = vsub.f32 %v1269_v50, %v1272_v59 }
 0xdf4   :  { %1977 = vpow2.f32 %v1354_v60  ;;  %v1274_v44 = vmul.f32 1.442695, %v1273_v61 }
 0xdf6   :  { %1979 = vpow2.f32 %v1274_v44 }
 0xdfa   :  { %v1978_v63 = vpop.eup %1977 }
 0xdfb   :  { %v1356_v2 = vsel %vm259_vm0, %v1978_v63, 0.0 }
 0xdfc   :  { %v1980_v4 = vpop.eup %1979  ;;  %1357 = vadd.xlane.f32.xlu0 %v1356_v2 }
 0xdfd   :  { %v1276_v6 = vsel %vm259_vm0, %v1980_v4, 0.0 }
 0xdfe   :  { %1277 = vadd.xlane.f32.xlu2 %v1276_v6 }
 0xe09   :  { %v1238_v8 = vpop.permute.xlu1 %1237 }
 0xe0a   :  { %v1240_v11 = vsel %vm399_vm13, %v1153_v42, %v1238_v8 }
 0xe0b   :  { %1859 = vmatmul.msk.f32.vlgmr.msrb.gmra.mxu1 %vm293_vm7, %v1240_v11  ;;  %v2594_v11 = vld [vmem:[%s2704_s23] ss:$0 sm:$0xff] }
 0xe10   :  { %1374 = vrot.lane.b32.xlu0 %v2537_v1, %s2096_s13 }
 0xe16   :  { %1294 = vrot.lane.b32.xlu2 %v2537_v1, %s2097_s17 }
 0xe6f   :  { %v1358_v43 = vpop.xlane.xlu0 %1357 }
 0xe70   :  { %1981 = vrcp.f32 %v1358_v43  ;;  %v1370_v20 = vand.u32 2147483648, %v1358_v43  ;;  %v1368_v7 = vand.u32 2147483647, %v1358_v43  ;;  %vm1364_vm11 = vweird.f32 %v1358_v43 }
 0xe71   :  { %v1278_v12 = vpop.xlane.xlu2 %1277 }
 0xe72   :  { %1983 = vrcp.f32 %v1278_v12  ;;  %v1290_v21 = vand.u32 2147483648, %v1278_v12  ;;  %v1288_v24 = vand.u32 2147483647, %v1278_v12  ;;  %v1371_v25 = vor.u32 1.1754944e-38, %v1370_v20  ;;  %v1631_v20 = vld [vmem:[%s2705_s26 + $0x70] sm:$0xff] }
 0xe73   :  { %vm1369_vm15 = vcmp.eq.f32.partialorder %v1368_v7, 8.507059e+37  ;;  %vm1284_vm1 = vweird.f32 %v1278_v12  ;;  %v1630_v7 = vld [vmem:[%s2705_s26 + $0x68] sm:$0xff] }
 0xe74   :  { %v1291_v30 = vor.u32 1.1754944e-38, %v1290_v21  ;;  %vm1289_vm3 = vcmp.eq.f32.partialorder %v1288_v24, 8.507059e+37  ;;  %v1629_v21 = vld [vmem:[%s2705_s26 + $0x60] sm:$0xff] }
 0xe76   :  { %v1982_v13 = vpop.eup %1981 }
 0xe77   :  { %v1360_v14 = vmul.f32 %v1982_v13, %v1358_v43  ;;  %vm1365_vm10 = vweird.f32 %v1982_v13 }
 0xe78   :  { %v1984_v15 = vpop.eup %1983  ;;  %vm1366_vm14 = vmor %vm1364_vm11, %vm1365_vm10 }
 0xe79   :  { %v1361_v62 = vsub.f32 1.0, %v1360_v14  ;;  %v1280_v17 = vmul.f32 %v1984_v15, %v1278_v12  ;;  %v1295_v19 = vpop.permute.xlu2 %1294  ;;  %vm1285_vm12 = vweird.f32 %v1984_v15 }
 0xe7a   :  { %1315 = vmatpush.msra.mxu3 %v1295_v19  ;;  %vm1286_vm2 = vmor %vm1284_vm1, %vm1285_vm12  ;;  %v1632_v19 = vld [vmem:[%s2705_s26 + $0x78] sm:$0xff] }
 0xe7b   :  { %v1362_v10 = vmul.f32 %v1982_v13, %v1361_v62  ;;  %v1281_v22 = vsub.f32 1.0, %v1280_v17  ;;  %1637 = vmatpush.msra.mxu2 %v1632_v19 }
 0xe7c   :  { %1526 = vmatpush.msrb.mxu3 %v1503_v51 }
 0xe7d   :  { %v1363_v23 = vadd.f32 %v1982_v13, %v1362_v10  ;;  %v1282_v1 = vmul.f32 %v1984_v15, %v1281_v22  ;;  %v2611_v10 = vld [vmem:[%s2706_s28] ss:$0 sm:$0xff]  ;;  %1638 = vmatpush.msra.mxu2 %v1631_v20 }
 0xe7e   :  { %1527 = vmatpush.msrb.mxu3 %v1502_v40 }
 0xe7f   :  { %v1367_v18 = vsel %vm1366_vm14, %v1982_v13, %v1363_v23  ;;  %v1283_v26 = vadd.f32 %v1984_v15, %v1282_v1  ;;  %1639 = vmatpush.msra.mxu2 %v1630_v7  ;;  %v1628_v1 = vld [vmem:[%s2705_s26 + $0x58] sm:$0xff] }
 0xe80   :  { %v1372_v28 = vsel %vm1369_vm15, %v1371_v25, %v1367_v18  ;;  %1528 = vmatpush.msrb.mxu3 %v1501_v53  ;;  %v1627_v25 = vld [vmem:[%s2705_s26 + $0x50] sm:$0xff] }
 0xe81   :  { %v1287_v31 = vsel %vm1286_vm2, %v1984_v15, %v1283_v26  ;;  %v1373_v32 = vmul.f32 %v1978_v63, %v1372_v28  ;;  %1640 = vmatpush.msra.mxu2 %v1629_v21  ;;  %v1626_v26 = vld [vmem:[%s2705_s26 + $0x48] sm:$0xff] }
 0xe82   :  { %v1292_v0 = vsel %vm1289_vm3, %v1291_v30, %v1287_v31  ;;  %v1375_v33 = vpop.permute.xlu0 %1374  ;;  %1529 = vmatpush.msrb.mxu3 %v1500_v54  ;;  %v1625_v30 = vld [vmem:[%s2705_s26 + $0x40] sm:$0xff] }
 0xe83   :  { %1395 = vmatpush.msrb.mxu0 %v1375_v33  ;;  %v1293_v3 = vmul.f32 %v1980_v4, %v1292_v0  ;;  %v2591_v4 = vld [vmem:[%s2703_s22] ss:$0 sm:$0xff]  ;;  %1641 = vmatpush.msra.mxu2 %v1628_v1  ;;  %v1623_v0 = vld [vmem:[%s2705_s26 + $0x30] sm:$0xff]  ;;  %v1622_v33 = vld [vmem:[%s2705_s26 + $0x28] sm:$0xff] }
 0xe84   :  { %1858 = vmatmul.msk.f32.vlgmr.msrb.gmra.mxu0 %vm259_vm0, %v1373_v32  ;;  %v1624_v32 = vld [vmem:[%s2705_s26 + $0x38] sm:$0xff] }
 0xe85   :  { %1855 = vmatmul.msk.f32.vlgmr.msra.gmra.mxu3 %vm259_vm0, %v1293_v3  ;;  %1642 = vmatpush.msra.mxu2 %v1627_v25  ;;  %v1621_v3 = vld [vmem:[%s2705_s26 + $0x20] sm:$0xff] }
 0xe87   :  { %1643 = vmatpush.msra.mxu2 %v1626_v26 }
 0xe88   :  { %v1436_v35 = vpop.f32.mrf.mxu1 }
 0xe89   :  { %v1437_v36 = vadd.f32 %v1924_v34, %v1436_v35  ;;  %1644 = vmatpush.msra.mxu2 %v1625_v30  ;;  %v1620_v35 = vld [vmem:[%s2705_s26 + $0x18] sm:$0xff] }
 0xe8b   :  { %v1442_v37 = vadd.f32 %v1437_v36, %v2511_v5  ;;  %1645 = vmatpush.msra.mxu2 %v1624_v32 }
 0xe8d   :  { %v1446_v16 = vsel %vm293_vm7, %v1442_v37, 0.0  ;;  %1646 = vmatpush.msra.mxu2 %v1623_v0 }
 0xe8f   :  { %1647 = vmatpush.msra.mxu2 %v1622_v33 }
 0xe91   :  { %1648 = vmatpush.msra.mxu2 %v1621_v3 }
 0xe93   :  { %1649 = vmatpush.msra.mxu2 %v1620_v35 }
 0xf01   :  { %v1397_v29 = vpop.f32.mrf.mxu0 }
 0xf02   :  { %1401 = vrot.lane.b32.xlu0 %v1397_v29, %s2098_s21 }
 0xf08   :  { %v1317_v27 = vpop.f32.mrf.mxu3 }
 0xf2c   :  { %1447 = vadd.xlane.f32.xlu0 %v1446_v16 }
 0xf74   :  { %v1402_v38 = vpop.permute.xlu0 %1401 }
 0xf75   :  { %v1404_v39 = vsel %vm399_vm13, %v1317_v27, %v1402_v38 }
 0xf76   :  { %1860 = vmatmul.msk.f32.gmra.mxu1 %vm293_vm7, %v1404_v39  ;;  %v1618_v39 = vld [vmem:[%s2705_s26 + $0x8] sm:$0xff] }
 0xf9f   :  { %v1448_v41 = vpop.xlane.xlu0 %1447 }
 0xfa0   :  { %v1452_v42 = vmul.f32 %v1448_v41, %v2321_v55 }
 0xfa2   :  { %v1454_v45 = vsub.f32 %v1442_v37, %v1452_v42  ;;  %v1619_v37 = vld [vmem:[%s2705_s26 + $0x10] sm:$0xff]  ;;  %v1617_v42 = vld [vmem:[%s2705_s26] sm:$0xff] }
 0xfa3   :  { %1650 = vmatpush.msra.mxu2 %v1619_v37 }
 0xfa4   :  { %v1456_v46 = vmul.f32 %v1454_v45, %v1454_v45 }
 0xfa5   :  { %1651 = vmatpush.msra.mxu2 %v1618_v39 }
 0xfa6   :  { %v1458_v47 = vsel %vm293_vm7, %v1456_v46, 0.0 }
 0xfa7   :  { %1459 = vadd.xlane.f32.xlu1 %v1458_v47  ;;  %1652 = vmatpush.msra.mxu2 %v1617_v42 }
 0xff3   :  { %v1439_v48 = vpop.f32.mrf.mxu1 }
 0xff4   :  { %v1440_v9 = vadd.f32 %v1924_v34, %v1439_v48 }
 0xff6   :  { %v1443_v49 = vadd.f32 %v1440_v9, %v2527_v52 }
 0xff8   :  { %v1449_v50 = vsel %vm293_vm7, %v1443_v49, 0.0 }
 0xff9   :  { %1450 = vadd.xlane.f32.xlu2 %v1449_v50 }
0x101a   :  { %v1460_v56 = vpop.xlane.xlu1 %1459 }
0x101b   :  { %v1464_v57 = vmul.f32 %v1460_v56, %v2321_v55 }
0x101d   :  { %v1466_v58 = vadd.f32 1e-12, %v1464_v57 }
0x101f   :  { %1985 = vrsqrt.f32 %v1466_v58  ;;  %vm1474_vm13 = vweird.f32 %v1466_v58 }
0x1025   :  { %v1986_v59 = vpop.eup %1985 }
0x1026   :  { %v1469_v60 = vmul.f32 %v1986_v59, %v1466_v58  ;;  %vm1475_vm0 = vweird.f32 %v1986_v59 }
0x1027   :  { %vm1476_vm4 = vmor %vm1474_vm13, %vm1475_vm0 }
0x1028   :  { %v1470_v61 = vmul.f32 %v1986_v59, %v1469_v60 }
0x102a   :  { %v1471_v44 = vmul.f32 0.5, %v1470_v61 }
0x102c   :  { %v1472_v63 = vsub.f32 1.5, %v1471_v44 }
0x102e   :  { %v1473_v2 = vmul.f32 %v1986_v59, %v1472_v63 }
0x1030   :  { %v1477_v6 = vsel %vm1476_vm4, %v1986_v59, %v1473_v2 }
0x1031   :  { %v1488_v8 = vmul.f32 %v1477_v6, %v1454_v45 }
0x1033   :  { %v1493_v43 = vmul.f32 %v2591_v4, %v1488_v8 }
0x1035   :  { %v2598_v12 = vadd.f32 %v2594_v11, %v1493_v43 }
0x1037   :  { %1861 = vmatmul.msk.f32.vlgmr.msrb.gmra.mxu3 %vm293_vm7, %v2598_v12 }
0x106c   :  { %v1451_v13 = vpop.xlane.xlu2 %1450 }
0x106d   :  { %v1453_v14 = vmul.f32 %v1451_v13, %v2321_v55 }
0x106f   :  { %v2603_v15 = vsub.f32 %v1443_v49, %v1453_v14 }
0x1071   :  { %v1457_v62 = vmul.f32 %v2603_v15, %v2603_v15 }
0x1073   :  { %v1461_v17 = vsel %vm293_vm7, %v1457_v62, 0.0 }
0x1074   :  { %1462 = vadd.xlane.f32.xlu0 %v1461_v17 }
0x10ba   :  { %v1531_v22 = vpop.f32.mrf.mxu3 }
0x10bb   :  { %v2616_v23 = vadd.f32 %v2611_v10, %v1531_v22 }
0x10bd   :  { %v2620_v24 = vmul.f32 0.70710677, %v2616_v23  ;;  %v1537_v13 = vmul.f32 0.5, %v2616_v23 }
0x10bf   :  { %v1541_v18 = vand.u32 2147483647, %v2620_v24  ;;  %vm1607_vm10 = vcmp.ge.f32.partialorder %v2620_v24, 0.0 }
0x10c1   :  { %v1543_v28 = vmul.f32 0.3275911, %v1541_v18  ;;  %v1595_v48 = vsub.f32 0.0, %v1541_v18 }
0x10c3   :  { %v1545_v31 = vadd.f32 1.0, %v1543_v28  ;;  %v1597_v50 = vmul.f32 %v1595_v48, %v1541_v18  ;;  %v1928_v18 = vld [vmem:[%s2707_s1] ss:$0 sm:$0xff] }
0x10c5   :  { %1987 = vrcp.f32 %v1545_v31  ;;  %v1558_v16 = vand.u32 2147483648, %v1545_v31  ;;  %v1556_v38 = vand.u32 2147483647, %v1545_v31  ;;  %vm1552_vm6 = vweird.f32 %v1545_v31 }
0x10c6   :  { %v1599_v53 = vmul.f32 1.442695, %v1597_v50 }
0x10c7   :  { %v1559_v45 = vor.u32 1.1754944e-38, %v1558_v16  ;;  %vm1557_vm9 = vcmp.eq.f32.partialorder %v1556_v38, 8.507059e+37 }
0x10c8   :  { %1989 = vpow2.f32 %v1599_v53 }
0x10cb   :  { %v1988_v29 = vpop.eup %1987 }
0x10cc   :  { %v1548_v34 = vmul.f32 %v1988_v29, %v1545_v31  ;;  %vm1553_vm5 = vweird.f32 %v1988_v29 }
0x10cd   :  { %vm1554_vm8 = vmor %vm1552_vm6, %vm1553_vm5 }
0x10ce   :  { %v1549_v36 = vsub.f32 1.0, %v1548_v34  ;;  %v1990_v60 = vpop.eup %1989 }
0x10d0   :  { %v1550_v27 = vmul.f32 %v1988_v29, %v1549_v36 }
0x10d2   :  { %v1551_v41 = vadd.f32 %v1988_v29, %v1550_v27 }
0x10d4   :  { %v1555_v46 = vsel %vm1554_vm8, %v1988_v29, %v1551_v41 }
0x10d5   :  { %v1560_v47 = vsel %vm1557_vm9, %v1559_v45, %v1555_v46 }
0x10d6   :  { %v1577_v9 = vmul.f32 1.0614054, %v1560_v47 }
0x10d8   :  { %v1579_v49 = vadd.f32 -1.4531521, %v1577_v9 }
0x10da   :  { %v1581_v51 = vmul.f32 %v1579_v49, %v1560_v47 }
0x10dc   :  { %v1583_v40 = vadd.f32 1.4214138, %v1581_v51 }
0x10de   :  { %v1585_v54 = vmul.f32 %v1583_v40, %v1560_v47 }
0x10e0   :  { %v1587_v56 = vadd.f32 -0.28449672, %v1585_v54 }
0x10e2   :  { %v1589_v57 = vmul.f32 %v1587_v56, %v1560_v47 }
0x10e4   :  { %v1591_v58 = vadd.f32 0.2548296, %v1589_v57 }
0x10e6   :  { %v1593_v59 = vmul.f32 %v1591_v58, %v1560_v47 }
0x10e7   :  { %v1463_v61 = vpop.xlane.xlu0 %1462 }
0x10e8   :  { %v1603_v44 = vmul.f32 %v1990_v60, %v1593_v59  ;;  %v1465_v63 = vmul.f32 %v1463_v61, %v2321_v55 }
0x10ea   :  { %v1605_v2 = vsub.f32 1.0, %v1603_v44  ;;  %v1467_v6 = vadd.f32 1e-12, %v1465_v63 }
0x10ec   :  { %v1609_v8 = vsub.f32 0.0, %v1605_v2  ;;  %1991 = vrsqrt.f32 %v1467_v6  ;;  %vm1484_vm12 = vweird.f32 %v1467_v6 }
0x10ee   :  { %v1611_v43 = vsel %vm1607_vm10, %v1605_v2, %v1609_v8  ;;  %vm1743_vm10 = vcmask 1040384  }
0x10ef   :  { %v1613_v14 = vadd.f32 1.0, %v1611_v43 }
0x10f1   :  { %v1615_v62 = vmul.f32 %v1613_v14, %v1537_v13 }
0x10f2   :  { %v1992_v17 = vpop.eup %1991 }
0x10f3   :  { %v1479_v19 = vmul.f32 %v1992_v17, %v1467_v6  ;;  %1653 = vmatmul.f32.vlgmr.msra.gmra.mxu2 %v1615_v62  ;;  %vm1485_vm11 = vweird.f32 %v1992_v17 }
0x10f4   :  { %vm1486_vm14 = vmor %vm1484_vm12, %vm1485_vm11  ;;  %vm1745_vm11 = vcmask 254976  }
0x10f5   :  { %v1480_v20 = vmul.f32 %v1992_v17, %v1479_v19 }
0x10f7   :  { %v1481_v7 = vmul.f32 0.5, %v1480_v20 }
0x10f9   :  { %v1482_v22 = vsub.f32 1.5, %v1481_v7 }
0x10fb   :  { %v1483_v21 = vmul.f32 %v1992_v17, %v1482_v22 }
0x10fd   :  { %v1487_v1 = vsel %vm1486_vm14, %v1992_v17, %v1483_v21 }
0x10fe   :  { %v1489_v25 = vmul.f32 %v1487_v1, %v2603_v15 }
0x1100   :  { %v1494_v24 = vmul.f32 %v2591_v4, %v1489_v25 }
0x1102   :  { %v1499_v23 = vadd.f32 %v2594_v11, %v1494_v24 }
0x1104   :  { %1862 = vmatmul.msk.f32.gmra.mxu3 %vm293_vm7, %v1499_v23 }
0x1176   :  { %v1654_v26 = vpop.f32.mrf.mxu2 }
0x1177   :  { %v1655_v28 = vadd.f32 %v1928_v18, %v1654_v26 }
0x1179   :  { %v1660_v30 = vadd.f32 %v1655_v28, %v2598_v12 }
0x117b   :  { %v1664_v31 = vsel %vm293_vm7, %v1660_v30, 0.0 }
0x117c   :  { %1665 = vadd.xlane.f32.xlu2 %v1664_v31 }
0x1187   :  { %v1534_v32 = vpop.f32.mrf.mxu3 }
0x1188   :  { %v1535_v0 = vadd.f32 %v2611_v10, %v1534_v32  ;;  %v1929_v32 = vld [vmem:[%s2265_s6] ss:$0 sm:$0xff]  ;;  %s2100_s6 = smov [#allocation4]  }
0x118a   :  { %v1540_v33 = vmul.f32 0.70710677, %v1535_v0  ;;  %v1538_v58 = vmul.f32 0.5, %v1535_v0 }
0x118c   :  { %v1542_v3 = vand.u32 2147483647, %v1540_v33  ;;  %vm1608_vm0 = vcmp.ge.f32.partialorder %v1540_v33, 0.0 }
0x118e   :  { %v1544_v15 = vmul.f32 0.3275911, %v1542_v3  ;;  %v1596_v38 = vsub.f32 0.0, %v1542_v3 }
0x1190   :  { %v1546_v29 = vadd.f32 1.0, %v1544_v15  ;;  %v1598_v42 = vmul.f32 %v1596_v38, %v1542_v3  ;;  %v1930_v15 = vld [vmem:[%s2270_s27] ss:$0 sm:$0xff]  ;;  %s1771_s27 = sshll.u32 %s2100_s6, 4  ;;  %s1772_s27 = int_to_ptr.vmem [resolvable:$true] %s1771_s27 }
0x1192   :  { %1993 = vrcp.f32 %v1546_v29  ;;  %v1573_v35 = vand.u32 2147483648, %v1546_v29  ;;  %v1571_v37 = vand.u32 2147483647, %v1546_v29  ;;  %vm1567_vm1 = vweird.f32 %v1546_v29 }
0x1193   :  { %v1601_v47 = vmul.f32 1.442695, %v1598_v42 }
0x1194   :  { %v1574_v16 = vor.u32 1.1754944e-38, %v1573_v35  ;;  %vm1572_vm3 = vcmp.eq.f32.partialorder %v1571_v37, 8.507059e+37  ;;  %v2099_v37 = vmov 8.0  }
0x1195   :  { %1995 = vpow2.f32 %v1601_v47 }
0x1198   :  { %v1994_v4 = vpop.eup %1993 }
0x1199   :  { %v1563_v11 = vmul.f32 %v1994_v4, %v1546_v29  ;;  %vm1568_vm15 = vweird.f32 %v1994_v4 }
0x119a   :  { %vm1569_vm2 = vmor %vm1567_vm1, %vm1568_vm15 }
0x119b   :  { %v1564_v34 = vsub.f32 1.0, %v1563_v11  ;;  %v1996_v40 = vpop.eup %1995 }
0x119d   :  { %v1565_v36 = vmul.f32 %v1994_v4, %v1564_v34 }
0x119f   :  { %v1566_v12 = vadd.f32 %v1994_v4, %v1565_v36 }
0x11a1   :  { %v1570_v27 = vsel %vm1569_vm2, %v1994_v4, %v1566_v12 }
0x11a2   :  { %v1575_v10 = vsel %vm1572_vm3, %v1574_v16, %v1570_v27 }
0x11a3   :  { %v1578_v39 = vmul.f32 1.0614054, %v1575_v10 }
0x11a5   :  { %v1580_v41 = vadd.f32 -1.4531521, %v1578_v39 }
0x11a7   :  { %v1582_v45 = vmul.f32 %v1580_v41, %v1575_v10 }
0x11a9   :  { %v1584_v46 = vadd.f32 1.4214138, %v1582_v45 }
0x11ab   :  { %v1586_v48 = vmul.f32 %v1584_v46, %v1575_v10 }
0x11ad   :  { %v1588_v9 = vadd.f32 -0.28449672, %v1586_v48 }
0x11af   :  { %v1590_v49 = vmul.f32 %v1588_v9, %v1575_v10 }
0x11b1   :  { %v1592_v50 = vadd.f32 0.2548296, %v1590_v49 }
0x11b3   :  { %v1594_v51 = vmul.f32 %v1592_v50, %v1575_v10 }
0x11b5   :  { %v1604_v53 = vmul.f32 %v1996_v40, %v1594_v51 }
0x11b7   :  { %v1606_v54 = vsub.f32 1.0, %v1604_v53 }
0x11b9   :  { %v1610_v56 = vsub.f32 0.0, %v1606_v54 }
0x11bb   :  { %v1612_v57 = vsel %vm1608_vm0, %v1606_v54, %v1610_v56 }
0x11bc   :  { %v1614_v59 = vadd.f32 1.0, %v1612_v57 }
0x11be   :  { %v1616_v60 = vmul.f32 %v1614_v59, %v1538_v58 }
0x11c0   :  { %1656 = vmatmul.f32.gmra.mxu2 %v1616_v60 }
0x11ef   :  { %v1666_v61 = vpop.xlane.xlu2 %1665 }
0x11f0   :  { %v1670_v44 = vmul.f32 %v1666_v61, %v2321_v55 }
0x11f2   :  { %v1672_v63 = vsub.f32 %v1660_v30, %v1670_v44 }
0x11f4   :  { %v1674_v2 = vmul.f32 %v1672_v63, %v1672_v63 }
0x11f6   :  { %v1676_v6 = vsel %vm293_vm7, %v1674_v2, 0.0 }
0x11f7   :  { %1677 = vadd.xlane.f32.xlu1 %v1676_v6 }
0x1243   :  { %v1657_v8 = vpop.f32.mrf.mxu2 }
0x1244   :  { %v1658_v43 = vadd.f32 %v1928_v18, %v1657_v8 }
0x1246   :  { %v1661_v13 = vadd.f32 %v1658_v43, %v1499_v23 }
0x1248   :  { %v1667_v14 = vsel %vm293_vm7, %v1661_v13, 0.0 }
0x1249   :  { %1668 = vadd.xlane.f32.xlu0 %v1667_v14 }
0x126a   :  { %v1678_v22 = vpop.xlane.xlu1 %1677 }
0x126b   :  { %v1682_v21 = vmul.f32 %v1678_v22, %v2321_v55 }
0x126d   :  { %v1684_v1 = vadd.f32 1e-12, %v1682_v21 }
0x126f   :  { %1997 = vrsqrt.f32 %v1684_v1  ;;  %vm1692_vm4 = vweird.f32 %v1684_v1 }
0x1275   :  { %v1998_v25 = vpop.eup %1997 }
0x1276   :  { %v1687_v24 = vmul.f32 %v1998_v25, %v1684_v1  ;;  %vm1693_vm13 = vweird.f32 %v1998_v25 }
0x1277   :  { %vm1694_vm5 = vmor %vm1692_vm4, %vm1693_vm13 }
0x1278   :  { %v1688_v23 = vmul.f32 %v1998_v25, %v1687_v24 }
0x127a   :  { %v1689_v18 = vmul.f32 0.5, %v1688_v23 }
0x127c   :  { %v1690_v26 = vsub.f32 1.5, %v1689_v18 }
0x127e   :  { %v1691_v28 = vmul.f32 %v1998_v25, %v1690_v26 }
0x1280   :  { %v1695_v30 = vsel %vm1694_vm5, %v1998_v25, %v1691_v28 }
0x1281   :  { %v1706_v0 = vmul.f32 %v1695_v30, %v1672_v63 }
0x1283   :  { %v1711_v29 = vmul.f32 %v1929_v32, %v1706_v0 }
0x1285   :  { %v1716_v4 = vadd.f32 %v1930_v15, %v1711_v29 }
0x1287   :  { %v1718_v35 = vadd.f32 %v1716_v4, %v2511_v5  ;;  %v1748_v49 = vrot.slane %v1716_v4, 7 }
0x1289   :  { %v1720_v16 = vsel %vm293_vm7, %v1718_v35, 0.0 }
0x12bc   :  { %v1669_v62 = vpop.xlane.xlu0 %1668 }
0x12bd   :  { %v1671_v17 = vmul.f32 %v1669_v62, %v2321_v55 }
0x12bf   :  { %v1673_v19 = vsub.f32 %v1661_v13, %v1671_v17 }
0x12c1   :  { %v1675_v20 = vmul.f32 %v1673_v19, %v1673_v19 }
0x12c3   :  { %v1679_v7 = vsel %vm293_vm7, %v1675_v20, 0.0 }
0x12c4   :  { %1680 = vadd.xlane.f32.xlu2 %v1679_v7 }
0x1337   :  { %v1681_v31 = vpop.xlane.xlu2 %1680 }
0x1338   :  { %v1683_v33 = vmul.f32 %v1681_v31, %v2321_v55  ;;  %v1721_v55 = vrot.slane %v1720_v16, 4 }
0x133a   :  { %v1685_v3 = vadd.f32 1e-12, %v1683_v33  ;;  %v1722_v42 = vadd.f32 %v1721_v55, %v1720_v16 }
0x133c   :  { %1999 = vrsqrt.f32 %v1685_v3  ;;  %vm1702_vm8 = vweird.f32 %v1685_v3  ;;  %v1723_v47 = vrot.slane %v1722_v42, 2 }
0x133d   :  { %2001 = vrcp.f32 %v2099_v37 }
0x133e   :  { %v1724_v53 = vadd.f32 %v1723_v47, %v1722_v42 }
0x1342   :  { %v2000_v11 = vpop.eup %1999 }
0x1343   :  { %v1697_v34 = vmul.f32 %v2000_v11, %v1685_v3  ;;  %vm1703_vm6 = vweird.f32 %v2000_v11  ;;  %v2002_v10 = vpop.eup %2001 }
0x1344   :  { %vm1704_vm9 = vmor %vm1702_vm8, %vm1703_vm6  ;;  %v1728_v45 = vmul.f32 8.0, %v2002_v10 }
0x1345   :  { %v1698_v36 = vmul.f32 %v2000_v11, %v1697_v34 }
0x1346   :  { %v1729_v48 = vsub.f32 1.0, %v1728_v45 }
0x1347   :  { %v1699_v12 = vmul.f32 0.5, %v1698_v36 }
0x1348   :  { %v1730_v56 = vmul.f32 %v2002_v10, %v1729_v48 }
0x1349   :  { %v1700_v27 = vsub.f32 1.5, %v1699_v12 }
0x134b   :  { %v1701_v38 = vmul.f32 %v2000_v11, %v1700_v27 }
0x134d   :  { %v1705_v39 = vsel %vm1704_vm9, %v2000_v11, %v1701_v38 }
0x134e   :  { %v1707_v41 = vmul.f32 %v1705_v39, %v1673_v19 }
0x1350   :  { %v1712_v46 = vmul.f32 %v1929_v32, %v1707_v41 }
0x1352   :  { %v1717_v5 = vadd.f32 %v1930_v15, %v1712_v46 }
0x1354   :  { %v1719_v9 = vadd.f32 %v1717_v5, %v2527_v52  ;;  %v1751_v50 = vrot.slane %v1717_v5, 6 }
0x1356   :  { %v1735_v51 = vsel %vm293_vm7, %v1719_v9, 0.0  ;;  %v1753_v40 = vsel %vm1743_vm10, %v1748_v49, %v1751_v50 }
0x1357   :  { %v1736_v54 = vrot.slane %v1735_v51, 4  ;;  %1754 = vst.msk [vmem:[#allocation4] sm:$0x3] %vm1745_vm11, %v1753_v40 }
0x1358   :  { %2026 = shalt.err (!%p2023_p4)
}
0x1359   :  { %1776 = dma.vmem_to_hbm [thread:$0]  %s1772_s27, 32, %s1774_s2, [#allocation5]   ;;  %v1737_v52 = vadd.f32 %v1736_v54, %v1735_v51  ;;  %v1725_v57 = vrot.slane %v1724_v53, 1  ;;  %v1731_v59 = vadd.f32 %v2002_v10, %v1730_v56  ;;  %vm1732_vm7 = vweird.f32 %v2002_v10 }
0x135a   :  { %s2101_s0 = smov [#allocation2]   ;;  %s1762_s5 = sshll.u32 %s2275_s4, 4  ;;  %s1763_s5 = int_to_ptr.hbm [resolvable:$true] %s1762_s5 }
0x135b   :  { %v1738_v58 = vrot.slane %v1737_v52, 2  ;;  %v1726_v61 = vadd.f32 %v1725_v57, %v1724_v53  ;;  %v1733_v63 = vsel %vm1732_vm7, %v2002_v10, %v1731_v59  ;;  %s1760_s12 = sshll.u32 %s2101_s0, 4  ;;  %s2039_s9 = sshra.s32 %s1763_s5, 4  ;;  %s1761_s12 = int_to_ptr.vmem [resolvable:$true] %s1760_s12  ;;  %s2040_s9 = int_to_ptr.hbm [resolvable:$true] %s2039_s9 }
0x135c   :  { %s2041_s13 = scalar_lea.hbm %s2040_s9, 2  ;;  %s2043_s17 = scalar_lea.hbm %s2275_s4, 2 }
0x135d   :  { %v1739_v60 = vadd.f32 %v1738_v58, %v1737_v52  ;;  %v1734_v6 = vmul.f32 %v1733_v63, %v1726_v61  ;;  %p2042_p5 = scmp.ne.s32.totalorder %s2040_s9, %s2041_s13  ;;  %p2044_p6 = scmp.lt.s32.totalorder %s2040_s9, %s2275_s4 }
0x135e   :  { %p2045_p7 = scmp.lt.s32.totalorder %s2043_s17, %s2041_s13 }
0x135f   :  { %v1740_v44 = vrot.slane %v1739_v60, 1 }
0x1360   :  { %p2046_p8 = por %p2045_p7, %p2044_p6 }
0x1361   :  { %v1741_v2 = vadd.f32 %v1740_v44, %v1739_v60 }
0x1362   :  { %p2047_p9 = pnand %p2046_p8, %p2042_p5 }
0x1363   :  { %v1742_v8 = vmul.f32 %v1741_v2, %v1733_v63 }
0x1365   :  { %v1744_v43 = vsel %vm1743_vm10, %v1734_v6, %v1742_v8 }
0x1366   :  { %1746 = vst.msk [vmem:[#allocation2] sm:$0x3] %vm1745_vm11, %v1744_v43 }
0x1367   :  { %2050 = shalt.err (!%p2047_p9)
}
0x1368   :  { %1765 = dma.vmem_to_hbm [thread:$0]  %s1761_s12, 32, %s1763_s5, [#allocation3]  }
0x1369   :  { %2051 = dma.done.wait [#allocation3], 32  }
0x136a   :  { %2052 = vsyncadd [#allocation3], 4294967264 }
0x136b   :  { %2053 = dma.done.wait [#allocation5], 32  }
0x136c   :  { %2054 = vsyncadd [#allocation5], 4294967264 }
0x136d   :  { %1785 = vsyncpa [#allocation3], 1 }
0x136e   :  { %1786 = vsyncpa [#allocation5], 1 }

</bundles_post_ra>
